<compile_context>
chip_gen: v7x
topology: tpu7x:2x2x1
jax: 0.10.0
libtpu: 0.0.40
codegen_flags: <defaults>
</compile_context>

<pallas_src>
import functools

import numpy as np

import jax
import jax.numpy as jnp
from jax.experimental import pallas as pl
from jax.experimental.pallas import tpu as pltpu


# ----------------------------------------------------------------------------
# Conv block kernel: Conv3x3 (3 accumulated tap-matmuls) + folded BN2d + ReLU
# + MaxPool2, batch-blocked with a spacer-row padded LHS.
# ----------------------------------------------------------------------------

def conv_block_kernel(*refs, fin, cin, cout, fuse_bn, bt):
    if fuse_bn:
        x_ref, bn_s_ref, bn_b_ref, w_ref, s_ref, b_ref, o_ref, xpad_ref = refs
    else:
        x_ref, w_ref, s_ref, b_ref, o_ref, xpad_ref = refs

    tin = x_ref.shape[1]
    seg = fin * cin                    # lanes contributed by one time tap
    half = (fin // 2) * cout
    tout = tin // 2
    stride_in = tin + 1                # one zero spacer row between batch chunks
    m_all = bt * stride_in - 1         # matmul M covering all batches (+ junk rows)
    dtype = xpad_ref.dtype

    # Build the batched, spacer-padded LHS in VMEM.  Only the bt+1 halo/spacer rows
    # are zeroed (not the whole scratch); interior stores are lane-aligned bf16.
    zrow = jnp.zeros((1, seg), dtype)
    xpad_ref[0:1, :] = zrow
    for b in range(bt):
        x = x_ref[b]                                        # (tin, seg)
        if fuse_bn:                                         # folded BatchNorm1d
            x = x * bn_s_ref[...] + bn_b_ref[...]
        lo = b * stride_in + 1
        xpad_ref[lo:lo + tin, :] = x.astype(dtype)
        xpad_ref[lo + tin:lo + tin + 1, :] = zrow           # right halo / spacer

    # Conv as three accumulated matmuls over the time taps (freq taps + input
    # channels are folded into the banded weight); bf16 operands, f32 accumulate.
    acc = jnp.zeros((m_all, fin * cout), jnp.float32)
    for dt in range(3):
        acc = acc + jnp.dot(xpad_ref[dt:dt + m_all, :],
                            w_ref[dt * seg:(dt + 1) * seg, :],
                            preferred_element_type=jnp.float32)

    # Folded conv-bias + BatchNorm2d + ReLU (f32 elementwise).
    y = jnp.maximum(acc * s_ref[...] + b_ref[...], 0.0)

    # MaxPool2d(2): freq pool = max of the two 128-lane halves (even/odd freqs are
    # interleaved into halves by the weight layout); time pool = pairwise row max
    # per batch chunk.  One bulk (bt, tout, half) output store.
    yfreq = jnp.maximum(y[:, :half], y[:, half:])           # (m_all, half)
    outs = []
    for b in range(bt):
        yb = yfreq[b * stride_in:b * stride_in + tin, :]    # (tin, half)
        yb = yb.reshape(tout, 2, half)
        outs.append(jnp.maximum(yb[:, 0, :], yb[:, 1, :]).astype(o_ref.dtype))
    o_ref[...] = jnp.stack(outs, axis=0)


def _pick_batch_block(B, cap):
    for cand in range(min(cap, B), 0, -1):
        if B % cand == 0:
            return cand
    return 1


def conv_block(x, w_big, out_scale, out_bias, *, fin, cin, cout,
               bn_scale=None, bn_bias=None, batch_block=8):
    B, tin, win = x.shape
    assert win == fin * cin
    assert tin % 2 == 0, "MaxPool2d(2) requires an even time extent at every stage"
    k_dim, n_dim = w_big.shape
    tout, nout = tin // 2, (fin // 2) * cout
    fuse_bn = bn_scale is not None
    bt = _pick_batch_block(B, batch_block)

    kernel = functools.partial(conv_block_kernel, fin=fin, cin=cin, cout=cout,
                               fuse_bn=fuse_bn, bt=bt)

    inputs = [x]
    in_specs = [pl.BlockSpec((bt, tin, win), lambda b: (b, 0, 0))]
    if fuse_bn:
        inputs += [bn_scale, bn_bias]
        in_specs += [pl.BlockSpec((1, win), lambda b: (0, 0))] * 2
    inputs += [w_big, out_scale, out_bias]
    in_specs += [pl.BlockSpec((k_dim, n_dim), lambda b: (0, 0)),
                 pl.BlockSpec((1, n_dim), lambda b: (0, 0)),
                 pl.BlockSpec((1, n_dim), lambda b: (0, 0))]

    return pl.pallas_call(
        kernel,
        out_shape=jax.ShapeDtypeStruct((B, tout, nout), jnp.bfloat16),
        grid=(B // bt,),
        in_specs=in_specs,
        out_specs=pl.BlockSpec((bt, tout, nout), lambda b: (b, 0, 0)),
        scratch_shapes=[pltpu.VMEM((bt * (tin + 1) + 1, fin * cin), jnp.bfloat16)],
        compiler_params=pltpu.CompilerParams(dimension_semantics=("parallel",)),
    )(*inputs)


# ----------------------------------------------------------------------------
# Fused bidirectional GRU + Linear + sigmoid + linear-softmax pooling
# ----------------------------------------------------------------------------

def gru_head_kernel(x_ref, wih_ref, whh_ref, bih_ref, bhh_ref, fcw_ref, fcb_ref,
                    time_ref, clip_ref, hf_sc, hb_sc):
    B, T, D = x_ref.shape
    H = whh_ref.shape[1]
    C = fcb_ref.shape[-1]

    xflat = x_ref[...].reshape(B * T, D).astype(jnp.bfloat16)

    for d, h_sc in ((0, hf_sc), (1, hb_sc)):
        # Hoisted, gate-fused input projection: ONE (B*T, D) x (D, 3H) matmul per
        # direction (gate order [r | z | n] along the lane dim).
        gix = (jnp.dot(xflat, wih_ref[d], preferred_element_type=jnp.float32)
               + bih_ref[d]).reshape(B, T, 3 * H)
        h = jnp.zeros((B, H), jnp.float32)
        hbf = jnp.zeros((B, H), jnp.bfloat16)
        steps = range(T) if d == 0 else range(T - 1, -1, -1)
        for t in steps:
            # TODO(synk): for long sequences switch to lax.fori_loop over a VMEM
            # gix scratch, and on v7x shard the two directions across TensorCores.
            # Gate-fused hidden projection: ONE (B, H) x (H, 3H) matmul per step.
            gh = (jnp.dot(hbf, whh_ref[d], preferred_element_type=jnp.float32)
                  + bhh_ref[d])
            gx = gix[:, t, :]
            r = jax.nn.sigmoid(gx[:, 0:H] + gh[:, 0:H])
            z = jax.nn.sigmoid(gx[:, H:2 * H] + gh[:, H:2 * H])
            n = jnp.tanh(gx[:, 2 * H:3 * H] + r * gh[:, 2 * H:3 * H])
            h = (1.0 - z) * n + z * h
            hbf = h.astype(jnp.bfloat16)              # one cast/step, reused below
            h_sc[:, t:t + 1, :] = hbf[:, None, :]

    # Batched head: ONE (B*T, 2H) x (2H, C) matmul + sigmoid, one bulk time_probs
    # store, then linear-softmax pooling over time as two axis reductions.
    hcat = jnp.concatenate([hf_sc[...].reshape(B * T, H),
                            hb_sc[...].reshape(B * T, H)], axis=1)
    logits = (jnp.dot(hcat, fcw_ref[...], preferred_element_type=jnp.float32)
              + fcb_ref[...])
    p = jax.nn.sigmoid(logits).reshape(B, T, C)
    time_ref[...] = p
    num = jnp.sum(p * p, axis=1)
    den = jnp.sum(p, axis=1)
    clip_ref[...] = num / den


def bigru_head(x, params):
    B, T, _ = x.shape
    C = params['fc_b'].shape[-1]
    H = params['gru_whh'].shape[1]
    args = (x, params['gru_wih'], params['gru_whh'], params['gru_bih'],
            params['gru_bhh'], params['fc_w'], params['fc_b'])
    vmem = pl.BlockSpec(memory_space=pltpu.MemorySpace.VMEM)
    return pl.pallas_call(
        gru_head_kernel,
        out_shape=(jax.ShapeDtypeStruct((B, T, C), jnp.float32),
                   jax.ShapeDtypeStruct((B, C), jnp.float32)),
        in_specs=[vmem] * len(args),
        out_specs=(vmem, vmem),
        scratch_shapes=[pltpu.VMEM((B, T, H), jnp.bfloat16),
                        pltpu.VMEM((B, T, H), jnp.bfloat16)],
    )(*args)


# ----------------------------------------------------------------------------
# Parameter construction (deterministic synthetic weights, PyTorch conventions)
# ----------------------------------------------------------------------------

def fold_conv_weight(w_pt, fin, cin, cout):
    """Fold a PyTorch (Cout, Cin, kh, kw) 3x3 conv weight into the banded matrix
    used by conv_block_kernel (no padded-frequency rows: they always multiply 0).

    row k = (dt*fin + fi)*cin + ci   (dt: time tap, fi: input frequency, ci)
    col j = ((f%2)*(fin//2) + f//2)*cout + co   (even/odd output freqs in separate
             halves so the freq max-pool is max(y[:, :half], y[:, half:]))
    """
    wb = np.zeros((3 * fin * cin, fin * cout), np.float32)
    w_np = np.asarray(w_pt, np.float32)
    for dt in range(3):              # time tap  (PyTorch kw)
        for df in range(3):          # freq tap  (PyTorch kh)
            for f in range(fin):
                fi = f + df - 1      # input frequency hit by this tap
                if fi < 0 or fi >= fin:
                    continue         # falls into the zero frequency padding
                j0 = ((f % 2) * (fin // 2) + f // 2) * cout
                for ci in range(cin):
                    k = (dt * fin + fi) * cin + ci
                    wb[k, j0:j0 + cout] = w_np[:, ci, df, dt]
    return jnp.asarray(wb, jnp.bfloat16)


def init_params(key, num_freq, class_num):
    eps = 1e-5
    keys = iter(jax.random.split(key, 64))

    def nrm(shape, s=0.1):
        return s * jax.random.normal(next(keys), shape, jnp.float32)

    p = {}

    # nn.BatchNorm1d(num_freq), eval mode, folded to a per-frequency affine.
    g = 1.0 + nrm((num_freq,))
    beta = nrm((num_freq,))
    mu = nrm((num_freq,))
    var = 1.0 + 0.1 * jax.random.uniform(next(keys), (num_freq,))
    s = g / jnp.sqrt(var + eps)
    p['bn0_scale'] = s.reshape(1, num_freq)
    p['bn0_bias'] = (beta - mu * s).reshape(1, num_freq)

    def conv_block_params(fin, cin, cout):
        w = nrm((cout, cin, 3, 3))        # PyTorch Conv2d weight (Cout, Cin, kh, kw)
        cb = nrm((cout,))                 # conv bias
        g = 1.0 + nrm((cout,))
        beta = nrm((cout,))
        mu = nrm((cout,))
        var = 1.0 + 0.1 * jax.random.uniform(next(keys), (cout,))
        sc = g / jnp.sqrt(var + eps)      # folded BN2d scale
        w_big = fold_conv_weight(w, fin, cin, cout)
        out_scale = jnp.tile(sc, fin).reshape(1, fin * cout)
        out_bias = jnp.tile((cb - mu) * sc + beta, fin).reshape(1, fin * cout)
        return w_big, out_scale, out_bias

    p['cb1'] = conv_block_params(num_freq, 1, 16)
    p['cb2'] = conv_block_params(num_freq // 2, 16, 32)
    p['cb3'] = conv_block_params(num_freq // 4, 32, 64)

    F8 = num_freq // 8
    C64 = 64
    D = F8 * C64
    H = 64

    # Our conv-3 output feature order is f*64 + c; PyTorch's flatten gives c*F8 + f.
    # Fold that permutation into the GRU input weights (mathematically identical).
    perm = np.array([c * F8 + f for f in range(F8) for c in range(C64)], np.int64)

    def gru_dir_params():
        wih_pt = np.asarray(nrm((3 * H, D)))      # PyTorch weight_ih, gates [r, z, n]
        whh_pt = np.asarray(nrm((3 * H, H)))      # PyTorch weight_hh
        bih_pt = np.asarray(nrm((3 * H,)))
        bhh_pt = np.asarray(nrm((3 * H,)))
        wih = wih_pt[:, perm].T                   # (D, 3H), gate blocks [r | z | n]
        whh = whh_pt.T                            # (H, 3H)
        return wih, whh, bih_pt.reshape(1, 3 * H), bhh_pt.reshape(1, 3 * H)

    fw = gru_dir_params()
    bw = gru_dir_params()
    p['gru_wih'] = jnp.asarray(np.stack([fw[0], bw[0]]), jnp.bfloat16)   # (2, D, 3H)
    p['gru_whh'] = jnp.asarray(np.stack([fw[1], bw[1]]), jnp.bfloat16)   # (2, H, 3H)
    p['gru_bih'] = jnp.asarray(np.stack([fw[2], bw[2]]), jnp.float32)    # (2, 1, 3H)
    p['gru_bhh'] = jnp.asarray(np.stack([fw[3], bw[3]]), jnp.float32)

    wfc = nrm((class_num, 2 * H))                 # PyTorch Linear weight (C, 2H)
    bfc = nrm((class_num,))
    p['fc_w'] = jnp.asarray(np.asarray(wfc).T, jnp.bfloat16)             # (2H, C)
    p['fc_b'] = bfc.reshape(1, class_num)
    return p


# ----------------------------------------------------------------------------
# Forward pass
# ----------------------------------------------------------------------------

def crnn_forward(x, params):
    # x: (B, t, num_freq)
    _, _, num_freq = x.shape
    # ConvBlock1 with the folded BatchNorm1d fused as a prologue.
    y = conv_block(x, *params['cb1'], fin=num_freq, cin=1, cout=16,
                   bn_scale=params['bn0_scale'], bn_bias=params['bn0_bias'])
    y = conv_block(y, *params['cb2'], fin=num_freq // 2, cin=16, cout=32)
    y = conv_block(y, *params['cb3'], fin=num_freq // 4, cin=32, cout=64)
    # y: (B, t/8, (num_freq/8)*64) bf16 -- already the GRU input layout.
    time_probs, clip_probs = bigru_head(y, params)
    return {'clip_probs': clip_probs, 'time_probs': time_probs}


if __name__ == "__main__":
    num_freq, class_num = 16, 8
    B, t = 2, 32

    key = jax.random.PRNGKey(0)
    kx, kp = jax.random.split(key)
    x = jax.random.normal(kx, (B, t, num_freq), jnp.float32)
    params = init_params(kp, num_freq, class_num)

    fwd = jax.jit(crnn_forward)
    out = fwd(x, params)
    jax.block_until_ready(out)

    assert out['time_probs'].shape == (B, t // 8, class_num)
    assert out['clip_probs'].shape == (B, class_num)
    assert bool(jnp.all(jnp.isfinite(out['time_probs'])))
    assert bool(jnp.all(jnp.isfinite(out['clip_probs'])))
    print("KERNEL_OK")
</pallas_src>

<mosaic_0001>
module attributes {stable_mosaic.version = 11 : i64} {
  func.func @conv_block_kernel(%arg0: i32, %arg1: memref<2x32x16xf32, #tpu.memory_space<vmem>>, %arg2: memref<1x16xf32, #tpu.memory_space<vmem>>, %arg3: memref<1x16xf32, #tpu.memory_space<vmem>>, %arg4: memref<48x256xbf16, #tpu.memory_space<vmem>>, %arg5: memref<1x256xf32, #tpu.memory_space<vmem>>, %arg6: memref<1x256xf32, #tpu.memory_space<vmem>>, %arg7: memref<2x16x128xbf16, #tpu.memory_space<vmem>>, %arg8: memref<67x16xbf16, #tpu.memory_space<vmem>>) attributes {dimension_semantics = [#tpu.dimension_semantics<parallel>], iteration_bounds = array<i64: 1>, scalar_prefetch = 0 : i64, scratch_operands = 1 : i64, tpu.core_type = #tpu.core_type<tc>, window_params = [{transform_indices = @transform_0, window_bounds = array<i64: 2, 32, 16>}, {pipeline_mode = #tpu.pipeline_mode<synchronous>, transform_indices = @transform_1, window_bounds = array<i64: 1, 16>}, {pipeline_mode = #tpu.pipeline_mode<synchronous>, transform_indices = @transform_2, window_bounds = array<i64: 1, 16>}, {pipeline_mode = #tpu.pipeline_mode<synchronous>, transform_indices = @transform_3, window_bounds = array<i64: 48, 256>}, {pipeline_mode = #tpu.pipeline_mode<synchronous>, transform_indices = @transform_4, window_bounds = array<i64: 1, 256>}, {pipeline_mode = #tpu.pipeline_mode<synchronous>, transform_indices = @transform_5, window_bounds = array<i64: 1, 256>}, {transform_indices = @transform_6, window_bounds = array<i64: 2, 16, 128>}]} {
    %cst = arith.constant 0.000000e+00 : bf16
    %0 = vector.broadcast %cst : bf16 to vector<1x16xbf16>
    %c0 = arith.constant 0 : index
    %c0_0 = arith.constant 0 : index
    %1 = vector.load %arg8[%c0, %c0_0] : memref<67x16xbf16, #tpu.memory_space<vmem>>, vector<1x16xbf16>
    tpu.vector_store %arg8[%c0, %c0_0], %0 {strides = array<i32>} : memref<67x16xbf16, #tpu.memory_space<vmem>>, vector<1x16xbf16>,
    %c0_1 = arith.constant 0 : index
    %c0_2 = arith.constant 0 : index
    %c0_3 = arith.constant 0 : index
    %2 = vector.load %arg1[%c0_1, %c0_2, %c0_3] : memref<2x32x16xf32, #tpu.memory_space<vmem>>, vector<1x32x16xf32>
    %3 = vector.shape_cast %2 : vector<1x32x16xf32> to vector<32x16xf32>
    %c0_4 = arith.constant 0 : index
    %c0_5 = arith.constant 0 : index
    %4 = vector.load %arg2[%c0_4, %c0_5] : memref<1x16xf32, #tpu.memory_space<vmem>>, vector<1x16xf32>
    %5 = vector.broadcast %4 : vector<1x16xf32> to vector<32x16xf32>
    %6 = arith.mulf %3, %5 : vector<32x16xf32>
    %c0_6 = arith.constant 0 : index
    %c0_7 = arith.constant 0 : index
    %7 = vector.load %arg3[%c0_6, %c0_7] : memref<1x16xf32, #tpu.memory_space<vmem>>, vector<1x16xf32>
    %8 = vector.broadcast %7 : vector<1x16xf32> to vector<32x16xf32>
    %9 = arith.addf %6, %8 : vector<32x16xf32>
    %10 = arith.truncf %9 : vector<32x16xf32> to vector<32x16xbf16>
    %c1 = arith.constant 1 : index
    %c0_8 = arith.constant 0 : index
    %11 = vector.load %arg8[%c1, %c0_8] : memref<67x16xbf16, #tpu.memory_space<vmem>>, vector<32x16xbf16>
    tpu.vector_store %arg8[%c1, %c0_8], %10 {strides = array<i32>} : memref<67x16xbf16, #tpu.memory_space<vmem>>, vector<32x16xbf16>,
    %c33 = arith.constant 33 : index
    %c0_9 = arith.constant 0 : index
    %12 = vector.load %arg8[%c33, %c0_9] : memref<67x16xbf16, #tpu.memory_space<vmem>>, vector<1x16xbf16>
    tpu.vector_store %arg8[%c33, %c0_9], %0 {strides = array<i32>} : memref<67x16xbf16, #tpu.memory_space<vmem>>, vector<1x16xbf16>,
    %c1_10 = arith.constant 1 : index
    %c0_11 = arith.constant 0 : index
    %c0_12 = arith.constant 0 : index
    %13 = vector.load %arg1[%c1_10, %c0_11, %c0_12] : memref<2x32x16xf32, #tpu.memory_space<vmem>>, vector<1x32x16xf32>
    %14 = vector.shape_cast %13 : vector<1x32x16xf32> to vector<32x16xf32>
    %c0_13 = arith.constant 0 : index
    %c0_14 = arith.constant 0 : index
    %15 = vector.load %arg2[%c0_13, %c0_14] : memref<1x16xf32, #tpu.memory_space<vmem>>, vector<1x16xf32>
    %16 = vector.broadcast %15 : vector<1x16xf32> to vector<32x16xf32>
    %17 = arith.mulf %14, %16 : vector<32x16xf32>
    %c0_15 = arith.constant 0 : index
    %c0_16 = arith.constant 0 : index
    %18 = vector.load %arg3[%c0_15, %c0_16] : memref<1x16xf32, #tpu.memory_space<vmem>>, vector<1x16xf32>
    %19 = vector.broadcast %18 : vector<1x16xf32> to vector<32x16xf32>
    %20 = arith.addf %17, %19 : vector<32x16xf32>
    %21 = arith.truncf %20 : vector<32x16xf32> to vector<32x16xbf16>
    %c34 = arith.constant 34 : index
    %c0_17 = arith.constant 0 : index
    %22 = vector.load %arg8[%c34, %c0_17] : memref<67x16xbf16, #tpu.memory_space<vmem>>, vector<32x16xbf16>
    tpu.vector_store %arg8[%c34, %c0_17], %21 {strides = array<i32>} : memref<67x16xbf16, #tpu.memory_space<vmem>>, vector<32x16xbf16>,
    %c66 = arith.constant 66 : index
    %c0_18 = arith.constant 0 : index
    %23 = vector.load %arg8[%c66, %c0_18] : memref<67x16xbf16, #tpu.memory_space<vmem>>, vector<1x16xbf16>
    tpu.vector_store %arg8[%c66, %c0_18], %0 {strides = array<i32>} : memref<67x16xbf16, #tpu.memory_space<vmem>>, vector<1x16xbf16>,
    %cst_19 = arith.constant 0.000000e+00 : f32
    %24 = vector.broadcast %cst_19 : f32 to vector<65x256xf32>
    %c0_20 = arith.constant 0 : index
    %c0_21 = arith.constant 0 : index
    %25 = vector.load %arg8[%c0_20, %c0_21] : memref<67x16xbf16, #tpu.memory_space<vmem>>, vector<65x16xbf16>
    %c0_22 = arith.constant 0 : index
    %c0_23 = arith.constant 0 : index
    %26 = vector.load %arg4[%c0_22, %c0_23] : memref<48x256xbf16, #tpu.memory_space<vmem>>, vector<16x256xbf16>
    %cst_24 = arith.constant dense<0.000000e+00> : vector<65x256xf32>
    %27 = tpu.matmul %25, %26, %cst_24 {dimension_numbers = #tpu.dot_dimension_numbers<[1], [0], [0], [1], [0, 0, 1, 1], [], []>} : vector<65x16xbf16>, vector<16x256xbf16>, vector<65x256xf32> -> vector<65x256xf32>
    %28 = arith.addf %24, %27 : vector<65x256xf32>
    %c1_25 = arith.constant 1 : index
    %c0_26 = arith.constant 0 : index
    %29 = vector.load %arg8[%c1_25, %c0_26] : memref<67x16xbf16, #tpu.memory_space<vmem>>, vector<65x16xbf16>
    %c16 = arith.constant 16 : index
    %c0_27 = arith.constant 0 : index
    %30 = vector.load %arg4[%c16, %c0_27] : memref<48x256xbf16, #tpu.memory_space<vmem>>, vector<16x256xbf16>
    %cst_28 = arith.constant dense<0.000000e+00> : vector<65x256xf32>
    %31 = tpu.matmul %29, %30, %cst_28 {dimension_numbers = #tpu.dot_dimension_numbers<[1], [0], [0], [1], [0, 0, 1, 1], [], []>} : vector<65x16xbf16>, vector<16x256xbf16>, vector<65x256xf32> -> vector<65x256xf32>
    %32 = arith.addf %28, %31 : vector<65x256xf32>
    %c2 = arith.constant 2 : index
    %c0_29 = arith.constant 0 : index
    %33 = vector.load %arg8[%c2, %c0_29] : memref<67x16xbf16, #tpu.memory_space<vmem>>, vector<65x16xbf16>
    %c32 = arith.constant 32 : index
    %c0_30 = arith.constant 0 : index
    %34 = vector.load %arg4[%c32, %c0_30] : memref<48x256xbf16, #tpu.memory_space<vmem>>, vector<16x256xbf16>
    %cst_31 = arith.constant dense<0.000000e+00> : vector<65x256xf32>
    %35 = tpu.matmul %33, %34, %cst_31 {dimension_numbers = #tpu.dot_dimension_numbers<[1], [0], [0], [1], [0, 0, 1, 1], [], []>} : vector<65x16xbf16>, vector<16x256xbf16>, vector<65x256xf32> -> vector<65x256xf32>
    %36 = arith.addf %32, %35 : vector<65x256xf32>
    %c0_32 = arith.constant 0 : index
    %c0_33 = arith.constant 0 : index
    %37 = vector.load %arg5[%c0_32, %c0_33] : memref<1x256xf32, #tpu.memory_space<vmem>>, vector<1x256xf32>
    %38 = vector.broadcast %37 : vector<1x256xf32> to vector<65x256xf32>
    %39 = arith.mulf %36, %38 : vector<65x256xf32>
    %c0_34 = arith.constant 0 : index
    %c0_35 = arith.constant 0 : index
    %40 = vector.load %arg6[%c0_34, %c0_35] : memref<1x256xf32, #tpu.memory_space<vmem>>, vector<1x256xf32>
    %41 = vector.broadcast %40 : vector<1x256xf32> to vector<65x256xf32>
    %42 = arith.addf %39, %41 : vector<65x256xf32>
    %cst_36 = arith.constant 0.000000e+00 : f32
    %43 = vector.broadcast %cst_36 : f32 to vector<65x256xf32>
    %44 = arith.maximumf %42, %43 : vector<65x256xf32>
    %45 = vector.extract_strided_slice %44 {offsets = [0, 0], sizes = [65, 128], strides = [1, 1]} : vector<65x256xf32> to vector<65x128xf32>
    %46 = vector.extract_strided_slice %44 {offsets = [0, 128], sizes = [65, 128], strides = [1, 1]} : vector<65x256xf32> to vector<65x128xf32>
    %47 = arith.maximumf %45, %46 : vector<65x128xf32>
    %48 = vector.extract_strided_slice %47 {offsets = [0, 0], sizes = [32, 128], strides = [1, 1]} : vector<65x128xf32> to vector<32x128xf32>
    %49 = vector.shape_cast %48 : vector<32x128xf32> to vector<16x2x128xf32>
    %50 = vector.extract_strided_slice %49 {offsets = [0, 0, 0], sizes = [16, 1, 128], strides = [1, 1, 1]} : vector<16x2x128xf32> to vector<16x1x128xf32>
    %51 = vector.shape_cast %50 : vector<16x1x128xf32> to vector<16x128xf32>
    %52 = vector.extract_strided_slice %49 {offsets = [0, 1, 0], sizes = [16, 1, 128], strides = [1, 1, 1]} : vector<16x2x128xf32> to vector<16x1x128xf32>
    %53 = vector.shape_cast %52 : vector<16x1x128xf32> to vector<16x128xf32>
    %54 = arith.maximumf %51, %53 : vector<16x128xf32>
    %55 = arith.truncf %54 : vector<16x128xf32> to vector<16x128xbf16>
    %56 = vector.extract_strided_slice %47 {offsets = [33, 0], sizes = [32, 128], strides = [1, 1]} : vector<65x128xf32> to vector<32x128xf32>
    %57 = vector.shape_cast %56 : vector<32x128xf32> to vector<16x2x128xf32>
    %58 = vector.extract_strided_slice %57 {offsets = [0, 0, 0], sizes = [16, 1, 128], strides = [1, 1, 1]} : vector<16x2x128xf32> to vector<16x1x128xf32>
    %59 = vector.shape_cast %58 : vector<16x1x128xf32> to vector<16x128xf32>
    %60 = vector.extract_strided_slice %57 {offsets = [0, 1, 0], sizes = [16, 1, 128], strides = [1, 1, 1]} : vector<16x2x128xf32> to vector<16x1x128xf32>
    %61 = vector.shape_cast %60 : vector<16x1x128xf32> to vector<16x128xf32>
    %62 = arith.maximumf %59, %61 : vector<16x128xf32>
    %63 = arith.truncf %62 : vector<16x128xf32> to vector<16x128xbf16>
    %64 = vector.shape_cast %55 : vector<16x128xbf16> to vector<1x16x128xbf16>
    %65 = vector.shape_cast %63 : vector<16x128xbf16> to vector<1x16x128xbf16>
    %66 = tpu.concatenate %64, %65 in 0 : vector<1x16x128xbf16>, vector<1x16x128xbf16> -> vector<2x16x128xbf16>
    %c0_37 = arith.constant 0 : index
    %c0_38 = arith.constant 0 : index
    %c0_39 = arith.constant 0 : index
    %67 = vector.load %arg7[%c0_37, %c0_38, %c0_39] : memref<2x16x128xbf16, #tpu.memory_space<vmem>>, vector<2x16x128xbf16>
    tpu.vector_store %arg7[%c0_37, %c0_38, %c0_39], %66 {strides = array<i32>} : memref<2x16x128xbf16, #tpu.memory_space<vmem>>, vector<2x16x128xbf16>,
    return
  }
  func.func @transform_0(%arg0: i32) -> (i32, i32, i32) {
    %c0_i32 = arith.constant 0 : i32
    %c0_i32_0 = arith.constant 0 : i32
    %c0_i32_1 = arith.constant 0 : i32
    return %arg0, %c0_i32, %c0_i32_0 : i32, i32, i32
  }
  func.func @transform_1(%arg0: i32) -> (i32, i32) {
    %c0_i32 = arith.constant 0 : i32
    %c0_i32_0 = arith.constant 0 : i32
    %c0_i32_1 = arith.constant 0 : i32
    return %c0_i32, %c0_i32_0 : i32, i32
  }
  func.func @transform_2(%arg0: i32) -> (i32, i32) {
    %c0_i32 = arith.constant 0 : i32
    %c0_i32_0 = arith.constant 0 : i32
    %c0_i32_1 = arith.constant 0 : i32
    return %c0_i32, %c0_i32_0 : i32, i32
  }
  func.func @transform_3(%arg0: i32) -> (i32, i32) {
    %c0_i32 = arith.constant 0 : i32
    %c0_i32_0 = arith.constant 0 : i32
    %c0_i32_1 = arith.constant 0 : i32
    return %c0_i32, %c0_i32_0 : i32, i32
  }
  func.func @transform_4(%arg0: i32) -> (i32, i32) {
    %c0_i32 = arith.constant 0 : i32
    %c0_i32_0 = arith.constant 0 : i32
    %c0_i32_1 = arith.constant 0 : i32
    return %c0_i32, %c0_i32_0 : i32, i32
  }
  func.func @transform_5(%arg0: i32) -> (i32, i32) {
    %c0_i32 = arith.constant 0 : i32
    %c0_i32_0 = arith.constant 0 : i32
    %c0_i32_1 = arith.constant 0 : i32
    return %c0_i32, %c0_i32_0 : i32, i32
  }
  func.func @transform_6(%arg0: i32) -> (i32, i32, i32) {
    %c0_i32 = arith.constant 0 : i32
    %c0_i32_0 = arith.constant 0 : i32
    %c0_i32_1 = arith.constant 0 : i32
    return %arg0, %c0_i32, %c0_i32_0 : i32, i32, i32
  }
}

module attributes {stable_mosaic.version = 11 : i64} {
  func.func @conv_block_kernel(%arg0: i32, %arg1: memref<2x16x128xbf16, #tpu.memory_space<vmem>>, %arg2: memref<384x256xbf16, #tpu.memory_space<vmem>>, %arg3: memref<1x256xf32, #tpu.memory_space<vmem>>, %arg4: memref<1x256xf32, #tpu.memory_space<vmem>>, %arg5: memref<2x8x128xbf16, #tpu.memory_space<vmem>>, %arg6: memref<35x128xbf16, #tpu.memory_space<vmem>>) attributes {dimension_semantics = [#tpu.dimension_semantics<parallel>], iteration_bounds = array<i64: 1>, scalar_prefetch = 0 : i64, scratch_operands = 1 : i64, tpu.core_type = #tpu.core_type<tc>, window_params = [{transform_indices = @transform_0, window_bounds = array<i64: 2, 16, 128>}, {pipeline_mode = #tpu.pipeline_mode<synchronous>, transform_indices = @transform_1, window_bounds = array<i64: 384, 256>}, {pipeline_mode = #tpu.pipeline_mode<synchronous>, transform_indices = @transform_2, window_bounds = array<i64: 1, 256>}, {pipeline_mode = #tpu.pipeline_mode<synchronous>, transform_indices = @transform_3, window_bounds = array<i64: 1, 256>}, {transform_indices = @transform_4, window_bounds = array<i64: 2, 8, 128>}]} {
    %cst = arith.constant 0.000000e+00 : bf16
    %0 = vector.broadcast %cst : bf16 to vector<1x128xbf16>
    %c0 = arith.constant 0 : index
    %c0_0 = arith.constant 0 : index
    %1 = vector.load %arg6[%c0, %c0_0] : memref<35x128xbf16, #tpu.memory_space<vmem>>, vector<1x128xbf16>
    tpu.vector_store %arg6[%c0, %c0_0], %0 {strides = array<i32>} : memref<35x128xbf16, #tpu.memory_space<vmem>>, vector<1x128xbf16>,
    %c0_1 = arith.constant 0 : index
    %c0_2 = arith.constant 0 : index
    %c0_3 = arith.constant 0 : index
    %2 = vector.load %arg1[%c0_1, %c0_2, %c0_3] : memref<2x16x128xbf16, #tpu.memory_space<vmem>>, vector<1x16x128xbf16>
    %3 = vector.shape_cast %2 : vector<1x16x128xbf16> to vector<16x128xbf16>
    %c1 = arith.constant 1 : index
    %c0_4 = arith.constant 0 : index
    %4 = vector.load %arg6[%c1, %c0_4] : memref<35x128xbf16, #tpu.memory_space<vmem>>, vector<16x128xbf16>
    tpu.vector_store %arg6[%c1, %c0_4], %3 {strides = array<i32>} : memref<35x128xbf16, #tpu.memory_space<vmem>>, vector<16x128xbf16>,
    %c17 = arith.constant 17 : index
    %c0_5 = arith.constant 0 : index
    %5 = vector.load %arg6[%c17, %c0_5] : memref<35x128xbf16, #tpu.memory_space<vmem>>, vector<1x128xbf16>
    tpu.vector_store %arg6[%c17, %c0_5], %0 {strides = array<i32>} : memref<35x128xbf16, #tpu.memory_space<vmem>>, vector<1x128xbf16>,
    %c1_6 = arith.constant 1 : index
    %c0_7 = arith.constant 0 : index
    %c0_8 = arith.constant 0 : index
    %6 = vector.load %arg1[%c1_6, %c0_7, %c0_8] : memref<2x16x128xbf16, #tpu.memory_space<vmem>>, vector<1x16x128xbf16>
    %7 = vector.shape_cast %6 : vector<1x16x128xbf16> to vector<16x128xbf16>
    %c18 = arith.constant 18 : index
    %c0_9 = arith.constant 0 : index
    %8 = vector.load %arg6[%c18, %c0_9] : memref<35x128xbf16, #tpu.memory_space<vmem>>, vector<16x128xbf16>
    tpu.vector_store %arg6[%c18, %c0_9], %7 {strides = array<i32>} : memref<35x128xbf16, #tpu.memory_space<vmem>>, vector<16x128xbf16>,
    %c34 = arith.constant 34 : index
    %c0_10 = arith.constant 0 : index
    %9 = vector.load %arg6[%c34, %c0_10] : memref<35x128xbf16, #tpu.memory_space<vmem>>, vector<1x128xbf16>
    tpu.vector_store %arg6[%c34, %c0_10], %0 {strides = array<i32>} : memref<35x128xbf16, #tpu.memory_space<vmem>>, vector<1x128xbf16>,
    %cst_11 = arith.constant 0.000000e+00 : f32
    %10 = vector.broadcast %cst_11 : f32 to vector<33x256xf32>
    %c0_12 = arith.constant 0 : index
    %c0_13 = arith.constant 0 : index
    %11 = vector.load %arg6[%c0_12, %c0_13] : memref<35x128xbf16, #tpu.memory_space<vmem>>, vector<33x128xbf16>
    %c0_14 = arith.constant 0 : index
    %c0_15 = arith.constant 0 : index
    %12 = vector.load %arg2[%c0_14, %c0_15] : memref<384x256xbf16, #tpu.memory_space<vmem>>, vector<128x256xbf16>
    %cst_16 = arith.constant dense<0.000000e+00> : vector<33x256xf32>
    %13 = tpu.matmul %11, %12, %cst_16 {dimension_numbers = #tpu.dot_dimension_numbers<[1], [0], [0], [1], [0, 0, 1, 1], [], []>} : vector<33x128xbf16>, vector<128x256xbf16>, vector<33x256xf32> -> vector<33x256xf32>
    %14 = arith.addf %10, %13 : vector<33x256xf32>
    %c1_17 = arith.constant 1 : index
    %c0_18 = arith.constant 0 : index
    %15 = vector.load %arg6[%c1_17, %c0_18] : memref<35x128xbf16, #tpu.memory_space<vmem>>, vector<33x128xbf16>
    %c128 = arith.constant 128 : index
    %c0_19 = arith.constant 0 : index
    %16 = vector.load %arg2[%c128, %c0_19] : memref<384x256xbf16, #tpu.memory_space<vmem>>, vector<128x256xbf16>
    %cst_20 = arith.constant dense<0.000000e+00> : vector<33x256xf32>
    %17 = tpu.matmul %15, %16, %cst_20 {dimension_numbers = #tpu.dot_dimension_numbers<[1], [0], [0], [1], [0, 0, 1, 1], [], []>} : vector<33x128xbf16>, vector<128x256xbf16>, vector<33x256xf32> -> vector<33x256xf32>
    %18 = arith.addf %14, %17 : vector<33x256xf32>
    %c2 = arith.constant 2 : index
    %c0_21 = arith.constant 0 : index
    %19 = vector.load %arg6[%c2, %c0_21] : memref<35x128xbf16, #tpu.memory_space<vmem>>, vector<33x128xbf16>
    %c256 = arith.constant 256 : index
    %c0_22 = arith.constant 0 : index
    %20 = vector.load %arg2[%c256, %c0_22] : memref<384x256xbf16, #tpu.memory_space<vmem>>, vector<128x256xbf16>
    %cst_23 = arith.constant dense<0.000000e+00> : vector<33x256xf32>
    %21 = tpu.matmul %19, %20, %cst_23 {dimension_numbers = #tpu.dot_dimension_numbers<[1], [0], [0], [1], [0, 0, 1, 1], [], []>} : vector<33x128xbf16>, vector<128x256xbf16>, vector<33x256xf32> -> vector<33x256xf32>
    %22 = arith.addf %18, %21 : vector<33x256xf32>
    %c0_24 = arith.constant 0 : index
    %c0_25 = arith.constant 0 : index
    %23 = vector.load %arg3[%c0_24, %c0_25] : memref<1x256xf32, #tpu.memory_space<vmem>>, vector<1x256xf32>
    %24 = vector.broadcast %23 : vector<1x256xf32> to vector<33x256xf32>
    %25 = arith.mulf %22, %24 : vector<33x256xf32>
    %c0_26 = arith.constant 0 : index
    %c0_27 = arith.constant 0 : index
    %26 = vector.load %arg4[%c0_26, %c0_27] : memref<1x256xf32, #tpu.memory_space<vmem>>, vector<1x256xf32>
    %27 = vector.broadcast %26 : vector<1x256xf32> to vector<33x256xf32>
    %28 = arith.addf %25, %27 : vector<33x256xf32>
    %cst_28 = arith.constant 0.000000e+00 : f32
    %29 = vector.broadcast %cst_28 : f32 to vector<33x256xf32>
    %30 = arith.maximumf %28, %29 : vector<33x256xf32>
    %31 = vector.extract_strided_slice %30 {offsets = [0, 0], sizes = [33, 128], strides = [1, 1]} : vector<33x256xf32> to vector<33x128xf32>
    %32 = vector.extract_strided_slice %30 {offsets = [0, 128], sizes = [33, 128], strides = [1, 1]} : vector<33x256xf32> to vector<33x128xf32>
    %33 = arith.maximumf %31, %32 : vector<33x128xf32>
    %34 = vector.extract_strided_slice %33 {offsets = [0, 0], sizes = [16, 128], strides = [1, 1]} : vector<33x128xf32> to vector<16x128xf32>
    %35 = vector.shape_cast %34 : vector<16x128xf32> to vector<8x2x128xf32>
    %36 = vector.extract_strided_slice %35 {offsets = [0, 0, 0], sizes = [8, 1, 128], strides = [1, 1, 1]} : vector<8x2x128xf32> to vector<8x1x128xf32>
    %37 = vector.shape_cast %36 : vector<8x1x128xf32> to vector<8x128xf32>
    %38 = vector.extract_strided_slice %35 {offsets = [0, 1, 0], sizes = [8, 1, 128], strides = [1, 1, 1]} : vector<8x2x128xf32> to vector<8x1x128xf32>
    %39 = vector.shape_cast %38 : vector<8x1x128xf32> to vector<8x128xf32>
    %40 = arith.maximumf %37, %39 : vector<8x128xf32>
    %41 = arith.truncf %40 : vector<8x128xf32> to vector<8x128xbf16>
    %42 = vector.extract_strided_slice %33 {offsets = [17, 0], sizes = [16, 128], strides = [1, 1]} : vector<33x128xf32> to vector<16x128xf32>
    %43 = vector.shape_cast %42 : vector<16x128xf32> to vector<8x2x128xf32>
    %44 = vector.extract_strided_slice %43 {offsets = [0, 0, 0], sizes = [8, 1, 128], strides = [1, 1, 1]} : vector<8x2x128xf32> to vector<8x1x128xf32>
    %45 = vector.shape_cast %44 : vector<8x1x128xf32> to vector<8x128xf32>
    %46 = vector.extract_strided_slice %43 {offsets = [0, 1, 0], sizes = [8, 1, 128], strides = [1, 1, 1]} : vector<8x2x128xf32> to vector<8x1x128xf32>
    %47 = vector.shape_cast %46 : vector<8x1x128xf32> to vector<8x128xf32>
    %48 = arith.maximumf %45, %47 : vector<8x128xf32>
    %49 = arith.truncf %48 : vector<8x128xf32> to vector<8x128xbf16>
    %50 = vector.shape_cast %41 : vector<8x128xbf16> to vector<1x8x128xbf16>
    %51 = vector.shape_cast %49 : vector<8x128xbf16> to vector<1x8x128xbf16>
    %52 = tpu.concatenate %50, %51 in 0 : vector<1x8x128xbf16>, vector<1x8x128xbf16> -> vector<2x8x128xbf16>
    %c0_29 = arith.constant 0 : index
    %c0_30 = arith.constant 0 : index
    %c0_31 = arith.constant 0 : index
    %53 = vector.load %arg5[%c0_29, %c0_30, %c0_31] : memref<2x8x128xbf16, #tpu.memory_space<vmem>>, vector<2x8x128xbf16>
    tpu.vector_store %arg5[%c0_29, %c0_30, %c0_31], %52 {strides = array<i32>} : memref<2x8x128xbf16, #tpu.memory_space<vmem>>, vector<2x8x128xbf16>,
    return
  }
  func.func @transform_0(%arg0: i32) -> (i32, i32, i32) {
    %c0_i32 = arith.constant 0 : i32
    %c0_i32_0 = arith.constant 0 : i32
    %c0_i32_1 = arith.constant 0 : i32
    return %arg0, %c0_i32, %c0_i32_0 : i32, i32, i32
  }
  func.func @transform_1(%arg0: i32) -> (i32, i32) {
    %c0_i32 = arith.constant 0 : i32
    %c0_i32_0 = arith.constant 0 : i32
    %c0_i32_1 = arith.constant 0 : i32
    return %c0_i32, %c0_i32_0 : i32, i32
  }
  func.func @transform_2(%arg0: i32) -> (i32, i32) {
    %c0_i32 = arith.constant 0 : i32
    %c0_i32_0 = arith.constant 0 : i32
    %c0_i32_1 = arith.constant 0 : i32
    return %c0_i32, %c0_i32_0 : i32, i32
  }
  func.func @transform_3(%arg0: i32) -> (i32, i32) {
    %c0_i32 = arith.constant 0 : i32
    %c0_i32_0 = arith.constant 0 : i32
    %c0_i32_1 = arith.constant 0 : i32
    return %c0_i32, %c0_i32_0 : i32, i32
  }
  func.func @transform_4(%arg0: i32) -> (i32, i32, i32) {
    %c0_i32 = arith.constant 0 : i32
    %c0_i32_0 = arith.constant 0 : i32
    %c0_i32_1 = arith.constant 0 : i32
    return %arg0, %c0_i32, %c0_i32_0 : i32, i32, i32
  }
}

module attributes {stable_mosaic.version = 11 : i64} {
  func.func @conv_block_kernel(%arg0: i32, %arg1: memref<2x8x128xbf16, #tpu.memory_space<vmem>>, %arg2: memref<384x256xbf16, #tpu.memory_space<vmem>>, %arg3: memref<1x256xf32, #tpu.memory_space<vmem>>, %arg4: memref<1x256xf32, #tpu.memory_space<vmem>>, %arg5: memref<2x4x128xbf16, #tpu.memory_space<vmem>>, %arg6: memref<19x128xbf16, #tpu.memory_space<vmem>>) attributes {dimension_semantics = [#tpu.dimension_semantics<parallel>], iteration_bounds = array<i64: 1>, scalar_prefetch = 0 : i64, scratch_operands = 1 : i64, tpu.core_type = #tpu.core_type<tc>, window_params = [{transform_indices = @transform_0, window_bounds = array<i64: 2, 8, 128>}, {pipeline_mode = #tpu.pipeline_mode<synchronous>, transform_indices = @transform_1, window_bounds = array<i64: 384, 256>}, {pipeline_mode = #tpu.pipeline_mode<synchronous>, transform_indices = @transform_2, window_bounds = array<i64: 1, 256>}, {pipeline_mode = #tpu.pipeline_mode<synchronous>, transform_indices = @transform_3, window_bounds = array<i64: 1, 256>}, {transform_indices = @transform_4, window_bounds = array<i64: 2, 4, 128>}]} {
    %cst = arith.constant 0.000000e+00 : bf16
    %0 = vector.broadcast %cst : bf16 to vector<1x128xbf16>
    %c0 = arith.constant 0 : index
    %c0_0 = arith.constant 0 : index
    %1 = vector.load %arg6[%c0, %c0_0] : memref<19x128xbf16, #tpu.memory_space<vmem>>, vector<1x128xbf16>
    tpu.vector_store %arg6[%c0, %c0_0], %0 {strides = array<i32>} : memref<19x128xbf16, #tpu.memory_space<vmem>>, vector<1x128xbf16>,
    %c0_1 = arith.constant 0 : index
    %c0_2 = arith.constant 0 : index
    %c0_3 = arith.constant 0 : index
    %2 = vector.load %arg1[%c0_1, %c0_2, %c0_3] : memref<2x8x128xbf16, #tpu.memory_space<vmem>>, vector<1x8x128xbf16>
    %3 = vector.shape_cast %2 : vector<1x8x128xbf16> to vector<8x128xbf16>
    %c1 = arith.constant 1 : index
    %c0_4 = arith.constant 0 : index
    %4 = vector.load %arg6[%c1, %c0_4] : memref<19x128xbf16, #tpu.memory_space<vmem>>, vector<8x128xbf16>
    tpu.vector_store %arg6[%c1, %c0_4], %3 {strides = array<i32>} : memref<19x128xbf16, #tpu.memory_space<vmem>>, vector<8x128xbf16>,
    %c9 = arith.constant 9 : index
    %c0_5 = arith.constant 0 : index
    %5 = vector.load %arg6[%c9, %c0_5] : memref<19x128xbf16, #tpu.memory_space<vmem>>, vector<1x128xbf16>
    tpu.vector_store %arg6[%c9, %c0_5], %0 {strides = array<i32>} : memref<19x128xbf16, #tpu.memory_space<vmem>>, vector<1x128xbf16>,
    %c1_6 = arith.constant 1 : index
    %c0_7 = arith.constant 0 : index
    %c0_8 = arith.constant 0 : index
    %6 = vector.load %arg1[%c1_6, %c0_7, %c0_8] : memref<2x8x128xbf16, #tpu.memory_space<vmem>>, vector<1x8x128xbf16>
    %7 = vector.shape_cast %6 : vector<1x8x128xbf16> to vector<8x128xbf16>
    %c10 = arith.constant 10 : index
    %c0_9 = arith.constant 0 : index
    %8 = vector.load %arg6[%c10, %c0_9] : memref<19x128xbf16, #tpu.memory_space<vmem>>, vector<8x128xbf16>
    tpu.vector_store %arg6[%c10, %c0_9], %7 {strides = array<i32>} : memref<19x128xbf16, #tpu.memory_space<vmem>>, vector<8x128xbf16>,
    %c18 = arith.constant 18 : index
    %c0_10 = arith.constant 0 : index
    %9 = vector.load %arg6[%c18, %c0_10] : memref<19x128xbf16, #tpu.memory_space<vmem>>, vector<1x128xbf16>
    tpu.vector_store %arg6[%c18, %c0_10], %0 {strides = array<i32>} : memref<19x128xbf16, #tpu.memory_space<vmem>>, vector<1x128xbf16>,
    %cst_11 = arith.constant 0.000000e+00 : f32
    %10 = vector.broadcast %cst_11 : f32 to vector<17x256xf32>
    %c0_12 = arith.constant 0 : index
    %c0_13 = arith.constant 0 : index
    %11 = vector.load %arg6[%c0_12, %c0_13] : memref<19x128xbf16, #tpu.memory_space<vmem>>, vector<17x128xbf16>
    %c0_14 = arith.constant 0 : index
    %c0_15 = arith.constant 0 : index
    %12 = vector.load %arg2[%c0_14, %c0_15] : memref<384x256xbf16, #tpu.memory_space<vmem>>, vector<128x256xbf16>
    %cst_16 = arith.constant dense<0.000000e+00> : vector<17x256xf32>
    %13 = tpu.matmul %11, %12, %cst_16 {dimension_numbers = #tpu.dot_dimension_numbers<[1], [0], [0], [1], [0, 0, 1, 1], [], []>} : vector<17x128xbf16>, vector<128x256xbf16>, vector<17x256xf32> -> vector<17x256xf32>
    %14 = arith.addf %10, %13 : vector<17x256xf32>
    %c1_17 = arith.constant 1 : index
    %c0_18 = arith.constant 0 : index
    %15 = vector.load %arg6[%c1_17, %c0_18] : memref<19x128xbf16, #tpu.memory_space<vmem>>, vector<17x128xbf16>
    %c128 = arith.constant 128 : index
    %c0_19 = arith.constant 0 : index
    %16 = vector.load %arg2[%c128, %c0_19] : memref<384x256xbf16, #tpu.memory_space<vmem>>, vector<128x256xbf16>
    %cst_20 = arith.constant dense<0.000000e+00> : vector<17x256xf32>
    %17 = tpu.matmul %15, %16, %cst_20 {dimension_numbers = #tpu.dot_dimension_numbers<[1], [0], [0], [1], [0, 0, 1, 1], [], []>} : vector<17x128xbf16>, vector<128x256xbf16>, vector<17x256xf32> -> vector<17x256xf32>
    %18 = arith.addf %14, %17 : vector<17x256xf32>
    %c2 = arith.constant 2 : index
    %c0_21 = arith.constant 0 : index
    %19 = vector.load %arg6[%c2, %c0_21] : memref<19x128xbf16, #tpu.memory_space<vmem>>, vector<17x128xbf16>
    %c256 = arith.constant 256 : index
    %c0_22 = arith.constant 0 : index
    %20 = vector.load %arg2[%c256, %c0_22] : memref<384x256xbf16, #tpu.memory_space<vmem>>, vector<128x256xbf16>
    %cst_23 = arith.constant dense<0.000000e+00> : vector<17x256xf32>
    %21 = tpu.matmul %19, %20, %cst_23 {dimension_numbers = #tpu.dot_dimension_numbers<[1], [0], [0], [1], [0, 0, 1, 1], [], []>} : vector<17x128xbf16>, vector<128x256xbf16>, vector<17x256xf32> -> vector<17x256xf32>
    %22 = arith.addf %18, %21 : vector<17x256xf32>
    %c0_24 = arith.constant 0 : index
    %c0_25 = arith.constant 0 : index
    %23 = vector.load %arg3[%c0_24, %c0_25] : memref<1x256xf32, #tpu.memory_space<vmem>>, vector<1x256xf32>
    %24 = vector.broadcast %23 : vector<1x256xf32> to vector<17x256xf32>
    %25 = arith.mulf %22, %24 : vector<17x256xf32>
    %c0_26 = arith.constant 0 : index
    %c0_27 = arith.constant 0 : index
    %26 = vector.load %arg4[%c0_26, %c0_27] : memref<1x256xf32, #tpu.memory_space<vmem>>, vector<1x256xf32>
    %27 = vector.broadcast %26 : vector<1x256xf32> to vector<17x256xf32>
    %28 = arith.addf %25, %27 : vector<17x256xf32>
    %cst_28 = arith.constant 0.000000e+00 : f32
    %29 = vector.broadcast %cst_28 : f32 to vector<17x256xf32>
    %30 = arith.maximumf %28, %29 : vector<17x256xf32>
    %31 = vector.extract_strided_slice %30 {offsets = [0, 0], sizes = [17, 128], strides = [1, 1]} : vector<17x256xf32> to vector<17x128xf32>
    %32 = vector.extract_strided_slice %30 {offsets = [0, 128], sizes = [17, 128], strides = [1, 1]} : vector<17x256xf32> to vector<17x128xf32>
    %33 = arith.maximumf %31, %32 : vector<17x128xf32>
    %34 = vector.extract_strided_slice %33 {offsets = [0, 0], sizes = [8, 128], strides = [1, 1]} : vector<17x128xf32> to vector<8x128xf32>
    %35 = vector.shape_cast %34 : vector<8x128xf32> to vector<4x2x128xf32>
    %36 = vector.extract_strided_slice %35 {offsets = [0, 0, 0], sizes = [4, 1, 128], strides = [1, 1, 1]} : vector<4x2x128xf32> to vector<4x1x128xf32>
    %37 = vector.shape_cast %36 : vector<4x1x128xf32> to vector<4x128xf32>
    %38 = vector.extract_strided_slice %35 {offsets = [0, 1, 0], sizes = [4, 1, 128], strides = [1, 1, 1]} : vector<4x2x128xf32> to vector<4x1x128xf32>
    %39 = vector.shape_cast %38 : vector<4x1x128xf32> to vector<4x128xf32>
    %40 = arith.maximumf %37, %39 : vector<4x128xf32>
    %41 = arith.truncf %40 : vector<4x128xf32> to vector<4x128xbf16>
    %42 = vector.extract_strided_slice %33 {offsets = [9, 0], sizes = [8, 128], strides = [1, 1]} : vector<17x128xf32> to vector<8x128xf32>
    %43 = vector.shape_cast %42 : vector<8x128xf32> to vector<4x2x128xf32>
    %44 = vector.extract_strided_slice %43 {offsets = [0, 0, 0], sizes = [4, 1, 128], strides = [1, 1, 1]} : vector<4x2x128xf32> to vector<4x1x128xf32>
    %45 = vector.shape_cast %44 : vector<4x1x128xf32> to vector<4x128xf32>
    %46 = vector.extract_strided_slice %43 {offsets = [0, 1, 0], sizes = [4, 1, 128], strides = [1, 1, 1]} : vector<4x2x128xf32> to vector<4x1x128xf32>
    %47 = vector.shape_cast %46 : vector<4x1x128xf32> to vector<4x128xf32>
    %48 = arith.maximumf %45, %47 : vector<4x128xf32>
    %49 = arith.truncf %48 : vector<4x128xf32> to vector<4x128xbf16>
    %50 = vector.shape_cast %41 : vector<4x128xbf16> to vector<1x4x128xbf16>
    %51 = vector.shape_cast %49 : vector<4x128xbf16> to vector<1x4x128xbf16>
    %52 = tpu.concatenate %50, %51 in 0 : vector<1x4x128xbf16>, vector<1x4x128xbf16> -> vector<2x4x128xbf16>
    %c0_29 = arith.constant 0 : index
    %c0_30 = arith.constant 0 : index
    %c0_31 = arith.constant 0 : index
    %53 = vector.load %arg5[%c0_29, %c0_30, %c0_31] : memref<2x4x128xbf16, #tpu.memory_space<vmem>>, vector<2x4x128xbf16>
    tpu.vector_store %arg5[%c0_29, %c0_30, %c0_31], %52 {strides = array<i32>} : memref<2x4x128xbf16, #tpu.memory_space<vmem>>, vector<2x4x128xbf16>,
    return
  }
  func.func @transform_0(%arg0: i32) -> (i32, i32, i32) {
    %c0_i32 = arith.constant 0 : i32
    %c0_i32_0 = arith.constant 0 : i32
    %c0_i32_1 = arith.constant 0 : i32
    return %arg0, %c0_i32, %c0_i32_0 : i32, i32, i32
  }
  func.func @transform_1(%arg0: i32) -> (i32, i32) {
    %c0_i32 = arith.constant 0 : i32
    %c0_i32_0 = arith.constant 0 : i32
    %c0_i32_1 = arith.constant 0 : i32
    return %c0_i32, %c0_i32_0 : i32, i32
  }
  func.func @transform_2(%arg0: i32) -> (i32, i32) {
    %c0_i32 = arith.constant 0 : i32
    %c0_i32_0 = arith.constant 0 : i32
    %c0_i32_1 = arith.constant 0 : i32
    return %c0_i32, %c0_i32_0 : i32, i32
  }
  func.func @transform_3(%arg0: i32) -> (i32, i32) {
    %c0_i32 = arith.constant 0 : i32
    %c0_i32_0 = arith.constant 0 : i32
    %c0_i32_1 = arith.constant 0 : i32
    return %c0_i32, %c0_i32_0 : i32, i32
  }
  func.func @transform_4(%arg0: i32) -> (i32, i32, i32) {
    %c0_i32 = arith.constant 0 : i32
    %c0_i32_0 = arith.constant 0 : i32
    %c0_i32_1 = arith.constant 0 : i32
    return %arg0, %c0_i32, %c0_i32_0 : i32, i32, i32
  }
}

module attributes {stable_mosaic.version = 11 : i64} {
  func.func @gru_head_kernel(%arg0: memref<2x4x128xbf16, #tpu.memory_space<vmem>>, %arg1: memref<2x128x192xbf16, #tpu.memory_space<vmem>>, %arg2: memref<2x64x192xbf16, #tpu.memory_space<vmem>>, %arg3: memref<2x1x192xf32, #tpu.memory_space<vmem>>, %arg4: memref<2x1x192xf32, #tpu.memory_space<vmem>>, %arg5: memref<128x8xbf16, #tpu.memory_space<vmem>>, %arg6: memref<1x8xf32, #tpu.memory_space<vmem>>, %arg7: memref<2x4x8xf32, #tpu.memory_space<vmem>>, %arg8: memref<2x8xf32, #tpu.memory_space<vmem>>, %arg9: memref<2x4x64xbf16, #tpu.memory_space<vmem>>, %arg10: memref<2x4x64xbf16, #tpu.memory_space<vmem>>) attributes {dimension_semantics = [], scalar_prefetch = 0 : i64, scratch_operands = 2 : i64, tpu.core_type = #tpu.core_type<tc>} {
    %c0 = arith.constant 0 : index
    %c0_0 = arith.constant 0 : index
    %c0_1 = arith.constant 0 : index
    %0 = vector.load %arg0[%c0, %c0_0, %c0_1] : memref<2x4x128xbf16, #tpu.memory_space<vmem>>, vector<2x4x128xbf16>
    %1 = vector.shape_cast %0 : vector<2x4x128xbf16> to vector<8x128xbf16>
    %c0_2 = arith.constant 0 : index
    %c0_3 = arith.constant 0 : index
    %c0_4 = arith.constant 0 : index
    %2 = vector.load %arg1[%c0_2, %c0_3, %c0_4] : memref<2x128x192xbf16, #tpu.memory_space<vmem>>, vector<1x128x192xbf16>
    %3 = vector.shape_cast %2 : vector<1x128x192xbf16> to vector<128x192xbf16>
    %cst = arith.constant dense<0.000000e+00> : vector<8x192xf32>
    %4 = tpu.matmul %1, %3, %cst {dimension_numbers = #tpu.dot_dimension_numbers<[1], [0], [0], [1], [0, 0, 1, 1], [], []>} : vector<8x128xbf16>, vector<128x192xbf16>, vector<8x192xf32> -> vector<8x192xf32>
    %c0_5 = arith.constant 0 : index
    %c0_6 = arith.constant 0 : index
    %c0_7 = arith.constant 0 : index
    %5 = vector.load %arg3[%c0_5, %c0_6, %c0_7] : memref<2x1x192xf32, #tpu.memory_space<vmem>>, vector<1x1x192xf32>
    %6 = vector.shape_cast %5 : vector<1x1x192xf32> to vector<1x192xf32>
    %7 = vector.broadcast %6 : vector<1x192xf32> to vector<8x192xf32>
    %8 = arith.addf %4, %7 : vector<8x192xf32>
    %9 = vector.shape_cast %8 : vector<8x192xf32> to vector<2x4x192xf32>
    %cst_8 = arith.constant 0.000000e+00 : f32
    %10 = vector.broadcast %cst_8 : f32 to vector<2x64xf32>
    %cst_9 = arith.constant 0.000000e+00 : bf16
    %11 = vector.broadcast %cst_9 : bf16 to vector<2x64xbf16>
    %c0_10 = arith.constant 0 : index
    %c0_11 = arith.constant 0 : index
    %c0_12 = arith.constant 0 : index
    %12 = vector.load %arg2[%c0_10, %c0_11, %c0_12] : memref<2x64x192xbf16, #tpu.memory_space<vmem>>, vector<1x64x192xbf16>
    %13 = vector.shape_cast %12 : vector<1x64x192xbf16> to vector<64x192xbf16>
    %cst_13 = arith.constant dense<0.000000e+00> : vector<2x192xf32>
    %14 = tpu.matmul %11, %13, %cst_13 {dimension_numbers = #tpu.dot_dimension_numbers<[1], [0], [0], [1], [0, 0, 1, 1], [], []>} : vector<2x64xbf16>, vector<64x192xbf16>, vector<2x192xf32> -> vector<2x192xf32>
    %c0_14 = arith.constant 0 : index
    %c0_15 = arith.constant 0 : index
    %c0_16 = arith.constant 0 : index
    %15 = vector.load %arg4[%c0_14, %c0_15, %c0_16] : memref<2x1x192xf32, #tpu.memory_space<vmem>>, vector<1x1x192xf32>
    %16 = vector.shape_cast %15 : vector<1x1x192xf32> to vector<1x192xf32>
    %17 = vector.broadcast %16 : vector<1x192xf32> to vector<2x192xf32>
    %18 = arith.addf %14, %17 : vector<2x192xf32>
    %19 = vector.extract_strided_slice %9 {offsets = [0, 0, 0], sizes = [2, 1, 192], strides = [1, 1, 1]} : vector<2x4x192xf32> to vector<2x1x192xf32>
    %20 = vector.shape_cast %19 : vector<2x1x192xf32> to vector<2x192xf32>
    %21 = vector.extract_strided_slice %20 {offsets = [0, 0], sizes = [2, 64], strides = [1, 1]} : vector<2x192xf32> to vector<2x64xf32>
    %22 = vector.extract_strided_slice %18 {offsets = [0, 0], sizes = [2, 64], strides = [1, 1]} : vector<2x192xf32> to vector<2x64xf32>
    %23 = arith.addf %21, %22 : vector<2x64xf32>
    %24 = arith.negf %23 : vector<2x64xf32>
    %25 = math.exp %24 : vector<2x64xf32>
    %cst_17 = arith.constant 1.000000e+00 : f32
    %26 = vector.broadcast %cst_17 : f32 to vector<2x64xf32>
    %27 = arith.addf %26, %25 : vector<2x64xf32>
    %28 = arith.divf %26, %27 : vector<2x64xf32>
    %29 = vector.extract_strided_slice %20 {offsets = [0, 64], sizes = [2, 64], strides = [1, 1]} : vector<2x192xf32> to vector<2x64xf32>
    %30 = vector.extract_strided_slice %18 {offsets = [0, 64], sizes = [2, 64], strides = [1, 1]} : vector<2x192xf32> to vector<2x64xf32>
    %31 = arith.addf %29, %30 : vector<2x64xf32>
    %32 = arith.negf %31 : vector<2x64xf32>
    %33 = math.exp %32 : vector<2x64xf32>
    %cst_18 = arith.constant 1.000000e+00 : f32
    %34 = vector.broadcast %cst_18 : f32 to vector<2x64xf32>
    %35 = arith.addf %34, %33 : vector<2x64xf32>
    %36 = arith.divf %34, %35 : vector<2x64xf32>
    %37 = vector.extract_strided_slice %20 {offsets = [0, 128], sizes = [2, 64], strides = [1, 1]} : vector<2x192xf32> to vector<2x64xf32>
    %38 = vector.extract_strided_slice %18 {offsets = [0, 128], sizes = [2, 64], strides = [1, 1]} : vector<2x192xf32> to vector<2x64xf32>
    %39 = arith.mulf %28, %38 : vector<2x64xf32>
    %40 = arith.addf %37, %39 : vector<2x64xf32>
    %41 = math.tanh %40 : vector<2x64xf32>
    %cst_19 = arith.constant 1.000000e+00 : f32
    %42 = vector.broadcast %cst_19 : f32 to vector<2x64xf32>
    %43 = arith.subf %42, %36 : vector<2x64xf32>
    %44 = arith.mulf %43, %41 : vector<2x64xf32>
    %45 = arith.mulf %36, %10 : vector<2x64xf32>
    %46 = arith.addf %44, %45 : vector<2x64xf32>
    %47 = arith.truncf %46 : vector<2x64xf32> to vector<2x64xbf16>
    %48 = vector.shape_cast %47 : vector<2x64xbf16> to vector<2x1x64xbf16>
    %c0_20 = arith.constant 0 : index
    %c0_21 = arith.constant 0 : index
    %c0_22 = arith.constant 0 : index
    %49 = vector.load %arg9[%c0_20, %c0_21, %c0_22] : memref<2x4x64xbf16, #tpu.memory_space<vmem>>, vector<2x1x64xbf16>
    tpu.vector_store %arg9[%c0_20, %c0_21, %c0_22], %48 {strides = array<i32>} : memref<2x4x64xbf16, #tpu.memory_space<vmem>>, vector<2x1x64xbf16>,
    %c0_23 = arith.constant 0 : index
    %c0_24 = arith.constant 0 : index
    %c0_25 = arith.constant 0 : index
    %50 = vector.load %arg2[%c0_23, %c0_24, %c0_25] : memref<2x64x192xbf16, #tpu.memory_space<vmem>>, vector<1x64x192xbf16>
    %51 = vector.shape_cast %50 : vector<1x64x192xbf16> to vector<64x192xbf16>
    %cst_26 = arith.constant dense<0.000000e+00> : vector<2x192xf32>
    %52 = tpu.matmul %47, %51, %cst_26 {dimension_numbers = #tpu.dot_dimension_numbers<[1], [0], [0], [1], [0, 0, 1, 1], [], []>} : vector<2x64xbf16>, vector<64x192xbf16>, vector<2x192xf32> -> vector<2x192xf32>
    %c0_27 = arith.constant 0 : index
    %c0_28 = arith.constant 0 : index
    %c0_29 = arith.constant 0 : index
    %53 = vector.load %arg4[%c0_27, %c0_28, %c0_29] : memref<2x1x192xf32, #tpu.memory_space<vmem>>, vector<1x1x192xf32>
    %54 = vector.shape_cast %53 : vector<1x1x192xf32> to vector<1x192xf32>
    %55 = vector.broadcast %54 : vector<1x192xf32> to vector<2x192xf32>
    %56 = arith.addf %52, %55 : vector<2x192xf32>
    %57 = vector.extract_strided_slice %9 {offsets = [0, 1, 0], sizes = [2, 1, 192], strides = [1, 1, 1]} : vector<2x4x192xf32> to vector<2x1x192xf32>
    %58 = vector.shape_cast %57 : vector<2x1x192xf32> to vector<2x192xf32>
    %59 = vector.extract_strided_slice %58 {offsets = [0, 0], sizes = [2, 64], strides = [1, 1]} : vector<2x192xf32> to vector<2x64xf32>
    %60 = vector.extract_strided_slice %56 {offsets = [0, 0], sizes = [2, 64], strides = [1, 1]} : vector<2x192xf32> to vector<2x64xf32>
    %61 = arith.addf %59, %60 : vector<2x64xf32>
    %62 = arith.negf %61 : vector<2x64xf32>
    %63 = math.exp %62 : vector<2x64xf32>
    %cst_30 = arith.constant 1.000000e+00 : f32
    %64 = vector.broadcast %cst_30 : f32 to vector<2x64xf32>
    %65 = arith.addf %64, %63 : vector<2x64xf32>
    %66 = arith.divf %64, %65 : vector<2x64xf32>
    %67 = vector.extract_strided_slice %58 {offsets = [0, 64], sizes = [2, 64], strides = [1, 1]} : vector<2x192xf32> to vector<2x64xf32>
    %68 = vector.extract_strided_slice %56 {offsets = [0, 64], sizes = [2, 64], strides = [1, 1]} : vector<2x192xf32> to vector<2x64xf32>
    %69 = arith.addf %67, %68 : vector<2x64xf32>
    %70 = arith.negf %69 : vector<2x64xf32>
    %71 = math.exp %70 : vector<2x64xf32>
    %cst_31 = arith.constant 1.000000e+00 : f32
    %72 = vector.broadcast %cst_31 : f32 to vector<2x64xf32>
    %73 = arith.addf %72, %71 : vector<2x64xf32>
    %74 = arith.divf %72, %73 : vector<2x64xf32>
    %75 = vector.extract_strided_slice %58 {offsets = [0, 128], sizes = [2, 64], strides = [1, 1]} : vector<2x192xf32> to vector<2x64xf32>
    %76 = vector.extract_strided_slice %56 {offsets = [0, 128], sizes = [2, 64], strides = [1, 1]} : vector<2x192xf32> to vector<2x64xf32>
    %77 = arith.mulf %66, %76 : vector<2x64xf32>
    %78 = arith.addf %75, %77 : vector<2x64xf32>
    %79 = math.tanh %78 : vector<2x64xf32>
    %cst_32 = arith.constant 1.000000e+00 : f32
    %80 = vector.broadcast %cst_32 : f32 to vector<2x64xf32>
    %81 = arith.subf %80, %74 : vector<2x64xf32>
    %82 = arith.mulf %81, %79 : vector<2x64xf32>
    %83 = arith.mulf %74, %46 : vector<2x64xf32>
    %84 = arith.addf %82, %83 : vector<2x64xf32>
    %85 = arith.truncf %84 : vector<2x64xf32> to vector<2x64xbf16>
    %86 = vector.shape_cast %85 : vector<2x64xbf16> to vector<2x1x64xbf16>
    %c0_33 = arith.constant 0 : index
    %c1 = arith.constant 1 : index
    %c0_34 = arith.constant 0 : index
    %87 = vector.load %arg9[%c0_33, %c1, %c0_34] : memref<2x4x64xbf16, #tpu.memory_space<vmem>>, vector<2x1x64xbf16>
    tpu.vector_store %arg9[%c0_33, %c1, %c0_34], %86 {strides = array<i32>} : memref<2x4x64xbf16, #tpu.memory_space<vmem>>, vector<2x1x64xbf16>,
    %c0_35 = arith.constant 0 : index
    %c0_36 = arith.constant 0 : index
    %c0_37 = arith.constant 0 : index
    %88 = vector.load %arg2[%c0_35, %c0_36, %c0_37] : memref<2x64x192xbf16, #tpu.memory_space<vmem>>, vector<1x64x192xbf16>
    %89 = vector.shape_cast %88 : vector<1x64x192xbf16> to vector<64x192xbf16>
    %cst_38 = arith.constant dense<0.000000e+00> : vector<2x192xf32>
    %90 = tpu.matmul %85, %89, %cst_38 {dimension_numbers = #tpu.dot_dimension_numbers<[1], [0], [0], [1], [0, 0, 1, 1], [], []>} : vector<2x64xbf16>, vector<64x192xbf16>, vector<2x192xf32> -> vector<2x192xf32>
    %c0_39 = arith.constant 0 : index
    %c0_40 = arith.constant 0 : index
    %c0_41 = arith.constant 0 : index
    %91 = vector.load %arg4[%c0_39, %c0_40, %c0_41] : memref<2x1x192xf32, #tpu.memory_space<vmem>>, vector<1x1x192xf32>
    %92 = vector.shape_cast %91 : vector<1x1x192xf32> to vector<1x192xf32>
    %93 = vector.broadcast %92 : vector<1x192xf32> to vector<2x192xf32>
    %94 = arith.addf %90, %93 : vector<2x192xf32>
    %95 = vector.extract_strided_slice %9 {offsets = [0, 2, 0], sizes = [2, 1, 192], strides = [1, 1, 1]} : vector<2x4x192xf32> to vector<2x1x192xf32>
    %96 = vector.shape_cast %95 : vector<2x1x192xf32> to vector<2x192xf32>
    %97 = vector.extract_strided_slice %96 {offsets = [0, 0], sizes = [2, 64], strides = [1, 1]} : vector<2x192xf32> to vector<2x64xf32>
    %98 = vector.extract_strided_slice %94 {offsets = [0, 0], sizes = [2, 64], strides = [1, 1]} : vector<2x192xf32> to vector<2x64xf32>
    %99 = arith.addf %97, %98 : vector<2x64xf32>
    %100 = arith.negf %99 : vector<2x64xf32>
    %101 = math.exp %100 : vector<2x64xf32>
    %cst_42 = arith.constant 1.000000e+00 : f32
    %102 = vector.broadcast %cst_42 : f32 to vector<2x64xf32>
    %103 = arith.addf %102, %101 : vector<2x64xf32>
    %104 = arith.divf %102, %103 : vector<2x64xf32>
    %105 = vector.extract_strided_slice %96 {offsets = [0, 64], sizes = [2, 64], strides = [1, 1]} : vector<2x192xf32> to vector<2x64xf32>
    %106 = vector.extract_strided_slice %94 {offsets = [0, 64], sizes = [2, 64], strides = [1, 1]} : vector<2x192xf32> to vector<2x64xf32>
    %107 = arith.addf %105, %106 : vector<2x64xf32>
    %108 = arith.negf %107 : vector<2x64xf32>
    %109 = math.exp %108 : vector<2x64xf32>
    %cst_43 = arith.constant 1.000000e+00 : f32
    %110 = vector.broadcast %cst_43 : f32 to vector<2x64xf32>
    %111 = arith.addf %110, %109 : vector<2x64xf32>
    %112 = arith.divf %110, %111 : vector<2x64xf32>
    %113 = vector.extract_strided_slice %96 {offsets = [0, 128], sizes = [2, 64], strides = [1, 1]} : vector<2x192xf32> to vector<2x64xf32>
    %114 = vector.extract_strided_slice %94 {offsets = [0, 128], sizes = [2, 64], strides = [1, 1]} : vector<2x192xf32> to vector<2x64xf32>
    %115 = arith.mulf %104, %114 : vector<2x64xf32>
    %116 = arith.addf %113, %115 : vector<2x64xf32>
    %117 = math.tanh %116 : vector<2x64xf32>
    %cst_44 = arith.constant 1.000000e+00 : f32
    %118 = vector.broadcast %cst_44 : f32 to vector<2x64xf32>
    %119 = arith.subf %118, %112 : vector<2x64xf32>
    %120 = arith.mulf %119, %117 : vector<2x64xf32>
    %121 = arith.mulf %112, %84 : vector<2x64xf32>
    %122 = arith.addf %120, %121 : vector<2x64xf32>
    %123 = arith.truncf %122 : vector<2x64xf32> to vector<2x64xbf16>
    %124 = vector.shape_cast %123 : vector<2x64xbf16> to vector<2x1x64xbf16>
    %c0_45 = arith.constant 0 : index
    %c2 = arith.constant 2 : index
    %c0_46 = arith.constant 0 : index
    %125 = vector.load %arg9[%c0_45, %c2, %c0_46] : memref<2x4x64xbf16, #tpu.memory_space<vmem>>, vector<2x1x64xbf16>
    tpu.vector_store %arg9[%c0_45, %c2, %c0_46], %124 {strides = array<i32>} : memref<2x4x64xbf16, #tpu.memory_space<vmem>>, vector<2x1x64xbf16>,
    %c0_47 = arith.constant 0 : index
    %c0_48 = arith.constant 0 : index
    %c0_49 = arith.constant 0 : index
    %126 = vector.load %arg2[%c0_47, %c0_48, %c0_49] : memref<2x64x192xbf16, #tpu.memory_space<vmem>>, vector<1x64x192xbf16>
    %127 = vector.shape_cast %126 : vector<1x64x192xbf16> to vector<64x192xbf16>
    %cst_50 = arith.constant dense<0.000000e+00> : vector<2x192xf32>
    %128 = tpu.matmul %123, %127, %cst_50 {dimension_numbers = #tpu.dot_dimension_numbers<[1], [0], [0], [1], [0, 0, 1, 1], [], []>} : vector<2x64xbf16>, vector<64x192xbf16>, vector<2x192xf32> -> vector<2x192xf32>
    %c0_51 = arith.constant 0 : index
    %c0_52 = arith.constant 0 : index
    %c0_53 = arith.constant 0 : index
    %129 = vector.load %arg4[%c0_51, %c0_52, %c0_53] : memref<2x1x192xf32, #tpu.memory_space<vmem>>, vector<1x1x192xf32>
    %130 = vector.shape_cast %129 : vector<1x1x192xf32> to vector<1x192xf32>
    %131 = vector.broadcast %130 : vector<1x192xf32> to vector<2x192xf32>
    %132 = arith.addf %128, %131 : vector<2x192xf32>
    %133 = vector.extract_strided_slice %9 {offsets = [0, 3, 0], sizes = [2, 1, 192], strides = [1, 1, 1]} : vector<2x4x192xf32> to vector<2x1x192xf32>
    %134 = vector.shape_cast %133 : vector<2x1x192xf32> to vector<2x192xf32>
    %135 = vector.extract_strided_slice %134 {offsets = [0, 0], sizes = [2, 64], strides = [1, 1]} : vector<2x192xf32> to vector<2x64xf32>
    %136 = vector.extract_strided_slice %132 {offsets = [0, 0], sizes = [2, 64], strides = [1, 1]} : vector<2x192xf32> to vector<2x64xf32>
    %137 = arith.addf %135, %136 : vector<2x64xf32>
    %138 = arith.negf %137 : vector<2x64xf32>
    %139 = math.exp %138 : vector<2x64xf32>
    %cst_54 = arith.constant 1.000000e+00 : f32
    %140 = vector.broadcast %cst_54 : f32 to vector<2x64xf32>
    %141 = arith.addf %140, %139 : vector<2x64xf32>
    %142 = arith.divf %140, %141 : vector<2x64xf32>
    %143 = vector.extract_strided_slice %134 {offsets = [0, 64], sizes = [2, 64], strides = [1, 1]} : vector<2x192xf32> to vector<2x64xf32>
    %144 = vector.extract_strided_slice %132 {offsets = [0, 64], sizes = [2, 64], strides = [1, 1]} : vector<2x192xf32> to vector<2x64xf32>
    %145 = arith.addf %143, %144 : vector<2x64xf32>
    %146 = arith.negf %145 : vector<2x64xf32>
    %147 = math.exp %146 : vector<2x64xf32>
    %cst_55 = arith.constant 1.000000e+00 : f32
    %148 = vector.broadcast %cst_55 : f32 to vector<2x64xf32>
    %149 = arith.addf %148, %147 : vector<2x64xf32>
    %150 = arith.divf %148, %149 : vector<2x64xf32>
    %151 = vector.extract_strided_slice %134 {offsets = [0, 128], sizes = [2, 64], strides = [1, 1]} : vector<2x192xf32> to vector<2x64xf32>
    %152 = vector.extract_strided_slice %132 {offsets = [0, 128], sizes = [2, 64], strides = [1, 1]} : vector<2x192xf32> to vector<2x64xf32>
    %153 = arith.mulf %142, %152 : vector<2x64xf32>
    %154 = arith.addf %151, %153 : vector<2x64xf32>
    %155 = math.tanh %154 : vector<2x64xf32>
    %cst_56 = arith.constant 1.000000e+00 : f32
    %156 = vector.broadcast %cst_56 : f32 to vector<2x64xf32>
    %157 = arith.subf %156, %150 : vector<2x64xf32>
    %158 = arith.mulf %157, %155 : vector<2x64xf32>
    %159 = arith.mulf %150, %122 : vector<2x64xf32>
    %160 = arith.addf %158, %159 : vector<2x64xf32>
    %161 = arith.truncf %160 : vector<2x64xf32> to vector<2x64xbf16>
    %162 = vector.shape_cast %161 : vector<2x64xbf16> to vector<2x1x64xbf16>
    %c0_57 = arith.constant 0 : index
    %c3 = arith.constant 3 : index
    %c0_58 = arith.constant 0 : index
    %163 = vector.load %arg9[%c0_57, %c3, %c0_58] : memref<2x4x64xbf16, #tpu.memory_space<vmem>>, vector<2x1x64xbf16>
    tpu.vector_store %arg9[%c0_57, %c3, %c0_58], %162 {strides = array<i32>} : memref<2x4x64xbf16, #tpu.memory_space<vmem>>, vector<2x1x64xbf16>,
    %c1_59 = arith.constant 1 : index
    %c0_60 = arith.constant 0 : index
    %c0_61 = arith.constant 0 : index
    %164 = vector.load %arg1[%c1_59, %c0_60, %c0_61] : memref<2x128x192xbf16, #tpu.memory_space<vmem>>, vector<1x128x192xbf16>
    %165 = vector.shape_cast %164 : vector<1x128x192xbf16> to vector<128x192xbf16>
    %cst_62 = arith.constant dense<0.000000e+00> : vector<8x192xf32>
    %166 = tpu.matmul %1, %165, %cst_62 {dimension_numbers = #tpu.dot_dimension_numbers<[1], [0], [0], [1], [0, 0, 1, 1], [], []>} : vector<8x128xbf16>, vector<128x192xbf16>, vector<8x192xf32> -> vector<8x192xf32>
    %c1_63 = arith.constant 1 : index
    %c0_64 = arith.constant 0 : index
    %c0_65 = arith.constant 0 : index
    %167 = vector.load %arg3[%c1_63, %c0_64, %c0_65] : memref<2x1x192xf32, #tpu.memory_space<vmem>>, vector<1x1x192xf32>
    %168 = vector.shape_cast %167 : vector<1x1x192xf32> to vector<1x192xf32>
    %169 = vector.broadcast %168 : vector<1x192xf32> to vector<8x192xf32>
    %170 = arith.addf %166, %169 : vector<8x192xf32>
    %171 = vector.shape_cast %170 : vector<8x192xf32> to vector<2x4x192xf32>
    %cst_66 = arith.constant 0.000000e+00 : f32
    %172 = vector.broadcast %cst_66 : f32 to vector<2x64xf32>
    %cst_67 = arith.constant 0.000000e+00 : bf16
    %173 = vector.broadcast %cst_67 : bf16 to vector<2x64xbf16>
    %c1_68 = arith.constant 1 : index
    %c0_69 = arith.constant 0 : index
    %c0_70 = arith.constant 0 : index
    %174 = vector.load %arg2[%c1_68, %c0_69, %c0_70] : memref<2x64x192xbf16, #tpu.memory_space<vmem>>, vector<1x64x192xbf16>
    %175 = vector.shape_cast %174 : vector<1x64x192xbf16> to vector<64x192xbf16>
    %cst_71 = arith.constant dense<0.000000e+00> : vector<2x192xf32>
    %176 = tpu.matmul %173, %175, %cst_71 {dimension_numbers = #tpu.dot_dimension_numbers<[1], [0], [0], [1], [0, 0, 1, 1], [], []>} : vector<2x64xbf16>, vector<64x192xbf16>, vector<2x192xf32> -> vector<2x192xf32>
    %c1_72 = arith.constant 1 : index
    %c0_73 = arith.constant 0 : index
    %c0_74 = arith.constant 0 : index
    %177 = vector.load %arg4[%c1_72, %c0_73, %c0_74] : memref<2x1x192xf32, #tpu.memory_space<vmem>>, vector<1x1x192xf32>
    %178 = vector.shape_cast %177 : vector<1x1x192xf32> to vector<1x192xf32>
    %179 = vector.broadcast %178 : vector<1x192xf32> to vector<2x192xf32>
    %180 = arith.addf %176, %179 : vector<2x192xf32>
    %181 = vector.extract_strided_slice %171 {offsets = [0, 3, 0], sizes = [2, 1, 192], strides = [1, 1, 1]} : vector<2x4x192xf32> to vector<2x1x192xf32>
    %182 = vector.shape_cast %181 : vector<2x1x192xf32> to vector<2x192xf32>
    %183 = vector.extract_strided_slice %182 {offsets = [0, 0], sizes = [2, 64], strides = [1, 1]} : vector<2x192xf32> to vector<2x64xf32>
    %184 = vector.extract_strided_slice %180 {offsets = [0, 0], sizes = [2, 64], strides = [1, 1]} : vector<2x192xf32> to vector<2x64xf32>
    %185 = arith.addf %183, %184 : vector<2x64xf32>
    %186 = arith.negf %185 : vector<2x64xf32>
    %187 = math.exp %186 : vector<2x64xf32>
    %cst_75 = arith.constant 1.000000e+00 : f32
    %188 = vector.broadcast %cst_75 : f32 to vector<2x64xf32>
    %189 = arith.addf %188, %187 : vector<2x64xf32>
    %190 = arith.divf %188, %189 : vector<2x64xf32>
    %191 = vector.extract_strided_slice %182 {offsets = [0, 64], sizes = [2, 64], strides = [1, 1]} : vector<2x192xf32> to vector<2x64xf32>
    %192 = vector.extract_strided_slice %180 {offsets = [0, 64], sizes = [2, 64], strides = [1, 1]} : vector<2x192xf32> to vector<2x64xf32>
    %193 = arith.addf %191, %192 : vector<2x64xf32>
    %194 = arith.negf %193 : vector<2x64xf32>
    %195 = math.exp %194 : vector<2x64xf32>
    %cst_76 = arith.constant 1.000000e+00 : f32
    %196 = vector.broadcast %cst_76 : f32 to vector<2x64xf32>
    %197 = arith.addf %196, %195 : vector<2x64xf32>
    %198 = arith.divf %196, %197 : vector<2x64xf32>
    %199 = vector.extract_strided_slice %182 {offsets = [0, 128], sizes = [2, 64], strides = [1, 1]} : vector<2x192xf32> to vector<2x64xf32>
    %200 = vector.extract_strided_slice %180 {offsets = [0, 128], sizes = [2, 64], strides = [1, 1]} : vector<2x192xf32> to vector<2x64xf32>
    %201 = arith.mulf %190, %200 : vector<2x64xf32>
    %202 = arith.addf %199, %201 : vector<2x64xf32>
    %203 = math.tanh %202 : vector<2x64xf32>
    %cst_77 = arith.constant 1.000000e+00 : f32
    %204 = vector.broadcast %cst_77 : f32 to vector<2x64xf32>
    %205 = arith.subf %204, %198 : vector<2x64xf32>
    %206 = arith.mulf %205, %203 : vector<2x64xf32>
    %207 = arith.mulf %198, %172 : vector<2x64xf32>
    %208 = arith.addf %206, %207 : vector<2x64xf32>
    %209 = arith.truncf %208 : vector<2x64xf32> to vector<2x64xbf16>
    %210 = vector.shape_cast %209 : vector<2x64xbf16> to vector<2x1x64xbf16>
    %c0_78 = arith.constant 0 : index
    %c3_79 = arith.constant 3 : index
    %c0_80 = arith.constant 0 : index
    %211 = vector.load %arg10[%c0_78, %c3_79, %c0_80] : memref<2x4x64xbf16, #tpu.memory_space<vmem>>, vector<2x1x64xbf16>
    tpu.vector_store %arg10[%c0_78, %c3_79, %c0_80], %210 {strides = array<i32>} : memref<2x4x64xbf16, #tpu.memory_space<vmem>>, vector<2x1x64xbf16>,
    %c1_81 = arith.constant 1 : index
    %c0_82 = arith.constant 0 : index
    %c0_83 = arith.constant 0 : index
    %212 = vector.load %arg2[%c1_81, %c0_82, %c0_83] : memref<2x64x192xbf16, #tpu.memory_space<vmem>>, vector<1x64x192xbf16>
    %213 = vector.shape_cast %212 : vector<1x64x192xbf16> to vector<64x192xbf16>
    %cst_84 = arith.constant dense<0.000000e+00> : vector<2x192xf32>
    %214 = tpu.matmul %209, %213, %cst_84 {dimension_numbers = #tpu.dot_dimension_numbers<[1], [0], [0], [1], [0, 0, 1, 1], [], []>} : vector<2x64xbf16>, vector<64x192xbf16>, vector<2x192xf32> -> vector<2x192xf32>
    %c1_85 = arith.constant 1 : index
    %c0_86 = arith.constant 0 : index
    %c0_87 = arith.constant 0 : index
    %215 = vector.load %arg4[%c1_85, %c0_86, %c0_87] : memref<2x1x192xf32, #tpu.memory_space<vmem>>, vector<1x1x192xf32>
    %216 = vector.shape_cast %215 : vector<1x1x192xf32> to vector<1x192xf32>
    %217 = vector.broadcast %216 : vector<1x192xf32> to vector<2x192xf32>
    %218 = arith.addf %214, %217 : vector<2x192xf32>
    %219 = vector.extract_strided_slice %171 {offsets = [0, 2, 0], sizes = [2, 1, 192], strides = [1, 1, 1]} : vector<2x4x192xf32> to vector<2x1x192xf32>
    %220 = vector.shape_cast %219 : vector<2x1x192xf32> to vector<2x192xf32>
    %221 = vector.extract_strided_slice %220 {offsets = [0, 0], sizes = [2, 64], strides = [1, 1]} : vector<2x192xf32> to vector<2x64xf32>
    %222 = vector.extract_strided_slice %218 {offsets = [0, 0], sizes = [2, 64], strides = [1, 1]} : vector<2x192xf32> to vector<2x64xf32>
    %223 = arith.addf %221, %222 : vector<2x64xf32>
    %224 = arith.negf %223 : vector<2x64xf32>
    %225 = math.exp %224 : vector<2x64xf32>
    %cst_88 = arith.constant 1.000000e+00 : f32
    %226 = vector.broadcast %cst_88 : f32 to vector<2x64xf32>
    %227 = arith.addf %226, %225 : vector<2x64xf32>
    %228 = arith.divf %226, %227 : vector<2x64xf32>
    %229 = vector.extract_strided_slice %220 {offsets = [0, 64], sizes = [2, 64], strides = [1, 1]} : vector<2x192xf32> to vector<2x64xf32>
    %230 = vector.extract_strided_slice %218 {offsets = [0, 64], sizes = [2, 64], strides = [1, 1]} : vector<2x192xf32> to vector<2x64xf32>
    %231 = arith.addf %229, %230 : vector<2x64xf32>
    %232 = arith.negf %231 : vector<2x64xf32>
    %233 = math.exp %232 : vector<2x64xf32>
    %cst_89 = arith.constant 1.000000e+00 : f32
    %234 = vector.broadcast %cst_89 : f32 to vector<2x64xf32>
    %235 = arith.addf %234, %233 : vector<2x64xf32>
    %236 = arith.divf %234, %235 : vector<2x64xf32>
    %237 = vector.extract_strided_slice %220 {offsets = [0, 128], sizes = [2, 64], strides = [1, 1]} : vector<2x192xf32> to vector<2x64xf32>
    %238 = vector.extract_strided_slice %218 {offsets = [0, 128], sizes = [2, 64], strides = [1, 1]} : vector<2x192xf32> to vector<2x64xf32>
    %239 = arith.mulf %228, %238 : vector<2x64xf32>
    %240 = arith.addf %237, %239 : vector<2x64xf32>
    %241 = math.tanh %240 : vector<2x64xf32>
    %cst_90 = arith.constant 1.000000e+00 : f32
    %242 = vector.broadcast %cst_90 : f32 to vector<2x64xf32>
    %243 = arith.subf %242, %236 : vector<2x64xf32>
    %244 = arith.mulf %243, %241 : vector<2x64xf32>
    %245 = arith.mulf %236, %208 : vector<2x64xf32>
    %246 = arith.addf %244, %245 : vector<2x64xf32>
    %247 = arith.truncf %246 : vector<2x64xf32> to vector<2x64xbf16>
    %248 = vector.shape_cast %247 : vector<2x64xbf16> to vector<2x1x64xbf16>
    %c0_91 = arith.constant 0 : index
    %c2_92 = arith.constant 2 : index
    %c0_93 = arith.constant 0 : index
    %249 = vector.load %arg10[%c0_91, %c2_92, %c0_93] : memref<2x4x64xbf16, #tpu.memory_space<vmem>>, vector<2x1x64xbf16>
    tpu.vector_store %arg10[%c0_91, %c2_92, %c0_93], %248 {strides = array<i32>} : memref<2x4x64xbf16, #tpu.memory_space<vmem>>, vector<2x1x64xbf16>,
    %c1_94 = arith.constant 1 : index
    %c0_95 = arith.constant 0 : index
    %c0_96 = arith.constant 0 : index
    %250 = vector.load %arg2[%c1_94, %c0_95, %c0_96] : memref<2x64x192xbf16, #tpu.memory_space<vmem>>, vector<1x64x192xbf16>
    %251 = vector.shape_cast %250 : vector<1x64x192xbf16> to vector<64x192xbf16>
    %cst_97 = arith.constant dense<0.000000e+00> : vector<2x192xf32>
    %252 = tpu.matmul %247, %251, %cst_97 {dimension_numbers = #tpu.dot_dimension_numbers<[1], [0], [0], [1], [0, 0, 1, 1], [], []>} : vector<2x64xbf16>, vector<64x192xbf16>, vector<2x192xf32> -> vector<2x192xf32>
    %c1_98 = arith.constant 1 : index
    %c0_99 = arith.constant 0 : index
    %c0_100 = arith.constant 0 : index
    %253 = vector.load %arg4[%c1_98, %c0_99, %c0_100] : memref<2x1x192xf32, #tpu.memory_space<vmem>>, vector<1x1x192xf32>
    %254 = vector.shape_cast %253 : vector<1x1x192xf32> to vector<1x192xf32>
    %255 = vector.broadcast %254 : vector<1x192xf32> to vector<2x192xf32>
    %256 = arith.addf %252, %255 : vector<2x192xf32>
    %257 = vector.extract_strided_slice %171 {offsets = [0, 1, 0], sizes = [2, 1, 192], strides = [1, 1, 1]} : vector<2x4x192xf32> to vector<2x1x192xf32>
    %258 = vector.shape_cast %257 : vector<2x1x192xf32> to vector<2x192xf32>
    %259 = vector.extract_strided_slice %258 {offsets = [0, 0], sizes = [2, 64], strides = [1, 1]} : vector<2x192xf32> to vector<2x64xf32>
    %260 = vector.extract_strided_slice %256 {offsets = [0, 0], sizes = [2, 64], strides = [1, 1]} : vector<2x192xf32> to vector<2x64xf32>
    %261 = arith.addf %259, %260 : vector<2x64xf32>
    %262 = arith.negf %261 : vector<2x64xf32>
    %263 = math.exp %262 : vector<2x64xf32>
    %cst_101 = arith.constant 1.000000e+00 : f32
    %264 = vector.broadcast %cst_101 : f32 to vector<2x64xf32>
    %265 = arith.addf %264, %263 : vector<2x64xf32>
    %266 = arith.divf %264, %265 : vector<2x64xf32>
    %267 = vector.extract_strided_slice %258 {offsets = [0, 64], sizes = [2, 64], strides = [1, 1]} : vector<2x192xf32> to vector<2x64xf32>
    %268 = vector.extract_strided_slice %256 {offsets = [0, 64], sizes = [2, 64], strides = [1, 1]} : vector<2x192xf32> to vector<2x64xf32>
    %269 = arith.addf %267, %268 : vector<2x64xf32>
    %270 = arith.negf %269 : vector<2x64xf32>
    %271 = math.exp %270 : vector<2x64xf32>
    %cst_102 = arith.constant 1.000000e+00 : f32
    %272 = vector.broadcast %cst_102 : f32 to vector<2x64xf32>
    %273 = arith.addf %272, %271 : vector<2x64xf32>
    %274 = arith.divf %272, %273 : vector<2x64xf32>
    %275 = vector.extract_strided_slice %258 {offsets = [0, 128], sizes = [2, 64], strides = [1, 1]} : vector<2x192xf32> to vector<2x64xf32>
    %276 = vector.extract_strided_slice %256 {offsets = [0, 128], sizes = [2, 64], strides = [1, 1]} : vector<2x192xf32> to vector<2x64xf32>
    %277 = arith.mulf %266, %276 : vector<2x64xf32>
    %278 = arith.addf %275, %277 : vector<2x64xf32>
    %279 = math.tanh %278 : vector<2x64xf32>
    %cst_103 = arith.constant 1.000000e+00 : f32
    %280 = vector.broadcast %cst_103 : f32 to vector<2x64xf32>
    %281 = arith.subf %280, %274 : vector<2x64xf32>
    %282 = arith.mulf %281, %279 : vector<2x64xf32>
    %283 = arith.mulf %274, %246 : vector<2x64xf32>
    %284 = arith.addf %282, %283 : vector<2x64xf32>
    %285 = arith.truncf %284 : vector<2x64xf32> to vector<2x64xbf16>
    %286 = vector.shape_cast %285 : vector<2x64xbf16> to vector<2x1x64xbf16>
    %c0_104 = arith.constant 0 : index
    %c1_105 = arith.constant 1 : index
    %c0_106 = arith.constant 0 : index
    %287 = vector.load %arg10[%c0_104, %c1_105, %c0_106] : memref<2x4x64xbf16, #tpu.memory_space<vmem>>, vector<2x1x64xbf16>
    tpu.vector_store %arg10[%c0_104, %c1_105, %c0_106], %286 {strides = array<i32>} : memref<2x4x64xbf16, #tpu.memory_space<vmem>>, vector<2x1x64xbf16>,
    %c1_107 = arith.constant 1 : index
    %c0_108 = arith.constant 0 : index
    %c0_109 = arith.constant 0 : index
    %288 = vector.load %arg2[%c1_107, %c0_108, %c0_109] : memref<2x64x192xbf16, #tpu.memory_space<vmem>>, vector<1x64x192xbf16>
    %289 = vector.shape_cast %288 : vector<1x64x192xbf16> to vector<64x192xbf16>
    %cst_110 = arith.constant dense<0.000000e+00> : vector<2x192xf32>
    %290 = tpu.matmul %285, %289, %cst_110 {dimension_numbers = #tpu.dot_dimension_numbers<[1], [0], [0], [1], [0, 0, 1, 1], [], []>} : vector<2x64xbf16>, vector<64x192xbf16>, vector<2x192xf32> -> vector<2x192xf32>
    %c1_111 = arith.constant 1 : index
    %c0_112 = arith.constant 0 : index
    %c0_113 = arith.constant 0 : index
    %291 = vector.load %arg4[%c1_111, %c0_112, %c0_113] : memref<2x1x192xf32, #tpu.memory_space<vmem>>, vector<1x1x192xf32>
    %292 = vector.shape_cast %291 : vector<1x1x192xf32> to vector<1x192xf32>
    %293 = vector.broadcast %292 : vector<1x192xf32> to vector<2x192xf32>
    %294 = arith.addf %290, %293 : vector<2x192xf32>
    %295 = vector.extract_strided_slice %171 {offsets = [0, 0, 0], sizes = [2, 1, 192], strides = [1, 1, 1]} : vector<2x4x192xf32> to vector<2x1x192xf32>
    %296 = vector.shape_cast %295 : vector<2x1x192xf32> to vector<2x192xf32>
    %297 = vector.extract_strided_slice %296 {offsets = [0, 0], sizes = [2, 64], strides = [1, 1]} : vector<2x192xf32> to vector<2x64xf32>
    %298 = vector.extract_strided_slice %294 {offsets = [0, 0], sizes = [2, 64], strides = [1, 1]} : vector<2x192xf32> to vector<2x64xf32>
    %299 = arith.addf %297, %298 : vector<2x64xf32>
    %300 = arith.negf %299 : vector<2x64xf32>
    %301 = math.exp %300 : vector<2x64xf32>
    %cst_114 = arith.constant 1.000000e+00 : f32
    %302 = vector.broadcast %cst_114 : f32 to vector<2x64xf32>
    %303 = arith.addf %302, %301 : vector<2x64xf32>
    %304 = arith.divf %302, %303 : vector<2x64xf32>
    %305 = vector.extract_strided_slice %296 {offsets = [0, 64], sizes = [2, 64], strides = [1, 1]} : vector<2x192xf32> to vector<2x64xf32>
    %306 = vector.extract_strided_slice %294 {offsets = [0, 64], sizes = [2, 64], strides = [1, 1]} : vector<2x192xf32> to vector<2x64xf32>
    %307 = arith.addf %305, %306 : vector<2x64xf32>
    %308 = arith.negf %307 : vector<2x64xf32>
    %309 = math.exp %308 : vector<2x64xf32>
    %cst_115 = arith.constant 1.000000e+00 : f32
    %310 = vector.broadcast %cst_115 : f32 to vector<2x64xf32>
    %311 = arith.addf %310, %309 : vector<2x64xf32>
    %312 = arith.divf %310, %311 : vector<2x64xf32>
    %313 = vector.extract_strided_slice %296 {offsets = [0, 128], sizes = [2, 64], strides = [1, 1]} : vector<2x192xf32> to vector<2x64xf32>
    %314 = vector.extract_strided_slice %294 {offsets = [0, 128], sizes = [2, 64], strides = [1, 1]} : vector<2x192xf32> to vector<2x64xf32>
    %315 = arith.mulf %304, %314 : vector<2x64xf32>
    %316 = arith.addf %313, %315 : vector<2x64xf32>
    %317 = math.tanh %316 : vector<2x64xf32>
    %cst_116 = arith.constant 1.000000e+00 : f32
    %318 = vector.broadcast %cst_116 : f32 to vector<2x64xf32>
    %319 = arith.subf %318, %312 : vector<2x64xf32>
    %320 = arith.mulf %319, %317 : vector<2x64xf32>
    %321 = arith.mulf %312, %284 : vector<2x64xf32>
    %322 = arith.addf %320, %321 : vector<2x64xf32>
    %323 = arith.truncf %322 : vector<2x64xf32> to vector<2x64xbf16>
    %324 = vector.shape_cast %323 : vector<2x64xbf16> to vector<2x1x64xbf16>
    %c0_117 = arith.constant 0 : index
    %c0_118 = arith.constant 0 : index
    %c0_119 = arith.constant 0 : index
    %325 = vector.load %arg10[%c0_117, %c0_118, %c0_119] : memref<2x4x64xbf16, #tpu.memory_space<vmem>>, vector<2x1x64xbf16>
    tpu.vector_store %arg10[%c0_117, %c0_118, %c0_119], %324 {strides = array<i32>} : memref<2x4x64xbf16, #tpu.memory_space<vmem>>, vector<2x1x64xbf16>,
    %c0_120 = arith.constant 0 : index
    %c0_121 = arith.constant 0 : index
    %c0_122 = arith.constant 0 : index
    %326 = vector.load %arg9[%c0_120, %c0_121, %c0_122] : memref<2x4x64xbf16, #tpu.memory_space<vmem>>, vector<2x4x64xbf16>
    %327 = vector.shape_cast %326 : vector<2x4x64xbf16> to vector<8x64xbf16>
    %c0_123 = arith.constant 0 : index
    %c0_124 = arith.constant 0 : index
    %c0_125 = arith.constant 0 : index
    %328 = vector.load %arg10[%c0_123, %c0_124, %c0_125] : memref<2x4x64xbf16, #tpu.memory_space<vmem>>, vector<2x4x64xbf16>
    %329 = vector.shape_cast %328 : vector<2x4x64xbf16> to vector<8x64xbf16>
    %330 = tpu.concatenate %327, %329 in 1 : vector<8x64xbf16>, vector<8x64xbf16> -> vector<8x128xbf16>
    %c0_126 = arith.constant 0 : index
    %c0_127 = arith.constant 0 : index
    %331 = vector.load %arg5[%c0_126, %c0_127] : memref<128x8xbf16, #tpu.memory_space<vmem>>, vector<128x8xbf16>
    %cst_128 = arith.constant dense<0.000000e+00> : vector<8x8xf32>
    %332 = tpu.matmul %330, %331, %cst_128 {dimension_numbers = #tpu.dot_dimension_numbers<[1], [0], [0], [1], [0, 0, 1, 1], [], []>} : vector<8x128xbf16>, vector<128x8xbf16>, vector<8x8xf32> -> vector<8x8xf32>
    %c0_129 = arith.constant 0 : index
    %c0_130 = arith.constant 0 : index
    %333 = vector.load %arg6[%c0_129, %c0_130] : memref<1x8xf32, #tpu.memory_space<vmem>>, vector<1x8xf32>
    %334 = vector.broadcast %333 : vector<1x8xf32> to vector<8x8xf32>
    %335 = arith.addf %332, %334 : vector<8x8xf32>
    %336 = arith.negf %335 : vector<8x8xf32>
    %337 = math.exp %336 : vector<8x8xf32>
    %cst_131 = arith.constant 1.000000e+00 : f32
    %338 = vector.broadcast %cst_131 : f32 to vector<8x8xf32>
    %339 = arith.addf %338, %337 : vector<8x8xf32>
    %340 = arith.divf %338, %339 : vector<8x8xf32>
    %341 = vector.shape_cast %340 : vector<8x8xf32> to vector<2x4x8xf32>
    %c0_132 = arith.constant 0 : index
    %c0_133 = arith.constant 0 : index
    %c0_134 = arith.constant 0 : index
    %342 = vector.load %arg7[%c0_132, %c0_133, %c0_134] : memref<2x4x8xf32, #tpu.memory_space<vmem>>, vector<2x4x8xf32>
    tpu.vector_store %arg7[%c0_132, %c0_133, %c0_134], %341 {strides = array<i32>} : memref<2x4x8xf32, #tpu.memory_space<vmem>>, vector<2x4x8xf32>,
    %343 = arith.mulf %341, %341 : vector<2x4x8xf32>
    %cst_135 = arith.constant dense<0.000000e+00> : vector<2x8xf32>
    %344 = vector.multi_reduction <add>, %343, %cst_135 [1] : vector<2x4x8xf32> to vector<2x8xf32>
    %cst_136 = arith.constant dense<0.000000e+00> : vector<2x8xf32>
    %345 = vector.multi_reduction <add>, %341, %cst_136 [1] : vector<2x4x8xf32> to vector<2x8xf32>
    %346 = arith.divf %344, %345 : vector<2x8xf32>
    %c0_137 = arith.constant 0 : index
    %c0_138 = arith.constant 0 : index
    %347 = vector.load %arg8[%c0_137, %c0_138] : memref<2x8xf32, #tpu.memory_space<vmem>>, vector<2x8xf32>
    tpu.vector_store %arg8[%c0_137, %c0_138], %346 {strides = array<i32>} : memref<2x8xf32, #tpu.memory_space<vmem>>, vector<2x8xf32>,
    return
  }
}

</mosaic_0001>

<bundles_post_ra>
// kernel: crnn_forward.6
= control target key start
LH: loop header
LB: loop body
LE: loop exit
PB: predicated region body
PF: predicated region fallthrough
CT: control target
= control target key end

     0   :  { %v1047_v1 = vmov 0   ;;  %vm18_vm0 = vcmask 1040384   ;;  %v21_v23 = vld [vmem:[#allocation2] sm:$0x1]  ;;  %vm19_vm1 = vsmask.f32 256  ;;  %s1298_s1 = inlined_call_operand.vmem [shape: bf16[384,256], index: 1, kind: input, shape index: {}]   ;;  %s1299_s0 = inlined_call_operand.vmem [shape: bf16[2,8,128], index: 0, kind: input, shape index: {}]   ;;  %s1300_s2 = inlined_call_operand.vmem [shape: f32[1,256], index: 2, kind: input, shape index: {}]   ;;  %s1301_s3 = inlined_call_operand.vmem [shape: f32[1,256], index: 3, kind: input, shape index: {}]   ;;  %s1302_s4 = inlined_call_operand.vmem [shape: bf16[2,4,128], index: 4, kind: output, shape index: {}]  }
   0x1   :  { %v971_v0 = vld [vmem:[%s1298_s1 + $0x84] ss:$8 sps:$4 sm:$0xff]   ;;  %235 = vmatprep.mubr.bf16.mxu1 %v1047_v1  ;;  %368 = vmatprep.mubr.bf16.mxu0 %v1047_v1  ;;  %v975_v3 = vld [vmem:[%s1298_s1 + $0x80] ss:$8 sps:$4 sm:$0xff]   ;;  %v977_v5 = vld [vmem:[%s1298_s1 + $0x94] ss:$8 sps:$4 sm:$0xff]  }
   0x2   :  { %v973_v2 = vld [vmem:[%s1298_s1 + $0x4] ss:$8 sps:$4 sm:$0xff]   ;;  %203 = vmatprep.subr.bf16.mxu1 %v971_v0  ;;  %v976_v4 = vld [vmem:[%s1298_s1] ss:$8 sps:$4 sm:$0xff]   ;;  %v979_v6 = vld [vmem:[%s1298_s1 + $0x14] ss:$8 sps:$4 sm:$0xff]  }
   0x3   :  { %336 = vmatprep.subr.bf16.mxu0 %v973_v2  ;;  %204 = vmatpush1.bf16.msra.mxu1 %v975_v3  ;;  %v981_v7 = vld [vmem:[%s1298_s1 + $0x90] ss:$8 sps:$4 sm:$0xff]   ;;  %v983_v9 = vld [vmem:[%s1298_s1 + $0xa4] ss:$8 sps:$4 sm:$0xff]   ;;  %v987_v11 = vld [vmem:[%s1298_s1 + $0xa0] ss:$8 sps:$4 sm:$0xff]  }
   0x4   :  { %337 = vmatpush1.bf16.msra.mxu0 %v976_v4  ;;  %205 = vmatprep.subr.bf16.mxu1 %v977_v5  ;;  %v982_v8 = vld [vmem:[%s1298_s1 + $0x10] ss:$8 sps:$4 sm:$0xff]   ;;  %v985_v10 = vld [vmem:[%s1298_s1 + $0x24] ss:$8 sps:$4 sm:$0xff]   ;;  %v988_v12 = vld [vmem:[%s1298_s1 + $0x20] ss:$8 sps:$4 sm:$0xff]  }
   0x5   :  { %338 = vmatprep.subr.bf16.mxu0 %v979_v6  ;;  %v989_v13 = vld [vmem:[%s1298_s1 + $0xb4] ss:$8 sps:$4 sm:$0xff]   ;;  %v993_v15 = vld [vmem:[%s1298_s1 + $0xb0] ss:$8 sps:$4 sm:$0xff]   ;;  %v995_v17 = vld [vmem:[%s1298_s1 + $0xc4] ss:$8 sps:$4 sm:$0xff]  }
   0x6   :  { %v991_v14 = vld [vmem:[%s1298_s1 + $0x34] ss:$8 sps:$4 sm:$0xff]   ;;  %v994_v16 = vld [vmem:[%s1298_s1 + $0x30] ss:$8 sps:$4 sm:$0xff]   ;;  %v997_v18 = vld [vmem:[%s1298_s1 + $0x44] ss:$8 sps:$4 sm:$0xff]  }
   0x7   :  { %206 = vmatpush1.bf16.msra.mxu1 %v981_v7  ;;  %v999_v19 = vld [vmem:[%s1298_s1 + $0xc0] ss:$8 sps:$4 sm:$0xff]   ;;  %v1001_v21 = vld [vmem:[%s1298_s1 + $0xd4] ss:$8 sps:$4 sm:$0xff]   ;;  %v1005_v24 = vld [vmem:[%s1298_s1 + $0xd0] ss:$8 sps:$4 sm:$0xff]  }
   0x8   :  { %339 = vmatpush1.bf16.msra.mxu0 %v982_v8  ;;  %207 = vmatprep.subr.bf16.mxu1 %v983_v9  ;;  %v1000_v20 = vld [vmem:[%s1298_s1 + $0x40] ss:$8 sps:$4 sm:$0xff]   ;;  %v1003_v22 = vld [vmem:[%s1298_s1 + $0x54] ss:$8 sps:$4 sm:$0xff]   ;;  %v1006_v25 = vld [vmem:[%s1298_s1 + $0x50] ss:$8 sps:$4 sm:$0xff]  }
   0x9   :  { %340 = vmatprep.subr.bf16.mxu0 %v985_v10  ;;  %v1007_v26 = vld [vmem:[%s1298_s1 + $0xe4] ss:$8 sps:$4 sm:$0xff]   ;;  %v1011_v28 = vld [vmem:[%s1298_s1 + $0xe0] ss:$8 sps:$4 sm:$0xff]   ;;  %vm1158_vm2 = vmand %vm18_vm0, %vm19_vm1  ;;  %vm35_vm3 = vcmask 1043456   ;;  %vm57_vm6 = vcmask 1041409  }
   0xa   :  { %v1009_v27 = vld [vmem:[%s1298_s1 + $0x64] ss:$8 sps:$4 sm:$0xff]   ;;  %v1012_v30 = vld [vmem:[%s1298_s1 + $0x60] ss:$8 sps:$4 sm:$0xff]   ;;  %v22_v31 = vsel %vm1158_vm2, 0, %v21_v23  ;;  %vm411_vm11 = vcmask 1046528  }
   0xb   :  { %208 = vmatpush1.bf16.msra.mxu1 %v987_v11  ;;  %v24_v32 = vld [vmem:[%s1299_s0] sm:$0xf]  ;;  %23 = vst [vmem:[#allocation2] sm:$0x1] %v22_v31  ;;  %v877_v35 = vld [vmem:[%s1299_s0 + $0x4] sm:$0xf] }
   0xc   :  { %341 = vmatpush1.bf16.msra.mxu0 %v988_v12  ;;  %209 = vmatprep.subr.bf16.mxu1 %v989_v13  ;;  %v26_v33 = vshrl.u32 %v24_v32, 16  ;;  %v29_v34 = vshll.u32 %v24_v32, 16  ;;  %v1013_v36 = vld [vmem:[%s1298_s1 + $0xf4] ss:$8 sps:$4 sm:$0xff]   ;;  %v51_v38 = vrot.slane %v877_v35, 7  ;;  %vm668_vm12 = vcmask 1042434  }
   0xd   :  { %342 = vmatprep.subr.bf16.mxu0 %v991_v14  ;;  %v1015_v37 = vld [vmem:[%s1298_s1 + $0x74] ss:$8 sps:$4 sm:$0xff]   ;;  %vm36_vm4 = vsmask.f32 7938  ;;  %v41_v40 = vld [vmem:[#allocation2 + $0x4] sm:$0x1]  ;;  %vm669_vm14 = vmor %vm18_vm0, %vm668_vm12 }
   0xe   :  { %v28_v39 = vrot.slane %v26_v33, 7  ;;  %v52_v41 = vrot.slane %v51_v38, 4  ;;  %55 = vst [vmem:[#allocation2 + $0x4] sm:$0xe] %v51_v38  ;;  %v1017_v42 = vld [vmem:[%s1298_s1 + $0xf0] ss:$8 sps:$4 sm:$0xff]   ;;  %vm37_vm5 = vmand %vm35_vm3, %vm36_vm4 }
   0xf   :  { %210 = vmatpush1.bf16.msra.mxu1 %v993_v15  ;;  %v1018_v43 = vld [vmem:[%s1298_s1 + $0x70] ss:$8 sps:$4 sm:$0xff]   ;;  %v1021_v46 = vld [vmem:[%s1298_s1 + $0x104] ss:$8 sps:$4 sm:$0xff]   ;;  %vm58_vm7 = vsmask.f32 1280  ;;  %vm44_vm9 = vmand %vm18_vm0, %vm36_vm4 }
  0x10   :  { %343 = vmatpush1.bf16.msra.mxu0 %v994_v16  ;;  %211 = vmatprep.subr.bf16.mxu1 %v995_v17  ;;  %v31_v44 = vor.u32 %v29_v34, %v28_v39  ;;  %v32_v45 = vrot.slane %v28_v39, 4  ;;  %56 = vst [vmem:[#allocation2 + $0x8] sm:$0x1] %v52_v41  ;;  %vm59_vm8 = vmand %vm57_vm6, %vm58_vm7  ;;  %v60_v50 = vld [vmem:[#allocation2 + $0x8] sm:$0x2]  ;;  %vm670_vm13 = vcmask 1044484  }
  0x11   :  { %344 = vmatprep.subr.bf16.mxu0 %v997_v18  ;;  %v61_v51 = vsel %vm59_vm8, 0, %v60_v50  ;;  %v1019_v56 = vld [vmem:[%s1298_s1 + $0x100] ss:$8 sps:$4 sm:$0xff]   ;;  %v1026_v60 = vld [vmem:[%s1298_s1 + $0x114] ss:$8 sps:$4 sm:$0xff]   ;;  %vm671_vm15 = vmor %vm669_vm14, %vm670_vm13  ;;  %vm672_vm1 = vcmask 1046534  }
  0x12   :  { %v42_v47 = vsel %vm1158_vm2, %v32_v45, %v41_v40  ;;  %v38_v48 = vld [vmem:[#allocation2] sm:$0xf]  ;;  %62 = vst [vmem:[#allocation2 + $0x8] sm:$0x2] %v61_v51  ;;  %v1024_v63 = vld [vmem:[%s1298_s1 + $0x110] ss:$8 sps:$4 sm:$0xff]   ;;  %vm1257_vm0 = vmor %vm671_vm15, %vm672_vm1 }
  0x13   :  { %212 = vmatpush1.bf16.msra.mxu1 %v999_v19  ;;  %43 = vst [vmem:[#allocation2 + $0x4] sm:$0x1] %v42_v47  ;;  %v39_v49 = vsel %vm37_vm5, %v31_v44, %v38_v48  ;;  %v1029_v3 = vld [vmem:[%s1298_s1 + $0x124] ss:$8 sps:$4 sm:$0xff]   ;;  %vm106_vm10 = vsmask.f32 7424 }
  0x14   :  { %345 = vmatpush1.bf16.msra.mxu0 %v1000_v20  ;;  %213 = vmatprep.subr.bf16.mxu1 %v1001_v21  ;;  %40 = vst [vmem:[#allocation2] sm:$0xf] %v39_v49  ;;  %v1027_v5 = vld [vmem:[%s1298_s1 + $0x120] ss:$8 sps:$4 sm:$0xff]   ;;  %v1032_v7 = vld [vmem:[%s1298_s1 + $0x134] ss:$8 sps:$4 sm:$0xff]  }
  0x15   :  { %346 = vmatprep.subr.bf16.mxu0 %v1003_v22  ;;  %v1030_v8 = vld [vmem:[%s1298_s1 + $0x130] ss:$8 sps:$4 sm:$0xff]   ;;  %v1035_v9 = vld [vmem:[%s1298_s1 + $0x144] ss:$8 sps:$4 sm:$0xff]   ;;  %v1033_v11 = vld [vmem:[%s1298_s1 + $0x140] ss:$8 sps:$4 sm:$0xff]  }
  0x16   :  { %v1038_v12 = vld [vmem:[%s1298_s1 + $0x154] ss:$8 sps:$4 sm:$0xff]   ;;  %v1036_v13 = vld [vmem:[%s1298_s1 + $0x150] ss:$8 sps:$4 sm:$0xff]   ;;  %v1041_v14 = vld [vmem:[%s1298_s1 + $0x164] ss:$8 sps:$4 sm:$0xff]  }
  0x17   :  { %214 = vmatpush1.bf16.msra.mxu1 %v1005_v24  ;;  %v1023_v54 = vld [vmem:[#allocation2 + $0x8] ss:$0 sps:$4 sm:$0x11]   ;;  %v1044_v18 = vld [vmem:[%s1298_s1 + $0x174] ss:$8 sps:$4 sm:$0xff]   ;;  %vm845_vm2 = vcmask 1043459  }
  0x18   :  { %347 = vmatpush1.bf16.msra.mxu0 %v1006_v25  ;;  %215 = vmatprep.subr.bf16.mxu1 %v1007_v26  ;;  %v115_v59 = vshll.u32 %v1023_v54, 16  ;;  %v119_v10 = vshrl.u32 %v1023_v54, 16  ;;  %v1039_v16 = vld [vmem:[%s1298_s1 + $0x160] ss:$8 sps:$4 sm:$0xff]   ;;  %v1042_v19 = vld [vmem:[%s1298_s1 + $0x170] ss:$8 sps:$4 sm:$0xff]  }
  0x19   :  { %348 = vmatprep.subr.bf16.mxu0 %v1009_v27  ;;  %v1046_v17 = vld [vmem:[#allocation2 + $0x8] ss:$0 sps:$4 sm:$0x33]   ;;  %v554_v40 = vld [vmem:[%s1300_s2] sm:$0x3] }
  0x1a   :  { %v45_v52 = vld [vmem:[#allocation2 + $0x4] sm:$0x1]  ;;  %v117_v2 = vrot.slane %v115_v59, 1  ;;  %v413_v21 = vrot.slane %v1046_v17, 1  ;;  %v1048_v45 = vmov 1983009808  }
  0x1b   :  { %216 = vmatpush1.bf16.msra.mxu1 %v1011_v28  ;;  %v46_v53 = vsel %vm44_vm9, 0, %v45_v52  ;;  %v63_v55 = vld [vmem:[#allocation2] sm:$0xf] }
  0x1c   :  { %349 = vmatpush1.bf16.msra.mxu0 %v1012_v30  ;;  %217 = vmatprep.subr.bf16.mxu1 %v1013_v36  ;;  %47 = vst [vmem:[#allocation2 + $0x4] sm:$0x1] %v46_v53  ;;  %v387_v15 = vld [vmem:[#allocation2] sm:$0xe] }
  0x1d   :  { %350 = vmatprep.subr.bf16.mxu0 %v1015_v37  ;;  %v556_v37 = vlaneseq }
  0x1f   :  { %218 = vmatpush1.bf16.msra.mxu1 %v1017_v42  ;;  %v557_v38 = vshrl.u32 %v556_v37, 7  ;;  %v572_v42 = vld [vmem:[%s1301_s3] sm:$0x3] }
  0x20   :  { %351 = vmatpush1.bf16.msra.mxu0 %v1018_v43  ;;  %941 = vmatprep.subr.bf16.mxu1 %v1021_v46 }
  0x21   :  { %497 = vmatprep.subr.bf16.mxu0 %v1021_v46  ;;  %v558_v39 = vsub.s32 0, %v557_v38  ;;  %v562_v41 = vsub.s32 1, %v557_v38  ;;  %v602_v46 = vunpack.c.l.s4 %v1048_v45 }
  0x23   :  { %v64_v57 = vld [vmem:[#allocation2 + $0x4] sm:$0xf]  ;;  %v559_v43 = vrot.slane %v554_v40, %v558_v39  ;;  %v563_v47 = vrot.slane %v554_v40, %v562_v41  ;;  %v577_v49 = vrot.slane %v572_v42, %v558_v39  ;;  %v581_v52 = vrot.slane %v572_v42, %v562_v41 }
  0x24   :  { %v878_v58 = vcombine.low %v63_v55, %v64_v57 }
  0x26   :  { %v108_v61 = vshrl.u32 %v878_v58, 16  ;;  %v110_v62 = vshll.u32 %v878_v58, 16  ;;  %369 = vmatmul.mubr.bf16.vlgmr.msra.gmra.mrb[0].mxu0 %v878_v58 }
  0x27   :  { %498 = vmatpush1.bf16.msra.mxu0 %v1019_v56  ;;  %378 = vmatprep.mubr.bf16.mxu0 %v1047_v1 }
  0x28   :  { %v112_v0 = vrot.slane %v110_v62, 1  ;;  %499 = vmatprep.subr.bf16.mxu0 %v1026_v60 }
  0x2a   :  { %v113_v4 = vor.u32 %v112_v0, %v108_v61 }
  0x2b   :  { %500 = vmatpush1.bf16.msra.mxu0 %v1024_v63 }
  0x2c   :  { %v118_v6 = vsel %vm106_vm10, %v113_v4, %v117_v2  ;;  %501 = vmatprep.subr.bf16.mxu0 %v1029_v3 }
  0x2d   :  { %236 = vmatmul.mubr.bf16.vlgmr.msra.gmra.mrb[0].mxu1 %v118_v6 }
  0x2e   :  { %949 = vmatpush1.bf16.msra.mxu1 %v1019_v56  ;;  %379 = vmatmul.mubr.bf16.gmra.mrb[4].mxu0 %v1023_v54 }
  0x2f   :  { %942 = vmatprep.subr.bf16.mxu1 %v1026_v60  ;;  %502 = vmatpush1.bf16.msra.mxu0 %v1027_v5 }
  0x30   :  { %503 = vmatprep.subr.bf16.mxu0 %v1032_v7  ;;  %245 = vmatprep.mubr.bf16.mxu1 %v1047_v1 }
  0x31   :  { %529 = vmatprep.mubr.bf16.mxu0 %v1047_v1 }
  0x32   :  { %950 = vmatpush1.bf16.msra.mxu1 %v1024_v63 }
  0x33   :  { %943 = vmatprep.subr.bf16.mxu1 %v1029_v3  ;;  %504 = vmatpush1.bf16.msra.mxu0 %v1030_v8 }
  0x34   :  { %505 = vmatprep.subr.bf16.mxu0 %v1035_v9 }
  0x35   :  { %246 = vmatmul.mubr.bf16.gmra.mrb[4].mxu1 %v119_v10 }
  0x36   :  { %951 = vmatpush1.bf16.msra.mxu1 %v1027_v5  ;;  %539 = vmatprep.mubr.bf16.mxu1 %v1047_v1  ;;  %v912_v1 = vcombine.low %v387_v15, %v64_v57  ;;  %v603_v57 = vunpack.c.0.s8 %v602_v46 }
  0x37   :  { %944 = vmatprep.subr.bf16.mxu1 %v1032_v7  ;;  %506 = vmatpush1.bf16.msra.mxu0 %v1033_v11 }
  0x38   :  { %507 = vmatprep.subr.bf16.mxu0 %v1038_v12  ;;  %v412_v20 = vrot.slane %v912_v1, 1  ;;  %v1249_v4 = vsub.s32 %v603_v57, %v557_v38 }
  0x3a   :  { %952 = vmatpush1.bf16.msra.mxu1 %v1030_v8  ;;  %v414_v22 = vsel %vm411_vm11, %v412_v20, %v413_v21 }
  0x3b   :  { %945 = vmatprep.subr.bf16.mxu1 %v1035_v9  ;;  %508 = vmatpush1.bf16.msra.mxu0 %v1036_v13 }
  0x3c   :  { %509 = vmatprep.subr.bf16.mxu0 %v1041_v14 }
  0x3e   :  { %953 = vmatpush1.bf16.msra.mxu1 %v1033_v11 }
  0x3f   :  { %946 = vmatprep.subr.bf16.mxu1 %v1038_v12  ;;  %510 = vmatpush1.bf16.msra.mxu0 %v1039_v16 }
  0x40   :  { %511 = vmatprep.subr.bf16.mxu0 %v1044_v18 }
  0x42   :  { %954 = vmatpush1.bf16.msra.mxu1 %v1036_v13 }
  0x43   :  { %947 = vmatprep.subr.bf16.mxu1 %v1041_v14  ;;  %512 = vmatpush1.bf16.msra.mxu0 %v1042_v19 }
  0x46   :  { %955 = vmatpush1.bf16.msra.mxu1 %v1039_v16  ;;  %530 = vmatmul.mubr.bf16.vlgmr.msra.gmra.mrb[0].mxu0 %v414_v22 }
  0x47   :  { %948 = vmatprep.subr.bf16.mxu1 %v1044_v18 }
  0x4a   :  { %956 = vmatpush1.bf16.msra.mxu1 %v1042_v19 }
  0x4d   :  { %540 = vmatmul.mubr.bf16.vlgmr.msra.gmra.mrb[8].mxu1 %v413_v21 }
 0x100   :  { %v237_v23 = vpop.f32.mrb[0].mxu1 }
 0x101   :  { %v239_v24 = vpop.f32.mrb[1].mxu1  ;;  %v380_v25 = vpop.f32.mrb[4].mxu0 }
 0x102   :  { %v241_v26 = vpop.f32.mrb[2].mxu1  ;;  %v382_v27 = vpop.f32.mrb[5].mxu0 }
 0x103   :  { %v243_v28 = vpop.f32.mrb[3].mxu1  ;;  %v384_v29 = vpop.f32.mrb[6].mxu0 }
 0x104   :  { %v385_v30 = vpop.f32.mrb[7].mxu0 }
 0x108   :  { %v247_v31 = vpop.f32.mrb[4].mxu1 }
 0x109   :  { %v381_v32 = vadd.f32 %v380_v25, %v247_v31  ;;  %v249_v33 = vpop.f32.mrb[5].mxu1 }
 0x10a   :  { %v383_v34 = vadd.f32 %v382_v27, %v249_v33  ;;  %v251_v35 = vpop.f32.mrb[6].mxu1 }
 0x10b   :  { %v252_v36 = vpop.f32.mrb[7].mxu1 }
 0x119   :  { %v531_v44 = vpop.f32.mrb[0].mxu0 }
 0x11a   :  { %v957_v48 = vadd.f32 %v531_v44, %v237_v23  ;;  %v533_v50 = vpop.f32.mrb[1].mxu0 }
 0x11b   :  { %v958_v51 = vadd.f32 %v533_v50, %v239_v24  ;;  %v535_v53 = vpop.f32.mrb[2].mxu0 }
 0x11c   :  { %v566_v54 = vmul.f32 %v957_v48, %v559_v43  ;;  %v959_v55 = vadd.f32 %v535_v53, %v241_v26  ;;  %v537_v56 = vpop.f32.mrb[3].mxu0 }
 0x11d   :  { %v567_v58 = vmul.f32 %v958_v51, %v563_v47  ;;  %v960_v59 = vadd.f32 %v537_v56, %v243_v28 }
 0x11e   :  { %v584_v60 = vadd.f32 %v577_v49, %v566_v54  ;;  %v568_v61 = vmul.f32 %v959_v55, %v559_v43 }
 0x11f   :  { %v585_v62 = vadd.f32 %v581_v52, %v567_v58  ;;  %v569_v63 = vmul.f32 %v960_v59, %v563_v47 }
 0x120   :  { %v590_v0 = vmax.f32 %v584_v60, 0.0  ;;  %v541_v2 = vpop.f32.mrb[8].mxu1  ;;  %v586_v3 = vadd.f32 %v577_v49, %v568_v61 }
 0x121   :  { %v552_v5 = vadd.f32 %v541_v2, %v381_v32  ;;  %v591_v6 = vmax.f32 %v585_v62, 0.0  ;;  %v543_v7 = vpop.f32.mrb[9].mxu1  ;;  %v587_v8 = vadd.f32 %v581_v52, %v569_v63 }
 0x122   :  { %v553_v9 = vadd.f32 %v543_v7, %v383_v34  ;;  %v592_v10 = vmax.f32 %v586_v3, 0.0  ;;  %v545_v11 = vpop.f32.mrb[10].mxu1 }
 0x123   :  { %v570_v12 = vmul.f32 %v559_v43, %v552_v5  ;;  %v596_v13 = vmax.f32 %v590_v0, %v591_v6  ;;  %v593_v14 = vmax.f32 %v587_v8, 0.0  ;;  %v546_v15 = vpop.f32.mrb[11].mxu1 }
 0x124   :  { %v571_v16 = vmul.f32 %v563_v47, %v553_v9 }
 0x125   :  { %v588_v1 = vadd.f32 %v577_v49, %v570_v12  ;;  %v600_v17 = vcombine.high %v596_v13, %v596_v13  ;;  %v607_v18 = vrot.slane %v596_v13, %v1249_v4  ;;  %v597_v19 = vmax.f32 %v592_v10, %v593_v14 }
 0x126   :  { %v589_v20 = vadd.f32 %v581_v52, %v571_v16 }
 0x127   :  { %v594_v21 = vmax.f32 %v588_v1, 0.0  ;;  %v614_v22 = vrot.slane %v600_v17, %v1249_v4  ;;  %v615_v23 = vcombine.high %v607_v18, %v607_v18  ;;  %v930_v24 = vrot.slane %v607_v18, 9 }
 0x128   :  { %v595_v25 = vmax.f32 %v589_v20, 0.0  ;;  %v643_v26 = vcombine.high %v597_v19, %v597_v19  ;;  %v650_v27 = vrot.slane %v597_v19, %v1249_v4 }
 0x129   :  { %v616_v28 = vcombine.high %v614_v22, %v614_v22  ;;  %v931_v29 = vrot.slane %v615_v23, 9  ;;  %v932_v30 = vrot.slane %v614_v22, 9  ;;  %v633_v31 = vmax.f32 %v607_v18, %v930_v24 }
 0x12a   :  { %v598_v32 = vmax.f32 %v594_v21, %v595_v25  ;;  %v657_v33 = vrot.slane %v643_v26, %v1249_v4  ;;  %v658_v34 = vcombine.high %v650_v27, %v650_v27  ;;  %v934_v35 = vrot.slane %v650_v27, 9 }
 0x12b   :  { %v933_v36 = vrot.slane %v616_v28, 9  ;;  %v634_v37 = vmax.f32 %v615_v23, %v931_v29  ;;  %v635_v38 = vmax.f32 %v614_v22, %v932_v30  ;;  %v637_v39 = vpack.c.bf16 %v633_v31, %v633_v31 }
 0x12c   :  { %v666_v41 = vrot.slane %v598_v32, %v1249_v4  ;;  %v659_v42 = vcombine.high %v657_v33, %v657_v33  ;;  %v676_v43 = vrot.slane %v658_v34, 7  ;;  %v679_v44 = vrot.slane %v657_v33, 7 }
 0x12d   :  { %v636_v45 = vmax.f32 %v616_v28, %v933_v36  ;;  %v638_v46 = vpack.c.bf16 %v634_v37, %v634_v37  ;;  %v639_v47 = vpack.c.bf16 %v635_v38, %v635_v38  ;;  %v725_v48 = vrot.slane %v637_v39, %v1249_v4 }
 0x12e   :  { %v677_v49 = vsel %vm1257_vm0, %v934_v35, %v676_v43  ;;  %v678_v50 = vrot.slane %v676_v43, 2  ;;  %v681_v51 = vrot.slane %v679_v44, 2  ;;  %v682_v57 = vrot.slane %v659_v42, 7 }
 0x12f   :  { %v640_v52 = vpack.c.bf16 %v636_v45, %v636_v45  ;;  %v732_v53 = vrot.slane %v638_v46, %v1249_v4  ;;  %v739_v54 = vrot.slane %v639_v47, %v1249_v4  ;;  %v781_v55 = vrot.slane %v725_v48, %v1249_v4 }
 0x130   :  { %v680_v56 = vsel %vm1257_vm0, %v678_v50, %v679_v44  ;;  %v935_v58 = vrot.slane %v677_v49, 9  ;;  %v685_v62 = vrot.slane %v666_v41, 7  ;;  %v683_v63 = vsel %vm1257_vm0, %v681_v51, %v682_v57 }
 0x131   :  { %v746_v59 = vrot.slane %v640_v52, %v1249_v4  ;;  %v788_v60 = vrot.slane %v732_v53, %v1249_v4  ;;  %v795_v61 = vrot.slane %v739_v54, %v1249_v4  ;;  %v684_v0 = vrot.slane %v682_v57, 2 }
 0x132   :  { %v936_v2 = vrot.slane %v680_v56, 9  ;;  %v703_v3 = vmax.f32 %v677_v49, %v935_v58  ;;  %v937_v8 = vrot.slane %v683_v63, 9  ;;  %v831_v9 = vunpack.c.l.b16 %v781_v55 }
 0x133   :  { %v802_v5 = vrot.slane %v746_v59, %v1249_v4  ;;  %v832_v6 = vunpack.c.l.b16 %v788_v60  ;;  %v833_v7 = vunpack.c.l.b16 %v795_v61  ;;  %v686_v10 = vsel %vm1257_vm0, %v684_v0, %v685_v62 }
 0x134   :  { %v704_v11 = vmax.f32 %v680_v56, %v936_v2  ;;  %v707_v12 = vpack.c.bf16 %v703_v3, %v703_v3  ;;  %v938_v16 = vrot.slane %v686_v10, 9  ;;  %v705_v1 = vmax.f32 %v683_v63, %v937_v8 }
 0x135   :  { %v834_v13 = vunpack.c.l.b16 %v802_v5  ;;  %v839_v14 = vrot.slane %v832_v6, 7  ;;  %v842_v15 = vrot.slane %v833_v7, 6 }
 0x136   :  { %v708_v17 = vpack.c.bf16 %v704_v11, %v704_v11  ;;  %v753_v18 = vrot.slane %v707_v12, %v1249_v4  ;;  %v706_v21 = vmax.f32 %v686_v10, %v938_v16  ;;  %v709_v22 = vpack.c.bf16 %v705_v1, %v705_v1 }
 0x137   :  { %v841_v19 = vsel %vm57_vm6, %v839_v14, %v831_v9  ;;  %v844_v20 = vrot.slane %v834_v13, 5 }
 0x138   :  { %v760_v23 = vrot.slane %v708_v17, %v1249_v4  ;;  %v843_v24 = vsel %vm668_vm12, %v842_v15, %v841_v19  ;;  %v710_v25 = vpack.c.bf16 %v706_v21, %v706_v21  ;;  %v767_v27 = vrot.slane %v709_v22, %v1249_v4 }
 0x139   :  { %v846_v26 = vsel %vm845_vm2, %v844_v20, %v843_v24  ;;  %v809_v28 = vrot.slane %v753_v18, %v1249_v4 }
 0x13a   :  { %v816_v29 = vrot.slane %v760_v23, %v1249_v4  ;;  %v853_v30 = vpack.c.b16 %v846_v26, %v846_v26  ;;  %v774_v31 = vrot.slane %v710_v25, %v1249_v4  ;;  %v823_v32 = vrot.slane %v767_v27, %v1249_v4 }
 0x13b   :  { %v835_v35 = vunpack.c.l.b16 %v809_v28 }
 0x13c   :  { %v836_v33 = vunpack.c.l.b16 %v816_v29  ;;  %939 = vst.sshfl [vmem:[%s1302_s4] sm:$0x3 pattern:$0x76325410] %v853_v30  ;;  %v830_v34 = vrot.slane %v774_v31, %v1249_v4  ;;  %v837_v36 = vunpack.c.l.b16 %v823_v32 }
 0x13e   :  { %v847_v37 = vrot.slane %v836_v33, 7  ;;  %v838_v38 = vunpack.c.l.b16 %v830_v34  ;;  %v849_v40 = vrot.slane %v837_v36, 6 }
 0x140   :  { %v848_v39 = vsel %vm57_vm6, %v847_v37, %v835_v35  ;;  %v851_v41 = vrot.slane %v838_v38, 5 }
 0x141   :  { %v850_v42 = vsel %vm668_vm12, %v849_v40, %v848_v39 }
 0x142   :  { %v852_v43 = vsel %vm845_vm2, %v851_v41, %v850_v42 }
 0x143   :  { %v854_v44 = vpack.c.b16 %v852_v43, %v852_v43 }
 0x145   :  { %940 = vst.sshfl [vmem:[%s1302_s4 + $0x2] sm:$0x3 pattern:$0x76325410] %v854_v44 }

// kernel: crnn_forward.5
= control target key start
LH: loop header
LB: loop body
LE: loop exit
PB: predicated region body
PF: predicated region fallthrough
CT: control target
= control target key end

     0   :  { %9 = vsyncpa [#allocation4], 0  ;;  %s1577_s0 = inlined_call_operand.vmem [shape: bf16[2,16,128], index: 0, kind: input, shape index: {}]   ;;  %s1578_s1 = inlined_call_operand.hbm [shape: bf16[384,256], index: 1, kind: input, shape index: {}]   ;;  %s1579_s2 = inlined_call_operand.hbm [shape: f32[1,256], index: 2, kind: input, shape index: {}]   ;;  %s1580_s3 = inlined_call_operand.hbm [shape: f32[1,256], index: 3, kind: input, shape index: {}]   ;;  %s1581_s4 = inlined_call_operand.vmem [shape: bf16[2,8,128], index: 4, kind: output, shape index: {}]  }
   0x1   :  { %10 = vsyncpa [#allocation6], 0  ;;  %s1337_s15 = smov [#allocation5]   ;;  %s1338_s17 = smov [#allocation3]  }
   0x2   :  { %s31_s16 = sshll.u32 %s1337_s15, 4  ;;  %s18_s18 = sshll.u32 %s1338_s17, 4  ;;  %s32_s16 = int_to_ptr.vmem [resolvable:$true] %s31_s16  ;;  %s1369_s18 = int_to_ptr.vmem [resolvable:$true] %s18_s18 }
   0x3   :  { %s1267_s21 = scalar_lea.hbm %s1579_s2, 32 }
   0x4   :  { %p1268_p0 = scmp.ne.s32.totalorder %s1579_s2, %s1267_s21  ;;  %p1271_p1 = scmp.lt.u32.totalorder %s1267_s21, %s1579_s2 }
   0x6   :  { %p1273_p2 = pnand %p1271_p1, %p1268_p0 }
   0x8   :  { %1276 = shalt.err (!%p1273_p2)
}
   0x9   :  { %s1277_s26 = scalar_lea.vmem %s32_s16, 32  ;;  %p1282_p4 = scmp.lt.s32.totalorder %s32_s16, %s32_s16 }
   0xa   :  { %p1278_p3 = scmp.ne.s32.totalorder %s32_s16, %s1277_s26  ;;  %p1283_p5 = scmp.lt.s32.totalorder %s1277_s26, %s1277_s26 }
   0xc   :  { %p1284_p6 = por %p1283_p5, %p1282_p4 }
   0xe   :  { %p1285_p7 = pnand %p1284_p6, %p1278_p3 }
  0x10   :  { %1288 = shalt.err (!%p1285_p7)
}
  0x11   :  { %34 = dma.hbm_to_vmem [thread:$0]  %s1579_s2, 32, %s32_s16, [#allocation6]  }
  0x12   :  { %s1289_s5 = scalar_lea.hbm %s1578_s1, 6144 }
  0x13   :  { %p1290_p8 = scmp.ne.s32.totalorder %s1578_s1, %s1289_s5  ;;  %p1293_p9 = scmp.lt.u32.totalorder %s1289_s5, %s1578_s1 }
  0x15   :  { %p1295_p10 = pnand %p1293_p9, %p1290_p8 }
  0x17   :  { %1298 = shalt.err (!%p1295_p10)
}
  0x18   :  { %s1299_s10 = scalar_lea.vmem %s1369_s18, 6144  ;;  %p1304_p12 = scmp.lt.s32.totalorder %s1369_s18, %s1369_s18 }
  0x19   :  { %p1300_p11 = scmp.ne.s32.totalorder %s1369_s18, %s1299_s10  ;;  %p1305_p13 = scmp.lt.s32.totalorder %s1299_s10, %s1299_s10 }
  0x1b   :  { %p1306_p0 = por %p1305_p13, %p1304_p12 }
  0x1d   :  { %p1307_p1 = pnand %p1306_p0, %p1300_p11 }
  0x1f   :  { %1310 = shalt.err (!%p1307_p1)
}
  0x20   :  { %s1339_s2 = smov 128   ;;  %s1340_s11 = smov 8  }
  0x21   :  { %24 = dma.hbm_to_vmem [thread:$0]  %s1578_s1, 6144, %s1369_s18, [#allocation4], %s1339_s2, %s1339_s2, %s1340_s11  }
  0x22   :  { %s1341_s14 = smov [#allocation7]   ;;  %s1311_s19 = scalar_lea.hbm %s1580_s3, 32 }
  0x23   :  { %s41_s15 = sshll.u32 %s1341_s14, 4  ;;  %p1312_p2 = scmp.ne.s32.totalorder %s1580_s3, %s1311_s19  ;;  %s42_s15 = int_to_ptr.vmem [resolvable:$true] %s41_s15 }
  0x24   :  { %p1315_p3 = scmp.lt.u32.totalorder %s1311_s19, %s1580_s3 }
  0x26   :  { %p1317_p4 = pnand %p1315_p3, %p1312_p2 }
  0x28   :  { %1320 = shalt.err (!%p1317_p4)
}
  0x29   :  { %s1321_s24 = scalar_lea.vmem %s42_s15, 32  ;;  %p1326_p6 = scmp.lt.s32.totalorder %s42_s15, %s42_s15 }
  0x2a   :  { %p1322_p5 = scmp.ne.s32.totalorder %s42_s15, %s1321_s24  ;;  %p1327_p7 = scmp.lt.s32.totalorder %s1321_s24, %s1321_s24 }
  0x2c   :  { %p1328_p8 = por %p1327_p7, %p1326_p6 }
  0x2e   :  { %p1329_p9 = pnand %p1328_p8, %p1322_p5 }
  0x30   :  { %1332 = shalt.err (!%p1329_p9)
}
  0x31   :  { %44 = dma.hbm_to_vmem [thread:$0]  %s1580_s3, 32, %s42_s15, [#allocation6]  }
  0x32   :  { %1333 = dma.done.wait [#allocation4], 6144  }
  0x33   :  { %1334 = vsyncadd [#allocation4], 4294961152 }
  0x34   :  { %1335 = dma.done.wait [#allocation6], 64  }
  0x35   :  { %1336 = vsyncadd [#allocation6], 4294967232  ;;  %v1342_v0 = vmov 0   ;;  %v1190_v1 = vld [vmem:[#allocation3 + $0x84] ss:$8 sps:$4 sm:$0xff]   ;;  %vm55_vm0 = vcmask 1040384  }
  0x36   :  { %311 = vmatprep.mubr.bf16.mxu1 %v1342_v0  ;;  %455 = vmatprep.mubr.bf16.mxu0 %v1342_v0  ;;  %v1192_v2 = vld [vmem:[#allocation3 + $0x4] ss:$8 sps:$4 sm:$0xff]   ;;  %v1194_v3 = vld [vmem:[#allocation3 + $0x80] ss:$8 sps:$4 sm:$0xff]   ;;  %v1196_v5 = vld [vmem:[#allocation3 + $0x94] ss:$8 sps:$4 sm:$0xff]  }
  0x37   :  { %279 = vmatprep.subr.bf16.mxu1 %v1190_v1  ;;  %v1195_v4 = vld [vmem:[#allocation3] ss:$8 sps:$4 sm:$0xff]   ;;  %423 = vmatprep.subr.bf16.mxu0 %v1192_v2  ;;  %v1198_v6 = vld [vmem:[#allocation3 + $0x14] ss:$8 sps:$4 sm:$0xff]   ;;  %v1200_v7 = vld [vmem:[#allocation3 + $0x90] ss:$8 sps:$4 sm:$0xff]  }
  0x38   :  { %280 = vmatpush1.bf16.msra.mxu1 %v1194_v3  ;;  %424 = vmatpush1.bf16.msra.mxu0 %v1195_v4  ;;  %v1201_v8 = vld [vmem:[#allocation3 + $0x10] ss:$8 sps:$4 sm:$0xff]   ;;  %v1202_v9 = vld [vmem:[#allocation3 + $0xa4] ss:$8 sps:$4 sm:$0xff]   ;;  %v1206_v11 = vld [vmem:[#allocation3 + $0xa0] ss:$8 sps:$4 sm:$0xff]  }
  0x39   :  { %281 = vmatprep.subr.bf16.mxu1 %v1196_v5  ;;  %425 = vmatprep.subr.bf16.mxu0 %v1198_v6  ;;  %v1204_v10 = vld [vmem:[#allocation3 + $0x24] ss:$8 sps:$4 sm:$0xff]   ;;  %v1207_v12 = vld [vmem:[#allocation3 + $0x20] ss:$8 sps:$4 sm:$0xff]   ;;  %v1208_v13 = vld [vmem:[#allocation3 + $0xb4] ss:$8 sps:$4 sm:$0xff]  }
  0x3a   :  { %v1210_v14 = vld [vmem:[#allocation3 + $0x34] ss:$8 sps:$4 sm:$0xff]   ;;  %v1212_v15 = vld [vmem:[#allocation3 + $0xb0] ss:$8 sps:$4 sm:$0xff]   ;;  %v1214_v17 = vld [vmem:[#allocation3 + $0xc4] ss:$8 sps:$4 sm:$0xff]  }
  0x3b   :  { %v1213_v16 = vld [vmem:[#allocation3 + $0x30] ss:$8 sps:$4 sm:$0xff]   ;;  %v1216_v18 = vld [vmem:[#allocation3 + $0x44] ss:$8 sps:$4 sm:$0xff]   ;;  %v1218_v19 = vld [vmem:[#allocation3 + $0xc0] ss:$8 sps:$4 sm:$0xff]  }
  0x3c   :  { %282 = vmatpush1.bf16.msra.mxu1 %v1200_v7  ;;  %426 = vmatpush1.bf16.msra.mxu0 %v1201_v8  ;;  %v1219_v20 = vld [vmem:[#allocation3 + $0x40] ss:$8 sps:$4 sm:$0xff]   ;;  %vm56_vm1 = vsmask.f32 256  ;;  %v1220_v21 = vld [vmem:[#allocation3 + $0xd4] ss:$8 sps:$4 sm:$0xff]  }
  0x3d   :  { %283 = vmatprep.subr.bf16.mxu1 %v1202_v9  ;;  %427 = vmatprep.subr.bf16.mxu0 %v1204_v10  ;;  %v1222_v22 = vld [vmem:[#allocation3 + $0x54] ss:$8 sps:$4 sm:$0xff]   ;;  %vm1416_vm2 = vmand %vm55_vm0, %vm56_vm1  ;;  %vm63_vm3 = vsmask.f32 4368  ;;  %v1224_v24 = vld [vmem:[#allocation3 + $0xd0] ss:$8 sps:$4 sm:$0xff]  }
  0x3e   :  { %vm86_vm4 = vsmask.f32 7938  ;;  %v1225_v25 = vld [vmem:[#allocation3 + $0x50] ss:$8 sps:$4 sm:$0xff]   ;;  %v1226_v26 = vld [vmem:[#allocation3 + $0xe4] ss:$8 sps:$4 sm:$0xff]   ;;  %vm1430_vm6 = vmor %vm56_vm1, %vm63_vm3 }
  0x3f   :  { %v1228_v27 = vld [vmem:[#allocation3 + $0x64] ss:$8 sps:$4 sm:$0xff]   ;;  %v1230_v30 = vld [vmem:[#allocation3 + $0xe0] ss:$8 sps:$4 sm:$0xff]   ;;  %v62_v33 = vld [vmem:[%s1577_s0 + $0x4] sm:$0xf] }
  0x40   :  { %284 = vmatpush1.bf16.msra.mxu1 %v1206_v11  ;;  %428 = vmatpush1.bf16.msra.mxu0 %v1207_v12  ;;  %v58_v28 = vld [vmem:[#allocation2] sm:$0x1]  ;;  %v1231_v31 = vld [vmem:[#allocation3 + $0x60] ss:$8 sps:$4 sm:$0xff]   ;;  %vm104_vm5 = vcmask 1044484   ;;  %v74_v37 = vshrl.u32 %v62_v33, 16  ;;  %vm95_vm13 = vmand %vm55_vm0, %vm86_vm4 }
  0x41   :  { %285 = vmatprep.subr.bf16.mxu1 %v1208_v13  ;;  %429 = vmatprep.subr.bf16.mxu0 %v1210_v14  ;;  %v61_v29 = vld [vmem:[%s1577_s0] sm:$0xf]  ;;  %v59_v32 = vsel %vm1416_vm2, 0, %v58_v28  ;;  %v77_v38 = vshll.u32 %v62_v33, 16  ;;  %vm85_vm7 = vcmask 1043456   ;;  %vm105_vm8 = vmor %vm55_vm0, %vm104_vm5  ;;  %vm117_vm10 = vcmask 1041409  }
  0x42   :  { %v66_v34 = vshrl.u32 %v61_v29, 16  ;;  %60 = vst [vmem:[#allocation2] sm:$0x1] %v59_v32  ;;  %v69_v36 = vshll.u32 %v61_v29, 16  ;;  %v1043_v39 = vld [vmem:[%s1577_s0 + $0x8] sm:$0xf]  ;;  %vm1444_vm9 = vmand %vm85_vm7, %vm86_vm4 }
  0x43   :  { %v1044_v41 = vld [vmem:[%s1577_s0 + $0xc] sm:$0xf]  ;;  %v106_v42 = vrot.slane %v1043_v39, 7  ;;  %v1232_v43 = vld [vmem:[#allocation3 + $0xf4] ss:$8 sps:$4 sm:$0xff]   ;;  %v76_v45 = vrot.slane %v74_v37, 7 }
  0x44   :  { %286 = vmatpush1.bf16.msra.mxu1 %v1212_v15  ;;  %430 = vmatpush1.bf16.msra.mxu0 %v1213_v16  ;;  %v68_v40 = vrot.slane %v66_v34, 7  ;;  %v1234_v44 = vld [vmem:[#allocation3 + $0x74] ss:$8 sps:$4 sm:$0xff]   ;;  %v108_v46 = vrot.slane %v1044_v41, 7  ;;  %v1236_v50 = vld [vmem:[#allocation3 + $0xf0] ss:$8 sps:$4 sm:$0xff]  }
  0x45   :  { %287 = vmatprep.subr.bf16.mxu1 %v1214_v17  ;;  %431 = vmatprep.subr.bf16.mxu0 %v1216_v18  ;;  %v92_v48 = vld [vmem:[#allocation2 + $0x8] sm:$0x1]  ;;  %v107_v49 = vrot.slane %v106_v42, 4  ;;  %114 = vst [vmem:[#allocation2 + $0x8] sm:$0xe] %v106_v42  ;;  %v79_v52 = vor.u32 %v77_v38, %v76_v45  ;;  %v81_v53 = vrot.slane %v76_v45, 4 }
  0x46   :  { %v72_v47 = vrot.slane %v68_v40, 4  ;;  %v71_v51 = vor.u32 %v69_v36, %v68_v40  ;;  %v1237_v55 = vld [vmem:[#allocation3 + $0x70] ss:$8 sps:$4 sm:$0xff]   ;;  %v110_v57 = vrot.slane %v108_v46, 4  ;;  %v1242_v60 = vld [vmem:[#allocation3 + $0x104] ss:$8 sps:$4 sm:$0xff]  }
  0x47   :  { %v109_v56 = vsel %vm105_vm8, %v107_v49, %v108_v46  ;;  %v93_v59 = vsel %vm1416_vm2, %v81_v53, %v92_v48  ;;  %vm118_vm11 = vsmask.f32 1280  ;;  %v120_v63 = vld [vmem:[#allocation2 + $0x10] sm:$0x2]  ;;  %v1240_v6 = vld [vmem:[#allocation3 + $0x100] ss:$8 sps:$4 sm:$0xff]  }
  0x48   :  { %288 = vmatpush1.bf16.msra.mxu1 %v1218_v19  ;;  %432 = vmatpush1.bf16.msra.mxu0 %v1219_v20  ;;  %v80_v58 = vsel %vm1430_vm6, %v72_v47, %v79_v52  ;;  %115 = vst [vmem:[#allocation2 + $0xc] sm:$0xf] %v109_v56  ;;  %94 = vst [vmem:[#allocation2 + $0x8] sm:$0x1] %v93_v59  ;;  %v1245_v8 = vld [vmem:[#allocation3 + $0x114] ss:$8 sps:$4 sm:$0xff]  }
  0x49   :  { %289 = vmatprep.subr.bf16.mxu1 %v1220_v21  ;;  %433 = vmatprep.subr.bf16.mxu0 %v1222_v22  ;;  %v88_v61 = vld [vmem:[#allocation2] sm:$0xf]  ;;  %91 = vst [vmem:[#allocation2 + $0x4] sm:$0xf] %v80_v58  ;;  %116 = vst [vmem:[#allocation2 + $0x10] sm:$0x1] %v110_v57  ;;  %v670_v58 = vlaneseq }
  0x4a   :  { %v89_v62 = vsel %vm1444_vm9, %v71_v51, %v88_v61  ;;  %vm119_vm12 = vmand %vm117_vm10, %vm118_vm11  ;;  %v1243_v10 = vld [vmem:[#allocation3 + $0x110] ss:$8 sps:$4 sm:$0xff]   ;;  %v1248_v13 = vld [vmem:[#allocation3 + $0x124] ss:$8 sps:$4 sm:$0xff]   ;;  %vm173_vm14 = vsmask.f32 7424 }
  0x4b   :  { %90 = vst [vmem:[#allocation2] sm:$0xf] %v89_v62  ;;  %v121_v1 = vsel %vm119_vm12, 0, %v120_v63  ;;  %v1246_v16 = vld [vmem:[#allocation3 + $0x120] ss:$8 sps:$4 sm:$0xff]   ;;  %vm508_vm15 = vcmask 1046528  }
  0x4c   :  { %290 = vmatpush1.bf16.msra.mxu1 %v1224_v24  ;;  %434 = vmatpush1.bf16.msra.mxu0 %v1225_v25  ;;  %122 = vst [vmem:[#allocation2 + $0x10] sm:$0x2] %v121_v1  ;;  %v1251_v19 = vld [vmem:[#allocation3 + $0x134] ss:$8 sps:$4 sm:$0xff]   ;;  %v1249_v23 = vld [vmem:[#allocation3 + $0x130] ss:$8 sps:$4 sm:$0xff]  }
  0x4d   :  { %291 = vmatprep.subr.bf16.mxu1 %v1226_v26  ;;  %435 = vmatprep.subr.bf16.mxu0 %v1228_v27  ;;  %v1255_v25 = vld [vmem:[#allocation3 + $0x144] ss:$8 sps:$4 sm:$0xff]   ;;  %v1253_v28 = vld [vmem:[#allocation3 + $0x140] ss:$8 sps:$4 sm:$0xff]   ;;  %v1258_v29 = vld [vmem:[#allocation3 + $0x154] ss:$8 sps:$4 sm:$0xff]  }
  0x4e   :  { %v1261_v32 = vld [vmem:[#allocation3 + $0x164] ss:$8 sps:$4 sm:$0xff]   ;;  %v1259_v34 = vld [vmem:[#allocation3 + $0x160] ss:$8 sps:$4 sm:$0xff]   ;;  %v1264_v36 = vld [vmem:[#allocation3 + $0x174] ss:$8 sps:$4 sm:$0xff]  }
  0x4f   :  { %v96_v2 = vld [vmem:[#allocation2 + $0x8] sm:$0x1]  ;;  %v1262_v38 = vld [vmem:[#allocation3 + $0x170] ss:$8 sps:$4 sm:$0xff]   ;;  %vm856_vm1 = vcmask 1042434   ;;  %vm860_vm2 = vcmask 1046534  }
  0x50   :  { %292 = vmatpush1.bf16.msra.mxu1 %v1230_v30  ;;  %436 = vmatpush1.bf16.msra.mxu0 %v1231_v31  ;;  %v1457_v3 = vld [vmem:[#allocation2 + $0x4] sm:$0xf]  ;;  %v97_v4 = vsel %vm95_vm13, 0, %v96_v2  ;;  %v1252_v15 = vld [vmem:[#allocation2 + $0x10] ss:$0 sps:$4 sm:$0x11]   ;;  %vm857_vm3 = vmor %vm55_vm0, %vm856_vm1 }
  0x51   :  { %293 = vmatprep.subr.bf16.mxu1 %v1232_v43  ;;  %437 = vmatprep.subr.bf16.mxu0 %v1234_v44  ;;  %98 = vst [vmem:[#allocation2 + $0x8] sm:$0x1] %v97_v4  ;;  %v190_v22 = vshll.u32 %v1252_v15, 16  ;;  %v1256_v31 = vld [vmem:[#allocation3 + $0x150] ss:$8 sps:$4 sm:$0xff]   ;;  %v194_v37 = vshrl.u32 %v1252_v15, 16  ;;  %vm859_vm6 = vmor %vm857_vm3, %vm104_vm5 }
  0x52   :  { %v123_v5 = vld [vmem:[#allocation2] sm:$0xf]  ;;  %v1266_v42 = vld [vmem:[#allocation2 + $0x10] ss:$0 sps:$4 sm:$0x33]   ;;  %v671_v2 = vshrl.u32 %v670_v58, 7  ;;  %vm1522_vm0 = vmor %vm859_vm6, %vm860_vm2 }
  0x53   :  { %v1045_v7 = vcombine.low %v123_v5, %v1457_v3  ;;  %v192_v27 = vrot.slane %v190_v22, 1  ;;  %v484_v33 = vld [vmem:[#allocation2] sm:$0xe]  ;;  %v512_v43 = vrot.slane %v1266_v42, 1  ;;  %vm1005_vm4 = vcmask 1043459  }
  0x54   :  { %294 = vmatpush1.bf16.msra.mxu1 %v1236_v50  ;;  %438 = vmatpush1.bf16.msra.mxu0 %v1237_v55  ;;  %v1080_v35 = vcombine.low %v484_v33, %v1457_v3  ;;  %v672_v4 = vsub.s32 0, %v671_v2  ;;  %vm1010_vm7 = vcmask 1045509   ;;  %vm1015_vm8 = vcmask 1047559  }
  0x55   :  { %597 = vmatprep.subr.bf16.mxu0 %v1242_v60  ;;  %1147 = vmatprep.subr.bf16.mxu1 %v1242_v60  ;;  %v177_v9 = vshll.u32 %v1045_v7, 16  ;;  %v175_v11 = vshrl.u32 %v1045_v7, 16 }
  0x56   :  { %v509_v39 = vrot.slane %v1080_v35, 1 }
  0x57   :  { %456 = vmatmul.mubr.bf16.vlgmr.msra.gmra.mrb[0].mxu0 %v1045_v7  ;;  %v179_v12 = vrot.slane %v177_v9, 1  ;;  %v668_v7 = vld [vmem:[#allocation5] sm:$0x3] }
  0x58   :  { %598 = vmatpush1.bf16.msra.mxu0 %v1240_v6  ;;  %465 = vmatprep.mubr.bf16.mxu0 %v1342_v0  ;;  %v1461_v14 = vld [vmem:[#allocation2 + $0x8] sm:$0xff]  }
  0x59   :  { %599 = vmatprep.subr.bf16.mxu0 %v1245_v8  ;;  %v180_v17 = vor.u32 %v179_v12, %v175_v11  ;;  %v182_v18 = vshll.u32 %v1461_v14, 16  ;;  %v186_v21 = vshrl.u32 %v1461_v14, 16  ;;  %v510_v40 = vrot.slane %v1461_v14, 1  ;;  %v690_v12 = vld [vmem:[#allocation7] sm:$0x3] }
  0x5b   :  { %v184_v20 = vrot.slane %v182_v18, 1  ;;  %v511_v41 = vsel %vm508_vm15, %v509_v39, %v510_v40  ;;  %v513_v44 = vsel %vm508_vm15, %v510_v40, %v512_v43 }
  0x5c   :  { %600 = vmatpush1.bf16.msra.mxu0 %v1243_v10 }
  0x5d   :  { %601 = vmatprep.subr.bf16.mxu0 %v1248_v13  ;;  %v185_v24 = vsel %vm173_vm14, %v180_v17, %v184_v20  ;;  %v188_v26 = vor.u32 %v186_v21, %v184_v20 }
  0x5e   :  { %312 = vmatmul.mubr.bf16.vlgmr.msra.gmra.mrb[0].mxu1 %v185_v24 }
  0x5f   :  { %466 = vmatmul.mubr.bf16.gmra.mrb[4].mxu0 %v1461_v14  ;;  %1155 = vmatpush1.bf16.msra.mxu1 %v1240_v6  ;;  %v193_v30 = vsel %vm173_vm14, %v188_v26, %v192_v27 }
  0x60   :  { %602 = vmatpush1.bf16.msra.mxu0 %v1246_v16  ;;  %475 = vmatprep.mubr.bf16.mxu0 %v1342_v0 }
  0x61   :  { %603 = vmatprep.subr.bf16.mxu0 %v1251_v19  ;;  %321 = vmatprep.mubr.bf16.mxu1 %v1342_v0 }
  0x62   :  { %1148 = vmatprep.subr.bf16.mxu1 %v1245_v8  ;;  %v676_v8 = vsub.s32 1, %v671_v2 }
  0x63   :  { %1156 = vmatpush1.bf16.msra.mxu1 %v1243_v10 }
  0x64   :  { %604 = vmatpush1.bf16.msra.mxu0 %v1249_v23  ;;  %1149 = vmatprep.subr.bf16.mxu1 %v1248_v13  ;;  %v1482_v13 = vrot.slane %v668_v7, %v672_v4  ;;  %v1484_v17 = vrot.slane %v668_v7, %v676_v8  ;;  %v1488_v22 = vrot.slane %v690_v12, %v676_v8 }
  0x65   :  { %605 = vmatprep.subr.bf16.mxu0 %v1255_v25 }
  0x66   :  { %322 = vmatmul.mubr.bf16.gmra.mrb[4].mxu1 %v193_v30 }
  0x67   :  { %476 = vmatmul.mubr.bf16.gmra.mrb[8].mxu0 %v1252_v15  ;;  %1157 = vmatpush1.bf16.msra.mxu1 %v1246_v16  ;;  %v1343_v15 = vmov 1983009808  }
  0x68   :  { %606 = vmatpush1.bf16.msra.mxu0 %v1253_v28  ;;  %629 = vmatprep.mubr.bf16.mxu0 %v1342_v0  ;;  %v731_v16 = vunpack.c.l.s4 %v1343_v15 }
  0x69   :  { %607 = vmatprep.subr.bf16.mxu0 %v1258_v29  ;;  %331 = vmatprep.mubr.bf16.mxu1 %v1342_v0 }
  0x6a   :  { %1150 = vmatprep.subr.bf16.mxu1 %v1251_v19  ;;  %v1486_v19 = vrot.slane %v690_v12, %v672_v4  ;;  %v732_v27 = vunpack.c.0.s8 %v731_v16 }
  0x6b   :  { %1158 = vmatpush1.bf16.msra.mxu1 %v1249_v23 }
  0x6c   :  { %608 = vmatpush1.bf16.msra.mxu0 %v1256_v31  ;;  %1151 = vmatprep.subr.bf16.mxu1 %v1255_v25 }
  0x6d   :  { %609 = vmatprep.subr.bf16.mxu0 %v1261_v32 }
  0x6e   :  { %332 = vmatmul.mubr.bf16.gmra.mrb[8].mxu1 %v194_v37 }
  0x6f   :  { %1159 = vmatpush1.bf16.msra.mxu1 %v1253_v28  ;;  %639 = vmatprep.mubr.bf16.mxu1 %v1342_v0 }
  0x70   :  { %610 = vmatpush1.bf16.msra.mxu0 %v1259_v34  ;;  %1152 = vmatprep.subr.bf16.mxu1 %v1258_v29 }
  0x71   :  { %611 = vmatprep.subr.bf16.mxu0 %v1264_v36 }
  0x73   :  { %1160 = vmatpush1.bf16.msra.mxu1 %v1256_v31 }
  0x74   :  { %612 = vmatpush1.bf16.msra.mxu0 %v1262_v38  ;;  %1153 = vmatprep.subr.bf16.mxu1 %v1261_v32 }
  0x77   :  { %630 = vmatmul.mubr.bf16.vlgmr.msra.gmra.mrb[0].mxu0 %v511_v41  ;;  %1161 = vmatpush1.bf16.msra.mxu1 %v1259_v34 }
  0x78   :  { %1154 = vmatprep.subr.bf16.mxu1 %v1264_v36  ;;  %v1497_v36 = vsub.s32 %v732_v27, %v671_v2 }
  0x7b   :  { %1162 = vmatpush1.bf16.msra.mxu1 %v1262_v38 }
  0x7e   :  { %640 = vmatmul.mubr.bf16.vlgmr.msra.gmra.mrb[12].mxu1 %v513_v44 }
  0x7f   :  { %649 = vmatprep.mubr.bf16.mxu1 %v1342_v0 }
  0x86   :  { %650 = vmatmul.mubr.bf16.gmra.mrb[16].mxu1 %v512_v43 }
 0x131   :  { %v313_v48 = vpop.f32.mrb[0].mxu1 }
 0x132   :  { %v467_v45 = vpop.f32.mrb[4].mxu0  ;;  %v315_v50 = vpop.f32.mrb[1].mxu1 }
 0x133   :  { %v469_v46 = vpop.f32.mrb[5].mxu0  ;;  %v317_v51 = vpop.f32.mrb[2].mxu1 }
 0x134   :  { %v471_v47 = vpop.f32.mrb[6].mxu0  ;;  %v319_v52 = vpop.f32.mrb[3].mxu1 }
 0x135   :  { %v473_v49 = vpop.f32.mrb[7].mxu0 }
 0x139   :  { %v323_v56 = vpop.f32.mrb[4].mxu1 }
 0x13a   :  { %v477_v53 = vpop.f32.mrb[8].mxu0  ;;  %v468_v59 = vadd.f32 %v467_v45, %v323_v56  ;;  %v325_v60 = vpop.f32.mrb[5].mxu1 }
 0x13b   :  { %v479_v54 = vpop.f32.mrb[9].mxu0  ;;  %v470_v61 = vadd.f32 %v469_v46, %v325_v60  ;;  %v327_v62 = vpop.f32.mrb[6].mxu1 }
 0x13c   :  { %v481_v55 = vpop.f32.mrb[10].mxu0  ;;  %v472_v0 = vadd.f32 %v471_v47, %v327_v62  ;;  %v329_v63 = vpop.f32.mrb[7].mxu1 }
 0x13d   :  { %v482_v57 = vpop.f32.mrb[11].mxu0  ;;  %v1476_v1 = vadd.f32 %v473_v49, %v329_v63 }
 0x141   :  { %v333_v3 = vpop.f32.mrb[8].mxu1 }
 0x142   :  { %v335_v5 = vpop.f32.mrb[9].mxu1  ;;  %v1478_v6 = vadd.f32 %v477_v53, %v333_v3 }
 0x143   :  { %v337_v9 = vpop.f32.mrb[10].mxu1  ;;  %v1480_v10 = vadd.f32 %v479_v54, %v335_v5 }
 0x144   :  { %v338_v11 = vpop.f32.mrb[11].mxu1 }
 0x14a   :  { %v631_v14 = vpop.f32.mrb[0].mxu0 }
 0x14b   :  { %v1163_v18 = vadd.f32 %v631_v14, %v313_v48  ;;  %v633_v20 = vpop.f32.mrb[1].mxu0 }
 0x14c   :  { %v1164_v21 = vadd.f32 %v633_v20, %v315_v50  ;;  %v635_v23 = vpop.f32.mrb[2].mxu0 }
 0x14d   :  { %v680_v24 = vmul.f32 %v1163_v18, %v1482_v13  ;;  %v1165_v25 = vadd.f32 %v635_v23, %v317_v51  ;;  %v637_v26 = vpop.f32.mrb[3].mxu0 }
 0x14e   :  { %v681_v28 = vmul.f32 %v1164_v21, %v1484_v17  ;;  %v1166_v29 = vadd.f32 %v637_v26, %v319_v52 }
 0x14f   :  { %v702_v30 = vadd.f32 %v1486_v19, %v680_v24  ;;  %v682_v31 = vmul.f32 %v1165_v25, %v1482_v13 }
 0x150   :  { %v703_v32 = vadd.f32 %v1488_v22, %v681_v28  ;;  %v683_v33 = vmul.f32 %v1166_v29, %v1484_v17 }
 0x151   :  { %v712_v34 = vmax.f32 %v702_v30, 0.0  ;;  %v704_v35 = vadd.f32 %v1486_v19, %v682_v31  ;;  %v641_v42 = vpop.f32.mrb[12].mxu1 }
 0x152   :  { %v713_v37 = vmax.f32 %v703_v32, 0.0  ;;  %v705_v38 = vadd.f32 %v1488_v22, %v683_v33  ;;  %v662_v43 = vadd.f32 %v641_v42, %v468_v59  ;;  %v643_v46 = vpop.f32.mrb[13].mxu1 }
 0x153   :  { %v714_v39 = vmax.f32 %v704_v35, 0.0  ;;  %v663_v48 = vadd.f32 %v643_v46, %v470_v61  ;;  %v645_v49 = vpop.f32.mrb[14].mxu1 }
 0x154   :  { %v722_v40 = vmax.f32 %v712_v34, %v713_v37  ;;  %v715_v41 = vmax.f32 %v705_v38, 0.0  ;;  %v684_v50 = vmul.f32 %v1482_v13, %v662_v43  ;;  %v1503_v54 = vpop.f32.mrb[15].mxu1  ;;  %v1506_v56 = vadd.f32 %v645_v49, %v472_v0 }
 0x155   :  { %v685_v55 = vmul.f32 %v1484_v17, %v663_v48 }
 0x156   :  { %v729_v44 = vcombine.high %v722_v40, %v722_v40  ;;  %v736_v45 = vrot.slane %v722_v40, %v1497_v36  ;;  %v723_v47 = vmax.f32 %v714_v39, %v715_v41  ;;  %v706_v59 = vadd.f32 %v1486_v19, %v684_v50 }
 0x157   :  { %v707_v2 = vadd.f32 %v1488_v22, %v685_v55 }
 0x158   :  { %v743_v51 = vrot.slane %v729_v44, %v1497_v36  ;;  %v744_v52 = vcombine.high %v736_v45, %v736_v45  ;;  %v1098_v53 = vrot.slane %v736_v45, 9  ;;  %v746_v57 = vcombine.high %v723_v47, %v723_v47 }
 0x159   :  { %v753_v58 = vrot.slane %v723_v47, %v1497_v36  ;;  %v716_v4 = vmax.f32 %v706_v59, 0.0  ;;  %v717_v0 = vmax.f32 %v707_v2, 0.0  ;;  %v1512_v12 = vpop.f32.mrb[16].mxu1 }
 0x15a   :  { %v745_v60 = vcombine.high %v743_v51, %v743_v51  ;;  %v1099_v61 = vrot.slane %v744_v52, 9  ;;  %v1100_v62 = vrot.slane %v743_v51, 9  ;;  %v795_v63 = vmax.f32 %v736_v45, %v1098_v53  ;;  %v653_v20 = vpop.f32.mrb[17].mxu1 }
 0x15b   :  { %v760_v3 = vrot.slane %v746_v57, %v1497_v36  ;;  %v761_v11 = vcombine.high %v753_v58, %v753_v58  ;;  %v724_v21 = vmax.f32 %v716_v4, %v717_v0  ;;  %v1102_v23 = vrot.slane %v753_v58, 9  ;;  %v655_v24 = vpop.f32.mrb[18].mxu1 }
 0x15c   :  { %v1101_v5 = vrot.slane %v745_v60, 9  ;;  %v796_v7 = vmax.f32 %v744_v52, %v1099_v61  ;;  %v797_v8 = vmax.f32 %v743_v51, %v1100_v62  ;;  %v1131_v9 = vpack.c.bf16 %v795_v63, %v795_v63  ;;  %v656_v29 = vpop.f32.mrb[19].mxu1 }
 0x15d   :  { %v762_v18 = vcombine.high %v760_v3, %v760_v3  ;;  %v1103_v28 = vrot.slane %v761_v11, 9  ;;  %v814_v30 = vcombine.high %v724_v21, %v724_v21  ;;  %v821_v31 = vrot.slane %v724_v21, %v1497_v36 }
 0x15e   :  { %v798_v14 = vmax.f32 %v745_v60, %v1101_v5  ;;  %v1132_v15 = vpack.c.bf16 %v796_v7, %v796_v7  ;;  %v1133_v16 = vpack.c.bf16 %v797_v8, %v797_v8  ;;  %v1104_v32 = vrot.slane %v760_v3, 9 }
 0x15f   :  { %v1105_v33 = vrot.slane %v762_v18, 9  ;;  %v983_v34 = vunpack.c.l.b16 %v1131_v9  ;;  %v799_v38 = vmax.f32 %v753_v58, %v1102_v23  ;;  %v828_v40 = vrot.slane %v814_v30, %v1497_v36 }
 0x160   :  { %v1134_v25 = vpack.c.bf16 %v798_v14, %v798_v14  ;;  %v984_v26 = vunpack.c.l.b16 %v1132_v15  ;;  %v985_v27 = vunpack.c.l.b16 %v1133_v16  ;;  %v829_v41 = vcombine.high %v821_v31, %v821_v31 }
 0x161   :  { %v800_v42 = vmax.f32 %v761_v11, %v1103_v28  ;;  %v801_v44 = vmax.f32 %v760_v3, %v1104_v32  ;;  %v802_v45 = vmax.f32 %v762_v18, %v1105_v33  ;;  %v830_v47 = vcombine.high %v828_v40, %v828_v40 }
 0x162   :  { %v986_v35 = vunpack.c.l.b16 %v1134_v25  ;;  %v999_v37 = vrot.slane %v984_v26, 7  ;;  %v1002_v39 = vrot.slane %v985_v27, 6  ;;  %v864_v48 = vrot.slane %v829_v41, 7 }
 0x163   :  { %v867_v49 = vrot.slane %v828_v40, 7  ;;  %v1135_v50 = vpack.c.bf16 %v799_v38, %v799_v38  ;;  %v1136_v51 = vpack.c.bf16 %v800_v42, %v800_v42  ;;  %v1137_v52 = vpack.c.bf16 %v801_v44, %v801_v44 }
 0x164   :  { %v1001_v43 = vsel %vm117_vm10, %v999_v37, %v983_v34  ;;  %v1004_v46 = vrot.slane %v986_v35, 5  ;;  %v1138_v53 = vpack.c.bf16 %v802_v45, %v802_v45  ;;  %v866_v57 = vrot.slane %v864_v48, 2 }
 0x165   :  { %v1003_v55 = vsel %vm856_vm1, %v1002_v39, %v1001_v43  ;;  %v869_v58 = vrot.slane %v867_v49, 2  ;;  %v870_v59 = vrot.slane %v830_v47, 7  ;;  %v686_v61 = vmul.f32 %v1482_v13, %v1506_v56 }
 0x166   :  { %v987_v62 = vunpack.c.l.b16 %v1135_v50  ;;  %v988_v63 = vunpack.c.l.b16 %v1136_v51  ;;  %v868_v2 = vsel %vm1522_vm0, %v866_v57, %v867_v49  ;;  %v989_v3 = vunpack.c.l.b16 %v1137_v52 }
 0x167   :  { %v1106_v4 = vrot.slane %v821_v31, 9  ;;  %v1108_v5 = vrot.slane %v868_v2, 9  ;;  %v990_v7 = vunpack.c.l.b16 %v1138_v53  ;;  %v1006_v8 = vsel %vm1005_vm4, %v1004_v46, %v1003_v55 }
 0x168   :  { %v871_v9 = vsel %vm1522_vm0, %v869_v58, %v870_v59  ;;  %v1007_v0 = vrot.slane %v987_v62, 4  ;;  %v708_v11 = vadd.f32 %v1486_v19, %v686_v61  ;;  %v1009_v14 = vrot.slane %v988_v63, 3 }
 0x169   :  { %v865_v56 = vsel %vm1522_vm0, %v1106_v4, %v864_v48  ;;  %v665_v15 = vadd.f32 %v1503_v54, %v1476_v1  ;;  %v1012_v18 = vrot.slane %v989_v3, 2  ;;  %v666_v21 = vadd.f32 %v1512_v12, %v1478_v6 }
 0x16a   :  { %v1008_v16 = vsel %vm104_vm5, %v1007_v0, %v1006_v8  ;;  %v667_v23 = vadd.f32 %v653_v20, %v1480_v10  ;;  %v1109_v24 = vrot.slane %v871_v9, 9  ;;  %v920_v25 = vmax.f32 %v868_v2, %v1108_v5 }
 0x16b   :  { %v1011_v26 = vsel %vm1010_vm7, %v1009_v14, %v1008_v16  ;;  %v1014_v27 = vrot.slane %v990_v7, 1  ;;  %v687_v29 = vmul.f32 %v1484_v17, %v665_v15  ;;  %v688_v30 = vmul.f32 %v1482_v13, %v666_v21 }
 0x16c   :  { %v1013_v28 = vsel %vm860_vm2, %v1012_v18, %v1011_v26  ;;  %v689_v1 = vmul.f32 %v1484_v17, %v667_v23  ;;  %v1107_v54 = vrot.slane %v865_v56, 9  ;;  %v718_v31 = vmax.f32 %v708_v11, 0.0 }
 0x16d   :  { %v1016_v32 = vsel %vm1015_vm8, %v1014_v27, %v1013_v28  ;;  %v709_v6 = vadd.f32 %v1488_v22, %v687_v29  ;;  %v710_v10 = vadd.f32 %v1486_v19, %v688_v30  ;;  %v921_v33 = vmax.f32 %v871_v9, %v1109_v24 }
 0x16e   :  { %v711_v12 = vadd.f32 %v1488_v22, %v689_v1  ;;  %v1031_v20 = vpack.c.b16 %v1016_v32, %v1016_v32  ;;  %v1140_v34 = vpack.c.bf16 %v920_v25, %v920_v25  ;;  %v919_v13 = vmax.f32 %v865_v56, %v1107_v54 }
 0x16f   :  { %v719_v35 = vmax.f32 %v709_v6, 0.0  ;;  %v720_v37 = vmax.f32 %v710_v10, 0.0  ;;  %v1141_v40 = vpack.c.bf16 %v921_v33, %v921_v33  ;;  %v872_v42 = vrot.slane %v870_v59, 2 }
 0x170   :  { %v721_v38 = vmax.f32 %v711_v12, 0.0  ;;  %1035 = vst [vmem:[%s1581_s4] sm:$0xf] %v1031_v20  ;;  %v992_v41 = vunpack.c.l.b16 %v1140_v34  ;;  %v1139_v22 = vpack.c.bf16 %v919_v13, %v919_v13 }
 0x171   :  { %v725_v17 = vmax.f32 %v718_v31, %v719_v35  ;;  %v993_v48 = vunpack.c.l.b16 %v1141_v40 }
 0x172   :  { %v726_v39 = vmax.f32 %v720_v37, %v721_v38  ;;  %v1017_v49 = vrot.slane %v992_v41, 7  ;;  %v991_v55 = vunpack.c.l.b16 %v1139_v22 }
 0x173   :  { %v831_v43 = vcombine.high %v725_v17, %v725_v17  ;;  %v838_v19 = vrot.slane %v725_v17, %v1497_v36  ;;  %v1019_v5 = vrot.slane %v993_v48, 6 }
 0x174   :  { %v854_v47 = vrot.slane %v726_v39, %v1497_v36  ;;  %v1018_v4 = vsel %vm117_vm10, %v1017_v49, %v991_v55 }
 0x175   :  { %v845_v44 = vrot.slane %v831_v43, %v1497_v36  ;;  %v846_v45 = vcombine.high %v838_v19, %v838_v19  ;;  %v873_v46 = vrot.slane %v838_v19, 7  ;;  %v1020_v24 = vsel %vm856_vm1, %v1019_v5, %v1018_v4 }
 0x176   :  { %v885_v63 = vrot.slane %v854_v47, 7 }
 0x177   :  { %v847_v50 = vcombine.high %v845_v44, %v845_v44  ;;  %v874_v51 = vsel %vm1522_vm0, %v872_v42, %v873_v46  ;;  %v875_v52 = vrot.slane %v873_v46, 2  ;;  %v876_v53 = vrot.slane %v846_v45, 7 }
 0x178   :  { %v879_v57 = vrot.slane %v845_v44, 7  ;;  %v1110_v58 = vrot.slane %v874_v51, 9 }
 0x179   :  { %v877_v59 = vsel %vm1522_vm0, %v875_v52, %v876_v53  ;;  %v878_v61 = vrot.slane %v876_v53, 2  ;;  %v882_v62 = vrot.slane %v847_v50, 7 }
 0x17a   :  { %v881_v2 = vrot.slane %v879_v57, 2  ;;  %v1111_v3 = vrot.slane %v877_v59, 9  ;;  %v922_v36 = vmax.f32 %v874_v51, %v1110_v58 }
 0x17b   :  { %v880_v7 = vsel %vm1522_vm0, %v878_v61, %v879_v57  ;;  %v884_v8 = vrot.slane %v882_v62, 2 }
 0x17c   :  { %v883_v9 = vsel %vm1522_vm0, %v881_v2, %v882_v62  ;;  %v1112_v0 = vrot.slane %v880_v7, 9  ;;  %v923_v56 = vmax.f32 %v877_v59, %v1111_v3  ;;  %v1142_v11 = vpack.c.bf16 %v922_v36, %v922_v36 }
 0x17d   :  { %v1113_v14 = vrot.slane %v883_v9, 9  ;;  %v886_v15 = vsel %vm1522_vm0, %v884_v8, %v885_v63 }
 0x17e   :  { %v924_v16 = vmax.f32 %v880_v7, %v1112_v0  ;;  %v1143_v18 = vpack.c.bf16 %v923_v56, %v923_v56  ;;  %v994_v21 = vunpack.c.l.b16 %v1142_v11  ;;  %v1114_v23 = vrot.slane %v886_v15, 9 }
 0x17f   :  { %v925_v25 = vmax.f32 %v883_v9, %v1113_v14 }
 0x180   :  { %v1144_v26 = vpack.c.bf16 %v924_v16, %v924_v16  ;;  %v995_v27 = vunpack.c.l.b16 %v1143_v18  ;;  %v1021_v28 = vrot.slane %v994_v21, 5  ;;  %v926_v29 = vmax.f32 %v886_v15, %v1114_v23 }
 0x181   :  { %v1145_v30 = vpack.c.bf16 %v925_v25, %v925_v25 }
 0x182   :  { %v996_v1 = vunpack.c.l.b16 %v1144_v26  ;;  %v1022_v54 = vsel %vm1005_vm4, %v1021_v28, %v1020_v24  ;;  %v1023_v31 = vrot.slane %v995_v27, 4  ;;  %v1146_v32 = vpack.c.bf16 %v926_v29, %v926_v29 }
 0x183   :  { %v997_v6 = vunpack.c.l.b16 %v1145_v30 }
 0x184   :  { %v1024_v60 = vsel %vm104_vm5, %v1023_v31, %v1022_v54  ;;  %v1025_v10 = vrot.slane %v996_v1, 3  ;;  %v998_v12 = vunpack.c.l.b16 %v1146_v32 }
 0x185   :  { %v1027_v20 = vrot.slane %v997_v6, 2 }
 0x186   :  { %v1026_v33 = vsel %vm1010_vm7, %v1025_v10, %v1024_v60  ;;  %v1029_v34 = vrot.slane %v998_v12, 1 }
 0x187   :  { %v1028_v35 = vsel %vm860_vm2, %v1027_v20, %v1026_v33 }
 0x188   :  { %v1030_v37 = vsel %vm1015_vm8, %v1029_v34, %v1028_v35 }
 0x189   :  { %v1032_v38 = vpack.c.b16 %v1030_v37, %v1030_v37 }
 0x18b   :  { %1036 = vst [vmem:[%s1581_s4 + $0x4] sm:$0xf] %v1032_v38 }
 0x18c   :  { %1041 = vsyncpa [#allocation4], 1 }
 0x18d   :  { %1042 = vsyncpa [#allocation6], 1 }

// kernel: crnn_forward.4
= control target key start
LH: loop header
LB: loop body
LE: loop exit
PB: predicated region body
PF: predicated region fallthrough
CT: control target
= control target key end

     0   :  { %11 = vsyncpa [#allocation4], 0  ;;  %s2165_s0 = inlined_call_operand.vmem [shape: f32[2,32,16], index: 0, kind: input, shape index: {}]   ;;  %s2166_s1 = inlined_call_operand.hbm [shape: f32[1,16], index: 1, kind: input, shape index: {}]   ;;  %s2167_s2 = inlined_call_operand.hbm [shape: f32[1,16], index: 2, kind: input, shape index: {}]   ;;  %s2168_s3 = inlined_call_operand.hbm [shape: bf16[48,256], index: 3, kind: input, shape index: {}]   ;;  %s2169_s4 = inlined_call_operand.hbm [shape: f32[1,256], index: 4, kind: input, shape index: {}]   ;;  %s2170_s5 = inlined_call_operand.hbm [shape: f32[1,256], index: 5, kind: input, shape index: {}]   ;;  %s2171_s6 = inlined_call_operand.vmem [shape: bf16[2,16,128], index: 6, kind: output, shape index: {}]  }
   0x1   :  { %12 = vsyncpa [#allocation6], 0 }
   0x2   :  { %13 = vsyncpa [#allocation9], 0  ;;  %s1709_s21 = smov [#allocation5]   ;;  %s1710_s23 = smov [#allocation8]  }
   0x3   :  { %s32_s22 = sshll.u32 %s1709_s21, 4  ;;  %s54_s24 = sshll.u32 %s1710_s23, 4  ;;  %s33_s22 = int_to_ptr.vmem [resolvable:$true] %s32_s22  ;;  %s55_s24 = int_to_ptr.vmem [resolvable:$true] %s54_s24 }
   0x4   :  { %s1593_s27 = scalar_lea.hbm %s2167_s2, 16 }
   0x5   :  { %p1594_p0 = scmp.ne.s32.totalorder %s2167_s2, %s1593_s27  ;;  %p1597_p1 = scmp.lt.u32.totalorder %s1593_s27, %s2167_s2 }
   0x7   :  { %p1599_p2 = pnand %p1597_p1, %p1594_p0 }
   0x9   :  { %1602 = shalt.err (!%p1599_p2)
}
   0xa   :  { %s1603_s8 = scalar_lea.vmem %s33_s22, 16  ;;  %s1607_s9 = scalar_lea.vmem %s33_s22, 32 }
   0xb   :  { %p1604_p3 = scmp.ne.s32.totalorder %s33_s22, %s1603_s8  ;;  %p1608_p4 = scmp.lt.s32.totalorder %s33_s22, %s33_s22 }
   0xc   :  { %p1609_p5 = scmp.lt.s32.totalorder %s1607_s9, %s1603_s8 }
   0xe   :  { %p1610_p6 = por %p1609_p5, %p1608_p4 }
  0x10   :  { %p1611_p7 = pnand %p1610_p6, %p1604_p3 }
  0x12   :  { %1614 = shalt.err (!%p1611_p7)
}
  0x13   :  { %35 = dma.hbm_to_vmem [thread:$0]  %s2167_s2, 16, %s33_s22, [#allocation6]  }
  0x14   :  { %s1615_s14 = scalar_lea.hbm %s2169_s4, 32 }
  0x15   :  { %p1616_p8 = scmp.ne.s32.totalorder %s2169_s4, %s1615_s14  ;;  %p1619_p9 = scmp.lt.u32.totalorder %s1615_s14, %s2169_s4 }
  0x17   :  { %p1621_p10 = pnand %p1619_p9, %p1616_p8 }
  0x19   :  { %1624 = shalt.err (!%p1621_p10)
}
  0x1a   :  { %s1625_s19 = scalar_lea.vmem %s55_s24, 32  ;;  %p1630_p12 = scmp.lt.s32.totalorder %s55_s24, %s55_s24 }
  0x1b   :  { %p1626_p11 = scmp.ne.s32.totalorder %s55_s24, %s1625_s19  ;;  %p1631_p13 = scmp.lt.s32.totalorder %s1625_s19, %s1625_s19 }
  0x1d   :  { %p1632_p0 = por %p1631_p13, %p1630_p12 }
  0x1f   :  { %p1633_p1 = pnand %p1632_p0, %p1626_p11 }
  0x21   :  { %1636 = shalt.err (!%p1633_p1)
}
  0x22   :  { %57 = dma.hbm_to_vmem [thread:$0]  %s2169_s4, 32, %s55_s24, [#allocation9]  }
  0x23   :  { %s1711_s21 = smov [#allocation3]   ;;  %s1712_s23 = smov [#allocation7]  }
  0x24   :  { %s22_s22 = sshll.u32 %s1711_s21, 4  ;;  %s41_s25 = sshll.u32 %s1712_s23, 4  ;;  %s23_s22 = int_to_ptr.vmem [resolvable:$true] %s22_s22  ;;  %s1777_s25 = int_to_ptr.vmem [resolvable:$true] %s41_s25 }
  0x25   :  { %s1637_s28 = scalar_lea.hbm %s2166_s1, 16 }
  0x26   :  { %p1638_p2 = scmp.ne.s32.totalorder %s2166_s1, %s1637_s28  ;;  %p1641_p3 = scmp.lt.u32.totalorder %s1637_s28, %s2166_s1 }
  0x28   :  { %p1643_p4 = pnand %p1641_p3, %p1638_p2 }
  0x2a   :  { %1646 = shalt.err (!%p1643_p4)
}
  0x2b   :  { %s1647_s4 = scalar_lea.vmem %s23_s22, 16  ;;  %s1651_s24 = scalar_lea.vmem %s23_s22, 32 }
  0x2c   :  { %p1648_p5 = scmp.ne.s32.totalorder %s23_s22, %s1647_s4  ;;  %p1652_p6 = scmp.lt.s32.totalorder %s23_s22, %s23_s22 }
  0x2d   :  { %p1653_p7 = scmp.lt.s32.totalorder %s1651_s24, %s1647_s4 }
  0x2f   :  { %p1654_p8 = por %p1653_p7, %p1652_p6 }
  0x31   :  { %p1655_p9 = pnand %p1654_p8, %p1648_p5 }
  0x33   :  { %1658 = shalt.err (!%p1655_p9)
}
  0x34   :  { %25 = dma.hbm_to_vmem [thread:$0]  %s2166_s1, 16, %s23_s22, [#allocation4]  }
  0x35   :  { %s1659_s13 = scalar_lea.hbm %s2168_s3, 768 }
  0x36   :  { %p1660_p10 = scmp.ne.s32.totalorder %s2168_s3, %s1659_s13  ;;  %p1663_p11 = scmp.lt.u32.totalorder %s1659_s13, %s2168_s3 }
  0x38   :  { %p1665_p12 = pnand %p1663_p11, %p1660_p10 }
  0x3a   :  { %1668 = shalt.err (!%p1665_p12)
}
  0x3b   :  { %s1669_s18 = scalar_lea.vmem %s1777_s25, 768  ;;  %p1674_p0 = scmp.lt.s32.totalorder %s1777_s25, %s1777_s25 }
  0x3c   :  { %p1670_p13 = scmp.ne.s32.totalorder %s1777_s25, %s1669_s18  ;;  %p1675_p1 = scmp.lt.s32.totalorder %s1669_s18, %s1669_s18 }
  0x3e   :  { %p1676_p2 = por %p1675_p1, %p1674_p0 }
  0x40   :  { %p1677_p3 = pnand %p1676_p2, %p1670_p13 }
  0x42   :  { %1680 = shalt.err (!%p1677_p3)
}
  0x43   :  { %s1713_s1 = smov 128   ;;  %s1714_s19 = smov 8  }
  0x44   :  { %47 = dma.hbm_to_vmem [thread:$0]  %s2168_s3, 768, %s1777_s25, [#allocation6], %s1713_s1, %s1713_s1, %s1714_s19  }
  0x45   :  { %s1715_s21 = smov [#allocation10]   ;;  %s1681_s27 = scalar_lea.hbm %s2170_s5, 32 }
  0x46   :  { %s64_s22 = sshll.u32 %s1715_s21, 4  ;;  %p1682_p4 = scmp.ne.s32.totalorder %s2170_s5, %s1681_s27  ;;  %s65_s22 = int_to_ptr.vmem [resolvable:$true] %s64_s22 }
  0x47   :  { %p1685_p5 = scmp.lt.u32.totalorder %s1681_s27, %s2170_s5 }
  0x49   :  { %p1687_p6 = pnand %p1685_p5, %p1682_p4 }
  0x4b   :  { %1690 = shalt.err (!%p1687_p6)
}
  0x4c   :  { %s1691_s8 = scalar_lea.vmem %s65_s22, 32  ;;  %p1696_p8 = scmp.lt.s32.totalorder %s65_s22, %s65_s22 }
  0x4d   :  { %p1692_p7 = scmp.ne.s32.totalorder %s65_s22, %s1691_s8  ;;  %p1697_p9 = scmp.lt.s32.totalorder %s1691_s8, %s1691_s8 }
  0x4f   :  { %p1698_p10 = por %p1697_p9, %p1696_p8 }
  0x51   :  { %p1699_p11 = pnand %p1698_p10, %p1692_p7 }
  0x53   :  { %1702 = shalt.err (!%p1699_p11)
}
  0x54   :  { %67 = dma.hbm_to_vmem [thread:$0]  %s2170_s5, 32, %s65_s22, [#allocation9]  }
  0x55   :  { %1703 = dma.done.wait [#allocation4], 16  }
  0x56   :  { %1704 = vsyncadd [#allocation4], 4294967280 }
  0x57   :  { %1705 = dma.done.wait [#allocation6], 784  }
  0x58   :  { %1706 = vsyncadd [#allocation6], 4294966512 }
  0x59   :  { %1707 = dma.done.wait [#allocation9], 64  }
  0x5a   :  { %1708 = vsyncadd [#allocation9], 4294967232  ;;  %v1716_v0 = vmov 0   ;;  %vm84_vm0 = vcmask 122880   ;;  %vm85_vm1 = vsmask.f32 256 }
  0x5b   :  { %492 = vmatprep.mubr.bf16.mxu0 %v1716_v0  ;;  %391 = vmatprep.mubr.bf16.mxu1 %v1716_v0  ;;  %vm1824_vm2 = vmand %vm84_vm0, %vm85_vm1  ;;  %v1577_v2 = vld [vmem:[#allocation7 + $0x4] ss:$8 sps:$4 sm:$0xff]   ;;  %v1828_v3 = vld [vmem:[#allocation7] ss:$8 sps:$4 sm:$0xff]   ;;  %vm128_vm3 = vsmask.f32 4368 }
  0x5c   :  { %460 = vmatprep.subr.bf16.mxu0 %v1577_v2  ;;  %v1582_v4 = vld [vmem:[#allocation7 + $0x24] ss:$8 sps:$4 sm:$0xff]   ;;  %v87_v5 = vld [vmem:[#allocation2] sm:$0x1]  ;;  %vm171_vm4 = vsmask.f32 7938  ;;  %vm1859_vm11 = vmor %vm85_vm1, %vm128_vm3 }
  0x5d   :  { %461 = vmatpush1.bf16.msra.mxu0 %v1828_v3  ;;  %v88_v6 = vsel %vm1824_vm2, 0, %v87_v5  ;;  %v90_v7 = vld [vmem:[%s2165_s0] sm:$0xff]  ;;  %v91_v8 = vld [vmem:[%s2165_s0 + $0x8] sm:$0xff]  ;;  %v92_v9 = vld [vmem:[%s2165_s0 + $0x10] sm:$0xff]  ;;  %vm170_vm5 = vcmask 125952   ;;  %vm252_vm7 = vcmask 123905  }
  0x5e   :  { %586 = vmatprep.subr.bf16.mxu0 %v1582_v4  ;;  %89 = vst [vmem:[#allocation2] sm:$0x1] %v88_v6  ;;  %v93_v10 = vld [vmem:[%s2165_s0 + $0x18] sm:$0xff]  ;;  %v1379_v11 = vld [vmem:[#allocation3] ss:$0 sm:$0xff]  ;;  %v1386_v24 = vld [vmem:[%s2165_s0 + $0x28] sm:$0xff] }
  0x5f   :  { %v1380_v12 = vld [vmem:[#allocation5] ss:$0 sm:$0xff]  ;;  %v101_v13 = vmul.f32 %v1379_v11, %v90_v7  ;;  %v102_v14 = vmul.f32 %v1379_v11, %v91_v8  ;;  %v103_v15 = vmul.f32 %v1379_v11, %v92_v9  ;;  %v104_v16 = vmul.f32 %v1379_v11, %v93_v10  ;;  %v1587_v18 = vld [vmem:[#allocation7 + $0x10] ss:$8 sps:$4 sm:$0xff]   ;;  %v1387_v25 = vld [vmem:[%s2165_s0 + $0x30] sm:$0xff] }
  0x60   :  { %vm253_vm6 = vsmask.f32 1280  ;;  %v1585_v17 = vld [vmem:[#allocation7 + $0x14] ss:$8 sps:$4 sm:$0xff]   ;;  %vm226_vm8 = vcmask 1040384   ;;  %vm227_vm9 = vcmask 1044484   ;;  %v200_v28 = vmul.f32 %v1386_v24, %v1379_v11  ;;  %vm1865_vm12 = vmand %vm170_vm5, %vm171_vm4 }
  0x61   :  { %v1385_v19 = vld [vmem:[%s2165_s0 + $0x20] sm:$0xff]  ;;  %v112_v20 = vadd.f32 %v1380_v12, %v101_v13  ;;  %v113_v21 = vadd.f32 %v1380_v12, %v102_v14  ;;  %v114_v22 = vadd.f32 %v1380_v12, %v103_v15  ;;  %v115_v23 = vadd.f32 %v1380_v12, %v104_v16  ;;  %v1388_v26 = vld [vmem:[%s2165_s0 + $0x38] sm:$0xff]  ;;  %359 = vmatprep.subr.bf16.mxu1 %v1585_v17  ;;  %v180_v62 = vld [vmem:[#allocation2 + $0x10] sm:$0x1] }
  0x62   :  { %v199_v27 = vmul.f32 %v1385_v19, %v1379_v11  ;;  %vm245_vm10 = vcmask 125953   ;;  %v201_v29 = vmul.f32 %v1387_v25, %v1379_v11  ;;  %v202_v30 = vmul.f32 %v1388_v26, %v1379_v11  ;;  %360 = vmatpush1.bf16.msra.mxu1 %v1587_v18  ;;  %vm1871_vm13 = vmand %vm252_vm7, %vm253_vm6  ;;  %v255_v7 = vld [vmem:[#allocation2 + $0x20] sm:$0x2]  ;;  %v1580_v25 = vld [vmem:[#allocation7 + $0x20] ss:$8 sps:$4 sm:$0xff]  }
  0x63   :  { %v1488_v31 = vpack.c.bf16 %v112_v20, %v112_v20  ;;  %v1489_v32 = vpack.c.bf16 %v113_v21, %v113_v21  ;;  %v1490_v33 = vpack.c.bf16 %v114_v22, %v114_v22  ;;  %v1491_v34 = vpack.c.bf16 %v115_v23, %v115_v23  ;;  %1528 = vmatprep.subr.bf16.mxu1 %v1577_v2  ;;  %vm1888_vm14 = vmor %vm226_vm8, %vm227_vm9 }
  0x64   :  { %v210_v35 = vadd.f32 %v1380_v12, %v199_v27  ;;  %v211_v36 = vadd.f32 %v1380_v12, %v200_v28  ;;  %v212_v37 = vadd.f32 %v1380_v12, %v201_v29  ;;  %v213_v38 = vadd.f32 %v1380_v12, %v202_v30  ;;  %vm183_vm15 = vmand %vm84_vm0, %vm171_vm4 }
  0x65   :  { %v131_v39 = vshrl.u32 %v1488_v31, 16  ;;  %v134_v40 = vshll.u32 %v1488_v31, 16  ;;  %v139_v41 = vshrl.u32 %v1489_v32, 16  ;;  %v142_v42 = vshll.u32 %v1489_v32, 16  ;;  %v173_v55 = vld [vmem:[#allocation2] sm:$0xf] }
  0x66   :  { %v148_v43 = vshrl.u32 %v1490_v33, 16  ;;  %v151_v44 = vshll.u32 %v1490_v33, 16  ;;  %v157_v45 = vshrl.u32 %v1491_v34, 16  ;;  %v160_v46 = vshll.u32 %v1491_v34, 16 }
  0x67   :  { %v133_v48 = vrot.slane %v131_v39, 7  ;;  %v141_v49 = vrot.slane %v139_v41, 7  ;;  %v1492_v50 = vpack.c.bf16 %v210_v35, %v210_v35  ;;  %v1493_v51 = vpack.c.bf16 %v211_v36, %v211_v36 }
  0x68   :  { %v150_v52 = vrot.slane %v148_v43, 7  ;;  %v159_v53 = vrot.slane %v157_v45, 7  ;;  %v1494_v56 = vpack.c.bf16 %v212_v37, %v212_v37  ;;  %v1495_v57 = vpack.c.bf16 %v213_v38, %v213_v38 }
  0x69   :  { %v136_v58 = vor.u32 %v134_v40, %v133_v48  ;;  %v137_v59 = vrot.slane %v133_v48, 4  ;;  %v144_v60 = vor.u32 %v142_v42, %v141_v49  ;;  %v146_v61 = vrot.slane %v141_v49, 4 }
  0x6a   :  { %v153_v63 = vor.u32 %v151_v44, %v150_v52  ;;  %v155_v2 = vrot.slane %v150_v52, 4  ;;  %v162_v4 = vor.u32 %v160_v46, %v159_v53  ;;  %v164_v5 = vrot.slane %v159_v53, 4 }
  0x6b   :  { %v145_v8 = vsel %vm1859_vm11, %v137_v59, %v144_v60  ;;  %v174_v9 = vsel %vm1865_vm12, %v136_v58, %v173_v55  ;;  %v229_v10 = vrot.slane %v1492_v50, 7  ;;  %v231_v11 = vrot.slane %v1493_v51, 7 }
  0x6c   :  { %v154_v12 = vsel %vm1859_vm11, %v146_v61, %v153_v63  ;;  %v163_v13 = vsel %vm1859_vm11, %v155_v2, %v162_v4  ;;  %175 = vst [vmem:[#allocation2] sm:$0xf] %v174_v9  ;;  %177 = vst.msk [vmem:[#allocation2 + $0x4] sm:$0xf] %vm170_vm5, %v145_v8  ;;  %v181_v14 = vsel %vm1824_vm2, %v164_v5, %v180_v62  ;;  %v234_v16 = vrot.slane %v1494_v56, 7 }
  0x6d   :  { %182 = vst [vmem:[#allocation2 + $0x10] sm:$0x1] %v181_v14  ;;  %178 = vst.msk [vmem:[#allocation2 + $0x8] sm:$0xf] %vm170_vm5, %v154_v12  ;;  %v230_v17 = vrot.slane %v229_v10, 4  ;;  %v233_v18 = vrot.slane %v231_v11, 4  ;;  %v687_v12 = vlaneseq }
  0x6e   :  { %179 = vst.msk [vmem:[#allocation2 + $0xc] sm:$0xf] %vm170_vm5, %v163_v13  ;;  %v237_v19 = vrot.slane %v1495_v57, 7  ;;  %v256_v1 = vsel %vm1871_vm13, 0, %v255_v7  ;;  %v236_v20 = vrot.slane %v234_v16, 4  ;;  %vm343_vm1 = vcmask 130048  }
  0x6f   :  { %246 = vst.msk [vmem:[#allocation2 + $0x10] sm:$0xe] %vm245_vm10, %v229_v10  ;;  %257 = vst [vmem:[#allocation2 + $0x20] sm:$0x2] %v256_v1  ;;  %v232_v21 = vsel %vm1888_vm14, %v230_v17, %v231_v11  ;;  %v235_v22 = vsel %vm1888_vm14, %v233_v18, %v234_v16  ;;  %vm294_vm2 = vsmask.f32 7424 }
  0x70   :  { %v239_v23 = vrot.slane %v237_v19, 4  ;;  %247 = vst.msk [vmem:[#allocation2 + $0x14] sm:$0xf] %vm170_vm5, %v232_v21  ;;  %v238_v24 = vsel %vm1888_vm14, %v236_v20, %v237_v19  ;;  %248 = vst.msk [vmem:[#allocation2 + $0x18] sm:$0xf] %vm170_vm5, %v235_v22  ;;  %v688_v14 = vshrl.u32 %v687_v12, 7 }
  0x71   :  { %249 = vst.msk [vmem:[#allocation2 + $0x1c] sm:$0xf] %vm170_vm5, %v238_v24  ;;  %v685_v19 = vld [vmem:[#allocation8] sm:$0x3]  ;;  %v715_v20 = vld [vmem:[#allocation10] sm:$0x3] }
  0x72   :  { %251 = vst.msk [vmem:[#allocation2 + $0x20] sm:$0x1] %vm84_vm0, %v239_v23  ;;  %vm551_vm0 = vcmask 1046528   ;;  %v689_v18 = vsub.s32 0, %v688_v14  ;;  %v693_v1 = vsub.s32 1, %v688_v14  ;;  %vm1301_vm3 = vcmask 1041409  }
  0x73   :  { %v258_v26 = vld [vmem:[#allocation2] sm:$0xf]  ;;  %v259_v27 = vld [vmem:[#allocation2 + $0x4] sm:$0xf]  ;;  %v1717_v24 = vmov 1983009808  }
  0x74   :  { %v184_v28 = vld [vmem:[#allocation2 + $0x10] sm:$0x1]  ;;  %v1395_v29 = vcombine.low %v258_v26, %v259_v27  ;;  %v541_v44 = vld [vmem:[#allocation2] sm:$0xe]  ;;  %v1952_v26 = vrot.slane %v685_v19, %v693_v1  ;;  %vm1021_vm4 = vcmask 1042434   ;;  %vm1306_vm5 = vcmask 1043459  }
  0x75   :  { %v185_v30 = vsel %vm183_vm15, 0, %v184_v28  ;;  %v1588_v31 = vld [vmem:[#allocation2 + $0x8] sm:$0xff]   ;;  %v1414_v48 = vcombine.low %v541_v44, %v259_v27  ;;  %v1954_v28 = vrot.slane %v715_v20, %v689_v18  ;;  %vm1311_vm6 = vcmask 1045509   ;;  %vm1022_vm11 = vmor %vm226_vm8, %vm1021_vm4 }
  0x76   :  { %1409 = vmatmul.mubr.msk.bf16.vlgmr.msra.gmra.mrb[0].mxu0 %vm343_vm1, %v1395_v29  ;;  %186 = vst [vmem:[#allocation2 + $0x10] sm:$0x1] %v185_v30  ;;  %v296_v32 = vshrl.u32 %v1395_v29, 16  ;;  %v298_v33 = vshll.u32 %v1395_v29, 16  ;;  %v303_v34 = vshll.u32 %v1588_v31, 16  ;;  %v307_v38 = vshrl.u32 %v1588_v31, 16  ;;  %vm1024_vm12 = vmor %vm1022_vm11, %vm227_vm9 }
  0x77   :  { %587 = vmatpush1.bf16.msra.mxu0 %v1580_v25  ;;  %502 = vmatprep.mubr.bf16.mxu0 %v1716_v0  ;;  %v552_v52 = vrot.slane %v1414_v48, 1  ;;  %v553_v53 = vrot.slane %v1588_v31, 1  ;;  %v778_v25 = vunpack.c.l.s4 %v1717_v24  ;;  %vm1025_vm7 = vcmask 1046534  }
  0x78   :  { %v300_v35 = vrot.slane %v298_v33, 1  ;;  %v305_v36 = vrot.slane %v303_v34, 1  ;;  %v1590_v41 = vld [vmem:[#allocation2 + $0x18] sm:$0xff]   ;;  %vm1316_vm10 = vcmask 1047559   ;;  %vm2069_vm8 = vmor %vm1024_vm12, %vm1025_vm7 }
  0x79   :  { %v319_v47 = vshll.u32 %v1590_v41, 16  ;;  %v1591_v51 = vld [vmem:[#allocation2 + $0x20] ss:$0 sps:$4 sm:$0x11]   ;;  %v323_v55 = vshrl.u32 %v1590_v41, 16  ;;  %v554_v57 = vsel %vm551_vm0, %v552_v52, %v553_v53  ;;  %v557_v63 = vrot.slane %v1590_v41, 1 }
  0x7a   :  { %v301_v37 = vor.u32 %v300_v35, %v296_v32  ;;  %v309_v42 = vor.u32 %v307_v38, %v305_v36  ;;  %v327_v56 = vshll.u32 %v1591_v51, 16  ;;  %v331_v2 = vshrl.u32 %v1591_v51, 16  ;;  %v1592_v5 = vld [vmem:[#allocation2 + $0x20] ss:$0 sps:$4 sm:$0x33]  }
  0x7b   :  { %v321_v50 = vrot.slane %v319_v47, 1  ;;  %v559_v6 = vrot.slane %v1592_v5, 1  ;;  %v1958_v32 = vrot.slane %v715_v20, %v693_v1  ;;  %v779_v38 = vunpack.c.0.s8 %v778_v25 }
  0x7c   :  { %v306_v39 = vsel %vm294_vm2, %v301_v37, %v305_v36  ;;  %v329_v59 = vrot.slane %v327_v56, 1 }
  0x7d   :  { %1402 = vmatmul.mubr.msk.bf16.vlgmr.msra.gmra.mrb[0].mxu1 %vm343_vm1, %v306_v39  ;;  %v1589_v40 = vld [vmem:[#allocation2 + $0x10] sm:$0xff]   ;;  %v325_v58 = vor.u32 %v323_v55, %v321_v50  ;;  %v560_v7 = vsel %vm551_vm0, %v557_v63, %v559_v6  ;;  %v1969_v47 = vsub.s32 %v779_v38, %v688_v14 }
  0x7e   :  { %1529 = vmatpush1.bf16.msra.mxu1 %v1828_v3  ;;  %1410 = vmatmul.mubr.msk.bf16.gmra.mrb[4].mxu0 %vm343_vm1, %v1588_v31  ;;  %v311_v43 = vshll.u32 %v1589_v40, 16  ;;  %v315_v46 = vshrl.u32 %v1589_v40, 16  ;;  %v555_v60 = vrot.slane %v1589_v40, 1 }
  0x7f   :  { %401 = vmatprep.mubr.bf16.mxu1 %v1716_v0  ;;  %512 = vmatprep.mubr.bf16.mxu0 %v1716_v0  ;;  %v330_v61 = vsel %vm294_vm2, %v325_v58, %v329_v59 }
  0x80   :  { %v313_v45 = vrot.slane %v311_v43, 1  ;;  %v556_v62 = vsel %vm551_vm0, %v553_v53, %v555_v60  ;;  %v558_v4 = vsel %vm551_vm0, %v555_v60, %v557_v63 }
  0x82   :  { %v314_v49 = vsel %vm294_vm2, %v309_v42, %v313_v45  ;;  %v317_v3 = vor.u32 %v315_v46, %v313_v45 }
  0x84   :  { %v322_v54 = vsel %vm294_vm2, %v317_v3, %v321_v50 }
  0x85   :  { %1403 = vmatmul.mubr.msk.bf16.gmra.mrb[4].mxu1 %vm343_vm1, %v314_v49 }
  0x86   :  { %1411 = vmatmul.mubr.msk.bf16.gmra.mrb[8].mxu0 %vm343_vm1, %v1589_v40  ;;  %411 = vmatprep.mubr.bf16.mxu1 %v1716_v0 }
  0x87   :  { %618 = vmatprep.mubr.bf16.mxu0 %v1716_v0 }
  0x8d   :  { %1404 = vmatmul.mubr.msk.bf16.gmra.mrb[8].mxu1 %vm343_vm1, %v322_v54 }
  0x8e   :  { %1418 = vmatmul.mubr.msk.bf16.vlgmr.msra.gmra.mrb[0].mxu0 %vm343_vm1, %v554_v57  ;;  %421 = vmatprep.mubr.bf16.mxu1 %v1716_v0 }
  0x8f   :  { %628 = vmatprep.mubr.bf16.mxu0 %v1716_v0 }
  0x95   :  { %1405 = vmatmul.mubr.msk.bf16.gmra.mrb[12].mxu1 %vm343_vm1, %v330_v61 }
  0x96   :  { %1419 = vmatmul.mubr.msk.bf16.gmra.mrb[4].mxu0 %vm343_vm1, %v556_v62  ;;  %431 = vmatprep.mubr.bf16.mxu1 %v1716_v0 }
  0x97   :  { %638 = vmatprep.mubr.bf16.mxu0 %v1716_v0 }
  0x9d   :  { %1406 = vmatmul.mubr.msk.bf16.gmra.mrb[16].mxu1 %vm343_vm1, %v331_v2 }
  0x9e   :  { %1420 = vmatmul.mubr.msk.bf16.gmra.mrb[8].mxu0 %vm343_vm1, %v558_v4  ;;  %522 = vmatprep.mubr.bf16.mxu1 %v1716_v0 }
  0x9f   :  { %648 = vmatprep.mubr.bf16.mxu0 %v1716_v0 }
  0xa5   :  { %1412 = vmatmul.mubr.msk.bf16.vlgmr.msra.gmra.mrb[12].mxu1 %vm343_vm1, %v1590_v41 }
  0xa6   :  { %1421 = vmatmul.mubr.msk.bf16.gmra.mrb[12].mxu0 %vm343_vm1, %v560_v7  ;;  %532 = vmatprep.mubr.bf16.mxu1 %v1716_v0 }
  0xa7   :  { %658 = vmatprep.mubr.bf16.mxu0 %v1716_v0  ;;  %v1948_v0 = vrot.slane %v685_v19, %v689_v18 }
  0xad   :  { %1413 = vmatmul.mubr.msk.bf16.gmra.mrb[16].mxu1 %vm343_vm1, %v1591_v51 }
  0xae   :  { %1422 = vmatmul.mubr.msk.bf16.gmra.mrb[16].mxu0 %vm343_vm1, %v559_v6 }
 0x150   :  { %v393_v8 = vpop.f32.mrb[0].mxu1 }
 0x151   :  { %v395_v9 = vpop.f32.mrb[1].mxu1 }
 0x152   :  { %v397_v10 = vpop.f32.mrb[2].mxu1 }
 0x153   :  { %v399_v11 = vpop.f32.mrb[3].mxu1 }
 0x158   :  { %v403_v13 = vpop.f32.mrb[4].mxu1 }
 0x159   :  { %v405_v15 = vpop.f32.mrb[5].mxu1 }
 0x15a   :  { %v407_v16 = vpop.f32.mrb[6].mxu1 }
 0x15b   :  { %v409_v17 = vpop.f32.mrb[7].mxu1 }
 0x160   :  { %v1946_v21 = vpop.f32.mrb[8].mxu1 }
 0x161   :  { %v1950_v22 = vpop.f32.mrb[9].mxu1  ;;  %v620_v23 = vpop.f32.mrb[0].mxu0 }
 0x162   :  { %v1530_v27 = vadd.f32 %v620_v23, %v393_v8  ;;  %v1956_v29 = vpop.f32.mrb[10].mxu1  ;;  %v622_v30 = vpop.f32.mrb[1].mxu0 }
 0x163   :  { %v1531_v31 = vadd.f32 %v622_v30, %v395_v9  ;;  %v1960_v33 = vpop.f32.mrb[11].mxu1  ;;  %v624_v34 = vpop.f32.mrb[2].mxu0 }
 0x164   :  { %v697_v35 = vmul.f32 %v1530_v27, %v1948_v0  ;;  %v1532_v36 = vadd.f32 %v624_v34, %v397_v10  ;;  %v626_v37 = vpop.f32.mrb[3].mxu0 }
 0x165   :  { %v698_v39 = vmul.f32 %v1531_v31, %v1952_v26  ;;  %v1533_v40 = vadd.f32 %v626_v37, %v399_v11 }
 0x166   :  { %v727_v41 = vadd.f32 %v1954_v28, %v697_v35  ;;  %v699_v42 = vmul.f32 %v1532_v36, %v1948_v0 }
 0x167   :  { %v728_v43 = vadd.f32 %v1958_v32, %v698_v39  ;;  %v700_v44 = vmul.f32 %v1533_v40, %v1952_v26 }
 0x168   :  { %v745_v45 = vmax.f32 %v727_v41, 0.0  ;;  %v729_v46 = vadd.f32 %v1954_v28, %v699_v42 }
 0x169   :  { %v746_v48 = vmax.f32 %v728_v43, 0.0  ;;  %v730_v49 = vadd.f32 %v1958_v32, %v700_v44  ;;  %v630_v3 = vpop.f32.mrb[4].mxu0 }
 0x16a   :  { %v747_v50 = vmax.f32 %v729_v46, 0.0  ;;  %v1534_v51 = vadd.f32 %v630_v3, %v403_v13  ;;  %v632_v52 = vpop.f32.mrb[5].mxu0 }
 0x16b   :  { %v763_v53 = vmax.f32 %v745_v45, %v746_v48  ;;  %v748_v54 = vmax.f32 %v730_v49, 0.0  ;;  %v1535_v55 = vadd.f32 %v632_v52, %v405_v15  ;;  %v634_v56 = vpop.f32.mrb[6].mxu0 }
 0x16c   :  { %v701_v57 = vmul.f32 %v1534_v51, %v1948_v0  ;;  %v1536_v58 = vadd.f32 %v634_v56, %v407_v16  ;;  %v636_v59 = vpop.f32.mrb[7].mxu0 }
 0x16d   :  { %v776_v60 = vcombine.high %v763_v53, %v763_v53  ;;  %v783_v61 = vrot.slane %v763_v53, %v1969_v47  ;;  %v764_v62 = vmax.f32 %v747_v50, %v748_v54  ;;  %v702_v63 = vmul.f32 %v1535_v55, %v1952_v26 }
 0x16e   :  { %v731_v2 = vadd.f32 %v1954_v28, %v701_v57  ;;  %v703_v4 = vmul.f32 %v1536_v58, %v1948_v0  ;;  %v1977_v5 = vadd.f32 %v636_v59, %v409_v17 }
 0x16f   :  { %v790_v6 = vrot.slane %v776_v60, %v1969_v47  ;;  %v791_v7 = vcombine.high %v783_v61, %v783_v61  ;;  %v1423_v8 = vrot.slane %v783_v61, 9  ;;  %v793_v9 = vcombine.high %v764_v62, %v764_v62 }
 0x170   :  { %v800_v10 = vrot.slane %v764_v62, %v1969_v47  ;;  %v749_v11 = vmax.f32 %v731_v2, 0.0  ;;  %v732_v12 = vadd.f32 %v1958_v32, %v702_v63  ;;  %v1983_v13 = vadd.f32 %v1954_v28, %v703_v4 }
 0x171   :  { %v792_v14 = vcombine.high %v790_v6, %v790_v6  ;;  %v1424_v15 = vrot.slane %v791_v7, 9  ;;  %v1425_v16 = vrot.slane %v790_v6, 9  ;;  %v908_v18 = vmax.f32 %v783_v61, %v1423_v8  ;;  %v1985_v17 = vpop.f32.mrb[8].mxu0 }
 0x172   :  { %v807_v19 = vrot.slane %v793_v9, %v1969_v47  ;;  %v808_v1 = vcombine.high %v800_v10, %v800_v10  ;;  %v1427_v20 = vrot.slane %v800_v10, 9  ;;  %v750_v23 = vmax.f32 %v732_v12, 0.0  ;;  %v1988_v24 = vpop.f32.mrb[9].mxu0 }
 0x173   :  { %v1426_v25 = vrot.slane %v792_v14, 9  ;;  %v909_v27 = vmax.f32 %v791_v7, %v1424_v15  ;;  %v910_v30 = vmax.f32 %v790_v6, %v1425_v16  ;;  %v1496_v31 = vpack.c.bf16 %v908_v18, %v908_v18  ;;  %v1990_v34 = vpop.f32.mrb[10].mxu0 }
 0x174   :  { %v809_v35 = vcombine.high %v807_v19, %v807_v19  ;;  %v1428_v36 = vrot.slane %v808_v1, 9  ;;  %v1429_v37 = vrot.slane %v807_v19, 9  ;;  %v912_v38 = vmax.f32 %v800_v10, %v1427_v20  ;;  %v1992_v39 = vpop.f32.mrb[11].mxu0 }
 0x175   :  { %v911_v40 = vmax.f32 %v792_v14, %v1426_v25  ;;  %v1497_v41 = vpack.c.bf16 %v909_v27, %v909_v27  ;;  %v1498_v42 = vpack.c.bf16 %v910_v30, %v910_v30  ;;  %v1268_v43 = vunpack.c.l.b16 %v1496_v31 }
 0x176   :  { %v1430_v44 = vrot.slane %v809_v35, 9  ;;  %v913_v45 = vmax.f32 %v808_v1, %v1428_v36  ;;  %v914_v46 = vmax.f32 %v807_v19, %v1429_v37  ;;  %v1500_v48 = vpack.c.bf16 %v912_v38, %v912_v38 }
 0x177   :  { %v1499_v49 = vpack.c.bf16 %v911_v40, %v911_v40  ;;  %v1269_v3 = vunpack.c.l.b16 %v1497_v41  ;;  %v1270_v50 = vunpack.c.l.b16 %v1498_v42  ;;  %v765_v51 = vmax.f32 %v749_v11, %v750_v23 }
 0x178   :  { %v915_v52 = vmax.f32 %v809_v35, %v1430_v44  ;;  %v1501_v53 = vpack.c.bf16 %v913_v45, %v913_v45  ;;  %v1502_v54 = vpack.c.bf16 %v914_v46, %v914_v46  ;;  %v1272_v55 = vunpack.c.l.b16 %v1500_v48  ;;  %v1994_v56 = vpop.f32.mrb[12].mxu1 }
 0x179   :  { %v1271_v57 = vunpack.c.l.b16 %v1499_v49  ;;  %v1300_v58 = vrot.slane %v1269_v3, 7  ;;  %v1303_v59 = vrot.slane %v1270_v50, 6  ;;  %v810_v60 = vcombine.high %v765_v51, %v765_v51  ;;  %v1996_v61 = vpop.f32.mrb[13].mxu1  ;;  %v1998_v62 = vpop.f32.mrb[12].mxu0 }
 0x17a   :  { %v1503_v63 = vpack.c.bf16 %v915_v52, %v915_v52  ;;  %v1273_v2 = vunpack.c.l.b16 %v1501_v53  ;;  %v1274_v4 = vunpack.c.l.b16 %v1502_v54  ;;  %v1308_v6 = vrot.slane %v1272_v55, 4  ;;  %v2000_v7 = vpop.f32.mrb[14].mxu1  ;;  %v2002_v8 = vpop.f32.mrb[13].mxu0 }
 0x17b   :  { %v1302_v9 = vsel %vm1301_vm3, %v1300_v58, %v1268_v43  ;;  %v1305_v10 = vrot.slane %v1271_v57, 5  ;;  %v817_v11 = vrot.slane %v765_v51, %v1969_v47  ;;  %v824_v12 = vrot.slane %v810_v60, %v1969_v47  ;;  %v2007_v14 = vpop.f32.mrb[15].mxu1  ;;  %v2009_v15 = vpop.f32.mrb[14].mxu0 }
 0x17c   :  { %v1304_v16 = vsel %vm1021_vm4, %v1303_v59, %v1302_v9  ;;  %v1275_v18 = vunpack.c.l.b16 %v1503_v63  ;;  %v1310_v19 = vrot.slane %v1273_v2, 3  ;;  %v1313_v1 = vrot.slane %v1274_v4, 2  ;;  %v2012_v20 = vpop.f32.mrb[15].mxu0 }
 0x17d   :  { %v1307_v23 = vsel %vm1306_vm5, %v1305_v10, %v1304_v16  ;;  %v825_v25 = vcombine.high %v817_v11, %v817_v11  ;;  %v826_v27 = vcombine.high %v824_v12, %v824_v12  ;;  %v1431_v30 = vrot.slane %v817_v11, 9 }
 0x17e   :  { %v1309_v31 = vsel %vm227_vm9, %v1308_v6, %v1307_v23  ;;  %v1315_v35 = vrot.slane %v1275_v18, 1  ;;  %v1433_v36 = vrot.slane %v824_v12, 9  ;;  %v751_v37 = vmax.f32 %v1983_v13, 0.0 }
 0x17f   :  { %v1312_v38 = vsel %vm1311_vm6, %v1310_v19, %v1309_v31  ;;  %v1432_v40 = vrot.slane %v825_v25, 9  ;;  %v1434_v41 = vrot.slane %v826_v27, 9  ;;  %v916_v42 = vmax.f32 %v817_v11, %v1431_v30 }
 0x180   :  { %v1314_v43 = vsel %vm1025_vm7, %v1313_v1, %v1312_v38  ;;  %v918_v44 = vmax.f32 %v824_v12, %v1433_v36  ;;  %v704_v45 = vmul.f32 %v1977_v5, %v1952_v26  ;;  %v1538_v46 = vadd.f32 %v1985_v17, %v1946_v21  ;;  %v2023_v48 = vpop.f32.mrb[16].mxu1 }
 0x181   :  { %v1317_v49 = vsel %vm1316_vm10, %v1315_v35, %v1314_v43  ;;  %v917_v3 = vmax.f32 %v825_v25, %v1432_v40  ;;  %v919_v13 = vmax.f32 %v826_v27, %v1434_v41  ;;  %v1504_v50 = vpack.c.bf16 %v916_v42, %v916_v42  ;;  %v2026_v51 = vpop.f32.mrb[17].mxu1  ;;  %v2028_v52 = vpop.f32.mrb[16].mxu0 }
 0x182   :  { %v1360_v53 = vpack.c.b16 %v1317_v49, %v1317_v49  ;;  %v1506_v54 = vpack.c.bf16 %v918_v44, %v918_v44  ;;  %v734_v55 = vadd.f32 %v1958_v32, %v704_v45  ;;  %v705_v5 = vmul.f32 %v1538_v46, %v1948_v0  ;;  %v538_v57 = vpop.f32.mrb[18].mxu1  ;;  %v2032_v58 = vpop.f32.mrb[17].mxu0 }
 0x183   :  { %v1505_v21 = vpack.c.bf16 %v917_v3, %v917_v3  ;;  %v1507_v17 = vpack.c.bf16 %v919_v13, %v919_v13  ;;  %v1276_v59 = vunpack.c.l.b16 %v1504_v50  ;;  %v1539_v60 = vadd.f32 %v1988_v24, %v1950_v22  ;;  %v539_v63 = vpop.f32.mrb[19].mxu1  ;;  %v664_v2 = vpop.f32.mrb[18].mxu0 }
 0x184   :  { %1368 = vst [vmem:[%s2171_s6] sm:$0xf] %v1360_v53  ;;  %v1278_v4 = vunpack.c.l.b16 %v1506_v54  ;;  %v752_v6 = vmax.f32 %v734_v55, 0.0  ;;  %v735_v9 = vadd.f32 %v1954_v28, %v705_v5  ;;  %v1540_v10 = vadd.f32 %v1990_v34, %v1956_v29  ;;  %v665_v11 = vpop.f32.mrb[19].mxu0 }
 0x185   :  { %v1277_v12 = vunpack.c.l.b16 %v1505_v21  ;;  %v1279_v16 = vunpack.c.l.b16 %v1507_v17  ;;  %v706_v18 = vmul.f32 %v1539_v60, %v1952_v26  ;;  %v1541_v22 = vadd.f32 %v1992_v39, %v1960_v33 }
 0x186   :  { %v1320_v24 = vrot.slane %v1278_v4, 6  ;;  %v766_v19 = vmax.f32 %v751_v37, %v752_v6  ;;  %v753_v1 = vmax.f32 %v735_v9, 0.0  ;;  %v707_v23 = vmul.f32 %v1540_v10, %v1948_v0 }
 0x187   :  { %v1318_v25 = vrot.slane %v1277_v12, 7  ;;  %v1322_v27 = vrot.slane %v1279_v16, 5  ;;  %v736_v30 = vadd.f32 %v1958_v32, %v706_v18  ;;  %v708_v31 = vmul.f32 %v1541_v22, %v1952_v26 }
 0x188   :  { %v827_v29 = vcombine.high %v766_v19, %v766_v19  ;;  %v834_v34 = vrot.slane %v766_v19, %v1969_v47  ;;  %v737_v35 = vadd.f32 %v1954_v28, %v707_v23  ;;  %v2052_v36 = vadd.f32 %v1998_v62, %v1994_v56 }
 0x189   :  { %v1319_v33 = vsel %vm1301_vm3, %v1318_v25, %v1276_v59  ;;  %v754_v39 = vmax.f32 %v736_v30, 0.0  ;;  %v738_v37 = vadd.f32 %v1958_v32, %v708_v31  ;;  %v2058_v38 = vadd.f32 %v2002_v8, %v1996_v61 }
 0x18a   :  { %v1321_v40 = vsel %vm1021_vm4, %v1320_v24, %v1319_v33  ;;  %v841_v41 = vrot.slane %v827_v29, %v1969_v47  ;;  %v842_v42 = vcombine.high %v834_v34, %v834_v34  ;;  %v1435_v43 = vrot.slane %v834_v34, 9 }
 0x18b   :  { %v767_v56 = vmax.f32 %v753_v1, %v754_v39  ;;  %v755_v62 = vmax.f32 %v737_v35, 0.0  ;;  %v756_v44 = vmax.f32 %v738_v37, 0.0  ;;  %v1323_v61 = vsel %vm1306_vm5, %v1322_v27, %v1321_v40 }
 0x18c   :  { %v843_v45 = vcombine.high %v841_v41, %v841_v41  ;;  %v1436_v46 = vrot.slane %v842_v42, 9  ;;  %v1437_v49 = vrot.slane %v841_v41, 9  ;;  %v920_v3 = vmax.f32 %v834_v34, %v1435_v43 }
 0x18d   :  { %v945_v8 = vcombine.high %v767_v56, %v767_v56  ;;  %v952_v13 = vrot.slane %v767_v56, %v1969_v47  ;;  %v768_v50 = vmax.f32 %v755_v62, %v756_v44 }
 0x18e   :  { %v1438_v53 = vrot.slane %v843_v45, 9  ;;  %v921_v54 = vmax.f32 %v842_v42, %v1436_v46  ;;  %v922_v55 = vmax.f32 %v841_v41, %v1437_v49  ;;  %v1508_v5 = vpack.c.bf16 %v920_v3, %v920_v3 }
 0x18f   :  { %v959_v57 = vrot.slane %v945_v8, %v1969_v47  ;;  %v960_v21 = vcombine.high %v952_v13, %v952_v13  ;;  %v1439_v17 = vrot.slane %v952_v13, 9  ;;  %v962_v59 = vcombine.high %v768_v50, %v768_v50 }
 0x190   :  { %v923_v63 = vmax.f32 %v843_v45, %v1438_v53  ;;  %v1509_v2 = vpack.c.bf16 %v921_v54, %v921_v54  ;;  %v1510_v4 = vpack.c.bf16 %v922_v55, %v922_v55  ;;  %v1280_v6 = vunpack.c.l.b16 %v1508_v5 }
 0x191   :  { %v961_v9 = vcombine.high %v959_v57, %v959_v57  ;;  %v1029_v10 = vrot.slane %v960_v21, 7  ;;  %v1032_v11 = vrot.slane %v959_v57, 7  ;;  %v969_v12 = vrot.slane %v768_v50, %v1969_v47 }
 0x192   :  { %v1511_v16 = vpack.c.bf16 %v923_v63, %v923_v63  ;;  %v1281_v18 = vunpack.c.l.b16 %v1509_v2  ;;  %v1282_v22 = vunpack.c.l.b16 %v1510_v4  ;;  %v1324_v24 = vrot.slane %v1280_v6, 4 }
 0x193   :  { %v1030_v19 = vsel %vm2069_vm8, %v1439_v17, %v1029_v10  ;;  %v1031_v1 = vrot.slane %v1029_v10, 2  ;;  %v1034_v23 = vrot.slane %v1032_v11, 2  ;;  %v1035_v25 = vrot.slane %v961_v9, 7 }
 0x194   :  { %v1283_v27 = vunpack.c.l.b16 %v1511_v16  ;;  %v1325_v30 = vsel %vm227_vm9, %v1324_v24, %v1323_v61  ;;  %v1326_v31 = vrot.slane %v1281_v18, 3  ;;  %v1328_v29 = vrot.slane %v1282_v22, 2 }
 0x195   :  { %v1033_v34 = vsel %vm2069_vm8, %v1031_v1, %v1032_v11  ;;  %v1036_v35 = vsel %vm2069_vm8, %v1034_v23, %v1035_v25  ;;  %v1037_v33 = vrot.slane %v1035_v25, 2  ;;  %v1440_v39 = vrot.slane %v1030_v19, 9 }
 0x196   :  { %v1327_v37 = vsel %vm1311_vm6, %v1326_v31, %v1325_v30  ;;  %v1330_v40 = vrot.slane %v1283_v27, 1  ;;  %v1441_v41 = vrot.slane %v1033_v34, 9  ;;  %v1442_v42 = vrot.slane %v1036_v35, 9 }
 0x197   :  { %v1329_v43 = vsel %vm1025_vm7, %v1328_v29, %v1327_v37  ;;  %v1140_v56 = vmax.f32 %v1030_v19, %v1440_v39  ;;  %v976_v62 = vrot.slane %v962_v59, %v1969_v47  ;;  %v977_v44 = vcombine.high %v969_v12, %v969_v12 }
 0x198   :  { %v1331_v45 = vsel %vm1316_vm10, %v1330_v40, %v1329_v43  ;;  %v1141_v46 = vmax.f32 %v1033_v34, %v1441_v41  ;;  %v1142_v49 = vmax.f32 %v1036_v35, %v1442_v42  ;;  %v1038_v3 = vrot.slane %v969_v12, 7 }
 0x199   :  { %v1361_v61 = vpack.c.b16 %v1331_v45, %v1331_v45  ;;  %v1512_v8 = vpack.c.bf16 %v1140_v56, %v1140_v56  ;;  %v978_v13 = vcombine.high %v976_v62, %v976_v62  ;;  %v1041_v50 = vrot.slane %v977_v44, 7 }
 0x19a   :  { %v1513_v53 = vpack.c.bf16 %v1141_v46, %v1141_v46  ;;  %v1514_v54 = vpack.c.bf16 %v1142_v49, %v1142_v49  ;;  %v1039_v55 = vsel %vm2069_vm8, %v1037_v33, %v1038_v3  ;;  %v1040_v5 = vrot.slane %v1038_v3, 2 }
 0x19b   :  { %1369 = vst [vmem:[%s2171_s6 + $0x4] sm:$0xf] %v1361_v61  ;;  %v1043_v57 = vrot.slane %v1041_v50, 2  ;;  %v1044_v21 = vrot.slane %v976_v62, 7  ;;  %v2090_v17 = vrot.slane %v978_v13, 7  ;;  %v709_v59 = vmul.f32 %v2052_v36, %v1948_v0 }
 0x19c   :  { %v1285_v63 = vunpack.c.l.b16 %v1513_v53  ;;  %v1286_v2 = vunpack.c.l.b16 %v1514_v54  ;;  %v1042_v4 = vsel %vm2069_vm8, %v1040_v5, %v1041_v50  ;;  %v1443_v6 = vrot.slane %v1039_v55, 9 }
 0x19d   :  { %v1284_v9 = vunpack.c.l.b16 %v1512_v8  ;;  %v1045_v10 = vsel %vm2069_vm8, %v1043_v57, %v1044_v21  ;;  %v1046_v11 = vrot.slane %v1044_v21, 2  ;;  %v1444_v12 = vrot.slane %v1042_v4, 9 }
 0x19e   :  { %v1332_v16 = vrot.slane %v1285_v63, 7  ;;  %v1334_v18 = vrot.slane %v1286_v2, 6  ;;  %v1445_v22 = vrot.slane %v1045_v10, 9  ;;  %v1143_v24 = vmax.f32 %v1039_v55, %v1443_v6 }
 0x19f   :  { %v1048_v36 = vsel %vm2069_vm8, %v1046_v11, %v2090_v17  ;;  %v1144_v19 = vmax.f32 %v1042_v4, %v1444_v12  ;;  %v739_v1 = vadd.f32 %v1954_v28, %v709_v59  ;;  %v710_v23 = vmul.f32 %v2058_v38, %v1952_v26 }
 0x1a0   :  { %v1333_v25 = vsel %vm1301_vm3, %v1332_v16, %v1284_v9  ;;  %v1446_v27 = vrot.slane %v1048_v36, 9  ;;  %v1145_v30 = vmax.f32 %v1045_v10, %v1445_v22  ;;  %v1515_v31 = vpack.c.bf16 %v1143_v24, %v1143_v24 }
 0x1a1   :  { %v1335_v29 = vsel %vm1021_vm4, %v1334_v18, %v1333_v25  ;;  %v1516_v34 = vpack.c.bf16 %v1144_v19, %v1144_v19  ;;  %v757_v35 = vmax.f32 %v739_v1, 0.0  ;;  %v740_v33 = vadd.f32 %v1958_v32, %v710_v23 }
 0x1a2   :  { %v1146_v39 = vmax.f32 %v1048_v36, %v1446_v27  ;;  %v1517_v37 = vpack.c.bf16 %v1145_v30, %v1145_v30  ;;  %v1287_v40 = vunpack.c.l.b16 %v1515_v31  ;;  %v1544_v41 = vadd.f32 %v2009_v15, %v2000_v7 }
 0x1a3   :  { %v1288_v42 = vunpack.c.l.b16 %v1516_v34  ;;  %v758_v43 = vmax.f32 %v740_v33, 0.0  ;;  %v1545_v38 = vadd.f32 %v2012_v20, %v2007_v14  ;;  %v1546_v56 = vadd.f32 %v2028_v52, %v2023_v48 }
 0x1a4   :  { %v1518_v62 = vpack.c.bf16 %v1146_v39, %v1146_v39  ;;  %v1289_v44 = vunpack.c.l.b16 %v1517_v37  ;;  %v1336_v45 = vrot.slane %v1287_v40, 5  ;;  %v711_v46 = vmul.f32 %v1544_v41, %v1948_v0 }
 0x1a5   :  { %v1049_v49 = vrot.slane %v2090_v17, 2  ;;  %v1338_v3 = vrot.slane %v1288_v42, 4  ;;  %v769_v61 = vmax.f32 %v757_v35, %v758_v43  ;;  %v712_v8 = vmul.f32 %v1545_v38, %v1952_v26 }
 0x1a6   :  { %v1290_v7 = vunpack.c.l.b16 %v1518_v62  ;;  %v1337_v15 = vsel %vm1306_vm5, %v1336_v45, %v1335_v29  ;;  %v1340_v13 = vrot.slane %v1289_v44, 3  ;;  %v741_v14 = vadd.f32 %v1954_v28, %v711_v46 }
 0x1a7   :  { %v1339_v20 = vsel %vm227_vm9, %v1338_v3, %v1337_v15  ;;  %v979_v48 = vcombine.high %v769_v61, %v769_v61  ;;  %v986_v52 = vrot.slane %v769_v61, %v1969_v47  ;;  %v742_v50 = vadd.f32 %v1958_v32, %v712_v8 }
 0x1a8   :  { %v1341_v53 = vsel %vm1311_vm6, %v1340_v13, %v1339_v20  ;;  %v1342_v54 = vrot.slane %v1290_v7, 2  ;;  %v759_v55 = vmax.f32 %v741_v14, 0.0  ;;  %v713_v5 = vmul.f32 %v1546_v56, %v1948_v0 }
 0x1a9   :  { %v993_v57 = vrot.slane %v979_v48, %v1969_v47  ;;  %v994_v21 = vcombine.high %v986_v52, %v986_v52  ;;  %v1050_v17 = vrot.slane %v986_v52, 7  ;;  %v760_v59 = vmax.f32 %v742_v50, 0.0 }
 0x1aa   :  { %v1343_v63 = vsel %vm1025_vm7, %v1342_v54, %v1341_v53  ;;  %v1547_v2 = vadd.f32 %v2032_v58, %v2026_v51  ;;  %v743_v36 = vadd.f32 %v1954_v28, %v713_v5 }
 0x1ab   :  { %v995_v4 = vcombine.high %v993_v57, %v993_v57  ;;  %v1051_v6 = vsel %vm2069_vm8, %v1049_v49, %v1050_v17  ;;  %v1052_v9 = vrot.slane %v1050_v17, 2  ;;  %v1053_v10 = vrot.slane %v994_v21, 7 }
 0x1ac   :  { %v1056_v11 = vrot.slane %v993_v57, 7  ;;  %v1447_v12 = vrot.slane %v1051_v6, 9  ;;  %v770_v16 = vmax.f32 %v759_v55, %v760_v59  ;;  %v714_v0 = vmul.f32 %v1547_v2, %v1952_v26 }
 0x1ad   :  { %v1054_v18 = vsel %vm2069_vm8, %v1052_v9, %v1053_v10  ;;  %v1055_v22 = vrot.slane %v1053_v10, 2  ;;  %v1059_v24 = vrot.slane %v995_v4, 7  ;;  %v761_v42 = vmax.f32 %v743_v36, 0.0 }
 0x1ae   :  { %v1058_v19 = vrot.slane %v1056_v11, 2  ;;  %v1448_v51 = vrot.slane %v1054_v18, 9  ;;  %v1147_v58 = vmax.f32 %v1051_v6, %v1447_v12  ;;  %v996_v1 = vcombine.high %v770_v16, %v770_v16 }
 0x1af   :  { %v1057_v23 = vsel %vm2069_vm8, %v1055_v22, %v1056_v11  ;;  %v1061_v25 = vrot.slane %v1059_v24, 2  ;;  %v1003_v27 = vrot.slane %v770_v16, %v1969_v47  ;;  %v744_v30 = vadd.f32 %v1958_v32, %v714_v0 }
 0x1b0   :  { %v1060_v26 = vsel %vm2069_vm8, %v1058_v19, %v1059_v24  ;;  %v1449_v31 = vrot.slane %v1057_v23, 9  ;;  %v1148_v29 = vmax.f32 %v1054_v18, %v1448_v51  ;;  %v1519_v34 = vpack.c.bf16 %v1147_v58, %v1147_v58 }
 0x1b1   :  { %v1450_v35 = vrot.slane %v1060_v26, 9  ;;  %v1010_v28 = vrot.slane %v996_v1, %v1969_v47  ;;  %v1011_v33 = vcombine.high %v1003_v27, %v1003_v27  ;;  %v1062_v39 = vrot.slane %v1003_v27, 7 }
 0x1b2   :  { %v1149_v37 = vmax.f32 %v1057_v23, %v1449_v31  ;;  %v1520_v40 = vpack.c.bf16 %v1148_v29, %v1148_v29  ;;  %v1291_v41 = vunpack.c.l.b16 %v1519_v34  ;;  %v762_v46 = vmax.f32 %v744_v30, 0.0 }
 0x1b3   :  { %v1150_v43 = vmax.f32 %v1060_v26, %v1450_v35  ;;  %v1012_v38 = vcombine.high %v1010_v28, %v1010_v28  ;;  %v1063_v32 = vsel %vm2069_vm8, %v1061_v25, %v1062_v39  ;;  %v1064_v56 = vrot.slane %v1062_v39, 2 }
 0x1b4   :  { %v1521_v62 = vpack.c.bf16 %v1149_v37, %v1149_v37  ;;  %v1344_v44 = vrot.slane %v1291_v41, 1  ;;  %v1065_v45 = vrot.slane %v1011_v33, 7  ;;  %v1068_v3 = vrot.slane %v1010_v28, 7 }
 0x1b5   :  { %v1522_v49 = vpack.c.bf16 %v1150_v43, %v1150_v43  ;;  %v1071_v61 = vrot.slane %v1012_v38, 7  ;;  %v1451_v8 = vrot.slane %v1063_v32, 9  ;;  %v1292_v20 = vunpack.c.l.b16 %v1520_v40 }
 0x1b6   :  { %v1293_v7 = vunpack.c.l.b16 %v1521_v62  ;;  %v1345_v15 = vsel %vm1316_vm10, %v1344_v44, %v1343_v63  ;;  %v1066_v13 = vsel %vm2069_vm8, %v1064_v56, %v1065_v45  ;;  %v1067_v14 = vrot.slane %v1065_v45, 2 }
 0x1b7   :  { %v1294_v48 = vunpack.c.l.b16 %v1522_v49  ;;  %v1362_v52 = vpack.c.b16 %v1345_v15, %v1345_v15  ;;  %v1070_v50 = vrot.slane %v1068_v3, 2  ;;  %v1452_v55 = vrot.slane %v1066_v13, 9 }
 0x1b8   :  { %v1346_v53 = vrot.slane %v1293_v7, 7  ;;  %v1069_v54 = vsel %vm2069_vm8, %v1067_v14, %v1068_v3  ;;  %v1151_v5 = vmax.f32 %v1063_v32, %v1451_v8  ;;  %v771_v59 = vmax.f32 %v761_v42, %v762_v46 }
 0x1b9   :  { %v1348_v57 = vrot.slane %v1294_v48, 6  ;;  %1370 = vst [vmem:[%s2171_s6 + $0x8] sm:$0xf] %v1362_v52  ;;  %v1072_v21 = vsel %vm2069_vm8, %v1070_v50, %v1071_v61  ;;  %v1453_v17 = vrot.slane %v1069_v54, 9  ;;  %v1152_v4 = vmax.f32 %v1066_v13, %v1452_v55 }
 0x1ba   :  { %v1347_v63 = vsel %vm1301_vm3, %v1346_v53, %v1292_v20  ;;  %v1454_v2 = vrot.slane %v1072_v21, 9  ;;  %v1523_v6 = vpack.c.bf16 %v1151_v5, %v1151_v5  ;;  %v1073_v9 = vrot.slane %v1071_v61, 2 }
 0x1bb   :  { %v1153_v10 = vmax.f32 %v1069_v54, %v1453_v17  ;;  %v1349_v11 = vsel %vm1021_vm4, %v1348_v57, %v1347_v63  ;;  %v1019_v12 = vrot.slane %v771_v59, %v1969_v47  ;;  %v1524_v0 = vpack.c.bf16 %v1152_v4, %v1152_v4 }
 0x1bc   :  { %v1154_v16 = vmax.f32 %v1072_v21, %v1454_v2  ;;  %v1295_v18 = vunpack.c.l.b16 %v1523_v6 }
 0x1bd   :  { %v1525_v22 = vpack.c.bf16 %v1153_v10, %v1153_v10  ;;  %v1074_v24 = vrot.slane %v1019_v12, 7  ;;  %v1296_v19 = vunpack.c.l.b16 %v1524_v0 }
 0x1be   :  { %v1526_v36 = vpack.c.bf16 %v1154_v16, %v1154_v16  ;;  %v1350_v51 = vrot.slane %v1295_v18, 5 }
 0x1bf   :  { %v1297_v58 = vunpack.c.l.b16 %v1525_v22  ;;  %v1075_v1 = vsel %vm2069_vm8, %v1073_v9, %v1074_v24  ;;  %v1352_v27 = vrot.slane %v1296_v19, 4 }
 0x1c0   :  { %v1298_v23 = vunpack.c.l.b16 %v1526_v36  ;;  %v1351_v25 = vsel %vm1306_vm5, %v1350_v51, %v1349_v11  ;;  %v1455_v30 = vrot.slane %v1075_v1, 9 }
 0x1c1   :  { %v1354_v26 = vrot.slane %v1297_v58, 3  ;;  %v1353_v47 = vsel %vm227_vm9, %v1352_v27, %v1351_v25 }
 0x1c2   :  { %v1356_v31 = vrot.slane %v1298_v23, 2  ;;  %v1155_v29 = vmax.f32 %v1075_v1, %v1455_v30 }
 0x1c3   :  { %v1355_v34 = vsel %vm1311_vm6, %v1354_v26, %v1353_v47 }
 0x1c4   :  { %v1527_v35 = vpack.c.bf16 %v1155_v29, %v1155_v29  ;;  %v1357_v28 = vsel %vm1025_vm7, %v1356_v31, %v1355_v34 }
 0x1c6   :  { %v1299_v33 = vunpack.c.l.b16 %v1527_v35 }
 0x1c8   :  { %v1358_v39 = vrot.slane %v1299_v33, 1 }
 0x1ca   :  { %v1359_v60 = vsel %vm1316_vm10, %v1358_v39, %v1357_v28 }
 0x1cb   :  { %v1363_v37 = vpack.c.b16 %v1359_v60, %v1359_v60 }
 0x1cd   :  { %1371 = vst [vmem:[%s2171_s6 + $0xc] sm:$0xf] %v1363_v37 }
 0x1ce   :  { %1376 = vsyncpa [#allocation4], 1 }
 0x1cf   :  { %1377 = vsyncpa [#allocation6], 1 }
 0x1d0   :  { %1378 = vsyncpa [#allocation9], 1 }

// kernel: crnn_forward.7
= control target key start
LH: loop header
LB: loop body
LE: loop exit
PB: predicated region body
PF: predicated region fallthrough
CT: control target
= control target key end

     0   :  { %14 = vsyncpa [#allocation5], 0  ;;  %v2573_v2 = vmov 0   ;;  %v51_v22 = vlaneseq  ;;  %v2574_v23 = vmov 1983009808   ;;  %s3251_s0 = inlined_call_operand.vmem [shape: bf16[2,4,128], index: 0, kind: input, shape index: {}]   ;;  %s3252_s1 = inlined_call_operand.vmem [shape: bf16[2,128,192], index: 1, kind: input, shape index: {}]   ;;  %s3253_s2 = inlined_call_operand.vmem [shape: bf16[2,64,192], index: 2, kind: input, shape index: {}]   ;;  %s3254_s3 = inlined_call_operand.vmem [shape: f32[2,1,192], index: 3, kind: input, shape index: {}]   ;;  %s3255_s4 = inlined_call_operand.vmem [shape: f32[2,1,192], index: 4, kind: input, shape index: {}]   ;;  %s3256_s5 = inlined_call_operand.vmem [shape: bf16[128,8], index: 5, kind: input, shape index: {}]   ;;  %s3257_s6 = inlined_call_operand.vmem [shape: f32[1,8], index: 6, kind: input, shape index: {}]   ;;  %s3258_s7 = inlined_call_operand.hbm [shape: f32[2,4,8], index: 7, kind: output, shape index: {0}]   ;;  %s3259_s8 = inlined_call_operand.hbm [shape: f32[2,8], index: 8, kind: output, shape index: {1}]  }
   0x1   :  { %v2341_v0 = vld [vmem:[%s3252_s1 + $0x4] ss:$8 sps:$4 sm:$0xff]   ;;  %v2343_v1 = vld [vmem:[%s3252_s1] ss:$8 sps:$4 sm:$0xff]   ;;  %295 = vmatprep.mubr.bf16.mxu1 %v2573_v2  ;;  %184 = vmatprep.mubr.bf16.mxu0 %v2573_v2  ;;  %v2344_v3 = vld [vmem:[%s3252_s1 + $0x14] ss:$8 sps:$4 sm:$0xff]   ;;  %v65_v24 = vunpack.c.l.s4 %v2574_v23 }
   0x2   :  { %152 = vmatprep.subr.bf16.mxu0 %v2341_v0  ;;  %v2346_v4 = vld [vmem:[%s3252_s1 + $0x10] ss:$8 sps:$4 sm:$0xff]   ;;  %v2347_v5 = vld [vmem:[%s3252_s1 + $0x24] ss:$8 sps:$4 sm:$0xff]   ;;  %v2651_v7 = vld [vmem:[%s3253_s2] ss:$8 sps:$4 sm:$0xff]  }
   0x3   :  { %153 = vmatpush1.bf16.msra.mxu0 %v2343_v1  ;;  %v2646_v6 = vld [vmem:[%s3253_s2 + $0x4] ss:$8 sps:$4 sm:$0xff]   ;;  %v2349_v8 = vld [vmem:[%s3252_s1 + $0x20] ss:$8 sps:$4 sm:$0xff]   ;;  %v2350_v9 = vld [vmem:[%s3252_s1 + $0x34] ss:$8 sps:$4 sm:$0xff]   ;;  %v66_v30 = vunpack.c.0.s8 %v65_v24 }
   0x4   :  { %154 = vmatprep.subr.bf16.mxu0 %v2344_v3  ;;  %263 = vmatprep.subr.bf16.mxu1 %v2646_v6  ;;  %v2663_v10 = vld [vmem:[%s3253_s2 + $0x14] ss:$8 sps:$4 sm:$0xff]   ;;  %v2669_v11 = vld [vmem:[%s3253_s2 + $0x10] ss:$8 sps:$4 sm:$0xff]   ;;  %v2678_v13 = vld [vmem:[%s3253_s2 + $0x24] ss:$8 sps:$4 sm:$0xff]  }
   0x5   :  { %264 = vmatpush1.bf16.msra.mxu1 %v2651_v7  ;;  %v2352_v12 = vld [vmem:[%s3252_s1 + $0x30] ss:$8 sps:$4 sm:$0xff]   ;;  %v2356_v14 = vld [vmem:[%s3252_s1 + $0x44] ss:$8 sps:$4 sm:$0xff]   ;;  %v2687_v15 = vld [vmem:[%s3253_s2 + $0x20] ss:$8 sps:$4 sm:$0xff]  }
   0x6   :  { %265 = vmatprep.subr.bf16.mxu1 %v2663_v10  ;;  %v2693_v16 = vld [vmem:[%s3253_s2 + $0x34] ss:$8 sps:$4 sm:$0xff]   ;;  %v2358_v17 = vld [vmem:[%s3252_s1 + $0x40] ss:$8 sps:$4 sm:$0xff]   ;;  %v2704_v19 = vld [vmem:[%s3253_s2 + $0x30] ss:$8 sps:$4 sm:$0xff]  }
   0x7   :  { %155 = vmatpush1.bf16.msra.mxu0 %v2346_v4  ;;  %v2362_v18 = vld [vmem:[%s3252_s1 + $0x54] ss:$8 sps:$4 sm:$0xff]   ;;  %v2364_v20 = vld [vmem:[%s3252_s1 + $0x50] ss:$8 sps:$4 sm:$0xff]   ;;  %v2368_v21 = vld [vmem:[%s3252_s1 + $0x64] ss:$8 sps:$4 sm:$0xff]  }
   0x8   :  { %156 = vmatprep.subr.bf16.mxu0 %v2347_v5  ;;  %v2370_v25 = vld [vmem:[%s3252_s1 + $0x60] ss:$8 sps:$4 sm:$0xff]   ;;  %v2374_v28 = vld [vmem:[%s3252_s1 + $0x74] ss:$8 sps:$4 sm:$0xff]   ;;  %v52_v29 = vshrl.u32 %v51_v22, 7 }
   0x9   :  { %266 = vmatpush1.bf16.msra.mxu1 %v2669_v11  ;;  %v31_v26 = vld [vmem:[%s3251_s0] sm:$0x3]  ;;  %v32_v27 = vld [vmem:[%s3251_s0 + $0x2] sm:$0x3]  ;;  %v2376_v31 = vld [vmem:[%s3252_s1 + $0x70] ss:$8 sps:$4 sm:$0xff]  }
   0xa   :  { %267 = vmatprep.subr.bf16.mxu1 %v2678_v13  ;;  %v63_v32 = vcombine.low %v31_v26, %v32_v27  ;;  %v2734_v33 = vsub.s32 %v66_v30, %v52_v29 }
   0xb   :  { %157 = vmatpush1.bf16.msra.mxu0 %v2349_v8 }
   0xc   :  { %158 = vmatprep.subr.bf16.mxu0 %v2350_v9  ;;  %v2739_v34 = vrot.slane %v63_v32, %v2734_v33 }
   0xd   :  { %268 = vmatpush1.bf16.msra.mxu1 %v2687_v15 }
   0xe   :  { %269 = vmatprep.subr.bf16.mxu1 %v2693_v16 }
   0xf   :  { %159 = vmatpush1.bf16.msra.mxu0 %v2352_v12 }
  0x10   :  { %160 = vmatprep.subr.bf16.mxu0 %v2356_v14 }
  0x11   :  { %270 = vmatpush1.bf16.msra.mxu1 %v2704_v19 }
  0x12   :  { %456 = vmatprep.subr.bf16.mxu1 %v2646_v6 }
  0x13   :  { %161 = vmatpush1.bf16.msra.mxu0 %v2358_v17 }
  0x14   :  { %162 = vmatprep.subr.bf16.mxu0 %v2362_v18  ;;  %296 = vmatmul.mubr.bf16.vlgmr.msra.gmra.mrb[0].mxu1 %v2573_v2 }
  0x15   :  { %457 = vmatpush1.bf16.msra.mxu1 %v2651_v7  ;;  %488 = vmatprep.mubr.bf16.mxu1 %v2573_v2 }
  0x16   :  { %458 = vmatprep.subr.bf16.mxu1 %v2663_v10 }
  0x17   :  { %163 = vmatpush1.bf16.msra.mxu0 %v2364_v20 }
  0x18   :  { %164 = vmatprep.subr.bf16.mxu0 %v2368_v21 }
  0x19   :  { %459 = vmatpush1.bf16.msra.mxu1 %v2669_v11 }
  0x1a   :  { %460 = vmatprep.subr.bf16.mxu1 %v2678_v13 }
  0x1b   :  { %165 = vmatpush1.bf16.msra.mxu0 %v2370_v25 }
  0x1c   :  { %166 = vmatprep.subr.bf16.mxu0 %v2374_v28 }
  0x1d   :  { %15 = vsyncpa [#allocation7], 0  ;;  %461 = vmatpush1.bf16.msra.mxu1 %v2687_v15  ;;  %v2748_v35 = vsub.s32 0, %v52_v29  ;;  %v207_v37 = vld [vmem:[%s3255_s4] sm:$0x3]  ;;  %v2754_v42 = vsub.s32 1, %v52_v29 }
  0x1e   :  { %462 = vmatprep.subr.bf16.mxu1 %v2693_v16  ;;  %v49_v43 = vld [vmem:[%s3254_s3] sm:$0x3]  ;;  %s2575_s16 = smov 64   ;;  %vm408_vm0 = vcmask 1041409   ;;  %vm259_vm1 = vcmask 523264   ;;  %vm766_vm2 = vcmask 517121  }
  0x1f   :  { %167 = vmatpush1.bf16.msra.mxu0 %v2376_v31  ;;  %v212_v41 = vrot.slane %v207_v37, %v2748_v35  ;;  %v54_v44 = vrot.slane %v49_v43, %v2748_v35  ;;  %v58_v46 = vrot.slane %v49_v43, %v2754_v42  ;;  %v216_v0 = vrot.slane %v207_v37, %v2754_v42  ;;  %s2578_s26 = smov [#allocation4]  }
  0x20   :  { %vm963_vm3 = vsmask.f32 7942  ;;  %vm376_vm5 = vcmask 516096   ;;  %vm571_vm6 = vsmask.f32 7938  ;;  %vm2577_vm12 = vmmov 0  }
  0x21   :  { %463 = vmatpush1.bf16.msra.mxu1 %v2704_v19  ;;  %vm3106_vm4 = vmand %vm766_vm2, %vm963_vm3  ;;  %vm767_vm8 = vsmask.f32 1280  ;;  %vm377_vm10 = vsmask.f32 256  ;;  %vm2044_vm13 = vcmask 60416  }
  0x22   :  { %185 = vmatmul.mubr.bf16.vlgmr.msra.gmra.mrb[0].mxu0 %v2739_v34  ;;  %649 = vmatprep.subr.bf16.mxu1 %v2646_v6  ;;  %vm3113_vm7 = vmand %vm376_vm5, %vm571_vm6 }
  0x23   :  { %1113 = vmatprep.mubr.bf16.mxu0 %v2573_v2  ;;  %vm3135_vm9 = vmand %vm766_vm2, %vm767_vm8 }
  0x24   :  { %vm3187_vm11 = vmand %vm376_vm5, %vm377_vm10 }
  0xe7   :  { %v297_v36 = vpop.f32.mrb[0].mxu1 }
  0xe8   :  { %v299_v38 = vpop.f32.mrb[1].mxu1  ;;  %v298_v45 = vadd.f32 %v297_v36, %v212_v41 }
  0xe9   :  { %v301_v39 = vpop.f32.mrb[2].mxu1  ;;  %v300_v1 = vadd.f32 %v299_v38, %v216_v0 }
  0xea   :  { %v302_v40 = vpop.f32.mrb[3].mxu1  ;;  %v305_v50 = vrot.slane %v298_v45, 1 }
  0xeb   :  { %v323_v4 = vrot.slane %v300_v1, 1 }
  0xf5   :  { %v186_v47 = vpop.f32.mrb[0].mxu0 }
  0xf6   :  { %v187_v48 = vadd.f32 %v186_v47, %v54_v44  ;;  %v188_v49 = vpop.f32.mrb[1].mxu0  ;;  %v393_v44 = vld [vmem:[%s3255_s4] sm:$0x3] }
  0xf7   :  { %v189_v51 = vadd.f32 %v188_v49, %v58_v46  ;;  %v190_v52 = vpop.f32.mrb[2].mxu0 }
  0xf8   :  { %v191_v53 = vpop.f32.mrb[3].mxu0 }
  0xf9   :  { %v2761_v54 = vcombine.low %v187_v48, %v189_v51  ;;  %v2763_v55 = vcombine.high %v187_v48, %v189_v51 }
  0xfb   :  { %v308_v56 = vadd.f32 %v298_v45, %v2761_v54  ;;  %v309_v57 = vadd.f32 %v305_v50, %v2763_v55  ;;  %v2769_v9 = vrot.slane %v2763_v55, 4  ;;  %v2772_v14 = vrot.slane %v2761_v54, 4 }
  0xfc   :  { %v398_v45 = vrot.slane %v393_v44, %v2748_v35 }
  0xfd   :  { %v2141_v58 = vmul.f32 -1.442695, %v308_v56  ;;  %v2142_v59 = vmul.f32 -1.442695, %v309_v57 }
  0xff   :  { %2421 = vpow2.f32 %v2141_v58 }
 0x100   :  { %2423 = vpow2.f32 %v2142_v59 }
 0x109   :  { %v2422_v60 = vpop.eup %2421 }
 0x10a   :  { %v2424_v61 = vpop.eup %2423  ;;  %v316_v62 = vadd.f32 1.0, %v2422_v60 }
 0x10b   :  { %v317_v63 = vadd.f32 1.0, %v2424_v61  ;;  %v402_v61 = vrot.slane %v393_v44, %v2754_v42 }
 0x10c   :  { %2425 = vrcp.f32 %v316_v62 }
 0x10d   :  { %2427 = vrcp.f32 %v317_v63 }
 0x116   :  { %v2426_v3 = vpop.eup %2425 }
 0x117   :  { %v2428_v5 = vpop.eup %2427  ;;  %v326_v8 = vmul.f32 %v2426_v3, %v300_v1  ;;  %v336_v27 = vsub.f32 1.0, %v2426_v3  ;;  %v348_v30 = vmul.f32 0.0, %v2426_v3 }
 0x118   :  { %v327_v12 = vmul.f32 %v2428_v5, %v323_v4  ;;  %v337_v22 = vsub.f32 1.0, %v2428_v5  ;;  %v349_v24 = vmul.f32 0.0, %v2428_v5 }
 0x119   :  { %v332_v18 = vadd.f32 %v2772_v14, %v326_v8 }
 0x11a   :  { %v333_v17 = vadd.f32 %v2769_v9, %v327_v12 }
 0x11c   :  { %2429 = vtanh.f32 %v333_v17 }
 0x11d   :  { %2431 = vtanh.f32 %v332_v18 }
 0x126   :  { %v2430_v20 = vpop.eup %2429 }
 0x127   :  { %342 = vrot.lane.b32.xlu0 %v2430_v20, %s2575_s16  ;;  %v2432_v21 = vpop.eup %2431 }
 0x12b   :  { %340 = vrot.lane.b32.xlu0 %v2432_v21, %s2575_s16 }
 0x199   :  { %v343_v23 = vpop.permute.xlu0 %342 }
 0x19a   :  { %v347_v25 = vmul.f32 %v343_v23, %v337_v22 }
 0x19c   :  { %v351_v26 = vadd.f32 %v349_v24, %v347_v25 }
 0x19d   :  { %v341_v28 = vpop.permute.xlu0 %340 }
 0x19e   :  { %v2778_v29 = vpack.c.bf16 %v351_v26, %v351_v26  ;;  %v346_v31 = vmul.f32 %v341_v28, %v336_v27  ;;  %v540_v63 = vrot.slane %v351_v26, 7 }
 0x1a0   :  { %v406_v32 = vunpack.c.l.b16 %v2778_v29  ;;  %v350_v36 = vadd.f32 %v348_v30, %v346_v31 }
 0x1a2   :  { %v2781_v37 = vpack.c.bf16 %v350_v36, %v350_v36  ;;  %v407_v39 = vrot.slane %v406_v32, 7  ;;  %v539_v1 = vrot.slane %v350_v36, 7 }
 0x1a4   :  { %v405_v38 = vunpack.c.l.b16 %v2781_v37 }
 0x1a6   :  { %v409_v40 = vsel %vm408_vm0, %v407_v39, %v405_v38 }
 0x1a7   :  { %v410_v41 = vpack.c.b16 %v409_v40, %v409_v40 }
 0x1a9   :  { %411 = vrot.lane.b32.xlu1 %v410_v41, %s2575_s16 }
 0x21b   :  { %v412_v43 = vpop.permute.xlu1 %411 }
 0x21c   :  { %2151 = vmatmul.mubr.msk.bf16.vlgmr.msra.gmra.mrb[4].mxu1 %vm259_vm1, %v412_v43 }
 0x21d   :  { %650 = vmatpush1.bf16.msra.mxu1 %v2651_v7  ;;  %681 = vmatprep.mubr.bf16.mxu1 %v2573_v2 }
 0x21e   :  { %651 = vmatprep.subr.bf16.mxu1 %v2663_v10 }
 0x221   :  { %652 = vmatpush1.bf16.msra.mxu1 %v2669_v11 }
 0x222   :  { %653 = vmatprep.subr.bf16.mxu1 %v2678_v13 }
 0x225   :  { %654 = vmatpush1.bf16.msra.mxu1 %v2687_v15 }
 0x226   :  { %655 = vmatprep.subr.bf16.mxu1 %v2693_v16 }
 0x229   :  { %656 = vmatpush1.bf16.msra.mxu1 %v2704_v19 }
 0x22a   :  { %846 = vmatprep.subr.bf16.mxu1 %v2646_v6 }
 0x2ef   :  { %v490_v46 = vpop.f32.mrb[4].mxu1 }
 0x2f0   :  { %v491_v47 = vadd.f32 %v490_v46, %v398_v45  ;;  %v492_v48 = vpop.f32.mrb[5].mxu1  ;;  %v587_v45 = vld [vmem:[%s3255_s4] sm:$0x3] }
 0x2f1   :  { %v494_v49 = vpop.f32.mrb[6].mxu1  ;;  %v493_v62 = vadd.f32 %v492_v48, %v402_v61 }
 0x2f2   :  { %v498_v50 = vrot.slane %v491_v47, 7  ;;  %v502_v51 = vadd.f32 %v491_v47, %v2763_v55  ;;  %v495_v52 = vpop.f32.mrb[7].mxu1 }
 0x2f3   :  { %v516_v3 = vrot.slane %v493_v62, 7 }
 0x2f4   :  { %v501_v53 = vadd.f32 %v498_v50, %v2761_v54  ;;  %v2153_v56 = vmul.f32 -1.442695, %v502_v51 }
 0x2f6   :  { %v2152_v57 = vmul.f32 -1.442695, %v501_v53  ;;  %2433 = vpow2.f32 %v2153_v56 }
 0x2f8   :  { %2435 = vpow2.f32 %v2152_v57  ;;  %v596_v57 = vrot.slane %v587_v45, %v2754_v42 }
 0x300   :  { %v2434_v6 = vpop.eup %2433 }
 0x301   :  { %v510_v58 = vadd.f32 1.0, %v2434_v6 }
 0x302   :  { %v2436_v59 = vpop.eup %2435 }
 0x303   :  { %v509_v60 = vadd.f32 1.0, %v2436_v59  ;;  %2437 = vrcp.f32 %v510_v58 }
 0x305   :  { %2439 = vrcp.f32 %v509_v60 }
 0x30d   :  { %v2438_v0 = vpop.eup %2437 }
 0x30e   :  { %v520_v4 = vmul.f32 %v2438_v0, %v493_v62  ;;  %v544_v5 = vmul.f32 %v2438_v0, %v540_v63  ;;  %v526_v23 = vsub.f32 1.0, %v2438_v0 }
 0x30f   :  { %v2440_v8 = vpop.eup %2439 }
 0x310   :  { %v519_v12 = vmul.f32 %v2440_v8, %v516_v3  ;;  %v522_v17 = vadd.f32 %v520_v4, %v2769_v9  ;;  %v543_v18 = vmul.f32 %v2440_v8, %v539_v1  ;;  %v525_v26 = vsub.f32 1.0, %v2440_v8 }
 0x312   :  { %v521_v20 = vadd.f32 %v519_v12, %v2772_v14  ;;  %2441 = vtanh.f32 %v522_v17 }
 0x314   :  { %2443 = vtanh.f32 %v521_v20  ;;  %v2379_v20 = vld [vmem:[%s3252_s1 + $0x84] ss:$8 sps:$4 sm:$0xff]  }
 0x315   :  { %1081 = vmatprep.subr.bf16.mxu0 %v2379_v20 }
 0x31c   :  { %v2442_v21 = vpop.eup %2441 }
 0x31d   :  { %531 = vrot.lane.b32.xlu0 %v2442_v21, %s2575_s16  ;;  %v2382_v21 = vld [vmem:[%s3252_s1 + $0x94] ss:$8 sps:$4 sm:$0xff]  }
 0x31e   :  { %v2444_v22 = vpop.eup %2443 }
 0x31f   :  { %529 = vrot.lane.b32.xlu1 %v2444_v22, %s2575_s16  ;;  %v2380_v22 = vld [vmem:[%s3252_s1 + $0x90] ss:$8 sps:$4 sm:$0xff]  }
 0x38f   :  { %v532_v24 = vpop.permute.xlu0 %531 }
 0x390   :  { %v536_v25 = vmul.f32 %v532_v24, %v526_v23  ;;  %v2385_v23 = vld [vmem:[%s3252_s1 + $0xa4] ss:$8 sps:$4 sm:$0xff]  }
 0x391   :  { %v530_v27 = vpop.permute.xlu1 %529  ;;  %v2853_v24 = vld [vmem:[%s3253_s2 + $0x44] ss:$8 sps:$4 sm:$0xff]  }
 0x392   :  { %v546_v28 = vadd.f32 %v544_v5, %v536_v25  ;;  %v535_v30 = vmul.f32 %v530_v27, %v525_v26  ;;  %v2383_v25 = vld [vmem:[%s3252_s1 + $0xa0] ss:$8 sps:$4 sm:$0xff]   ;;  %v2388_v26 = vld [vmem:[%s3252_s1 + $0xb4] ss:$8 sps:$4 sm:$0xff]   ;;  %v2386_v27 = vld [vmem:[%s3252_s1 + $0xb0] ss:$8 sps:$4 sm:$0xff]  }
 0x394   :  { %v545_v31 = vadd.f32 %v543_v18, %v535_v30  ;;  %v2807_v32 = vpack.c.bf16 %v546_v28, %v546_v28  ;;  %v735_v61 = vrot.slane %v546_v28, 7  ;;  %v2377_v18 = vld [vmem:[%s3252_s1 + $0x80] ss:$8 sps:$4 sm:$0xff]   ;;  %v2391_v28 = vld [vmem:[%s3252_s1 + $0xc4] ss:$8 sps:$4 sm:$0xff]  }
 0x395   :  { %1082 = vmatpush1.bf16.msra.mxu0 %v2377_v18  ;;  %v2389_v30 = vld [vmem:[%s3252_s1 + $0xc0] ss:$8 sps:$4 sm:$0xff]  }
 0x396   :  { %v2809_v36 = vpack.c.bf16 %v545_v31, %v545_v31  ;;  %v600_v39 = vunpack.c.l.b16 %v2807_v32  ;;  %v734_v58 = vrot.slane %v545_v31, 7  ;;  %1083 = vmatprep.subr.bf16.mxu0 %v2382_v21  ;;  %v2394_v31 = vld [vmem:[%s3252_s1 + $0xd4] ss:$8 sps:$4 sm:$0xff]   ;;  %v783_v18 = vld [vmem:[%s3255_s4] sm:$0x3] }
 0x397   :  { %v788_v20 = vrot.slane %v783_v18, %v2748_v35 }
 0x398   :  { %v599_v38 = vunpack.c.l.b16 %v2809_v36 }
 0x399   :  { %1084 = vmatpush1.bf16.msra.mxu0 %v2380_v22 }
 0x39a   :  { %v601_v40 = vrot.slane %v599_v38, 1  ;;  %1085 = vmatprep.subr.bf16.mxu0 %v2385_v23  ;;  %v2392_v38 = vld [vmem:[%s3252_s1 + $0xd0] ss:$8 sps:$4 sm:$0xff]  }
 0x39c   :  { %v602_v41 = vsel %vm408_vm0, %v600_v39, %v601_v40 }
 0x39d   :  { %v603_v43 = vpack.c.b16 %v602_v41, %v602_v41  ;;  %1086 = vmatpush1.bf16.msra.mxu0 %v2383_v25 }
 0x39e   :  { %1087 = vmatprep.subr.bf16.mxu0 %v2388_v26 }
 0x39f   :  { %604 = vrot.lane.b32.xlu1 %v603_v43, %s2575_s16 }
 0x3a1   :  { %1088 = vmatpush1.bf16.msra.mxu0 %v2386_v27 }
 0x3a2   :  { %1089 = vmatprep.subr.bf16.mxu0 %v2391_v28 }
 0x3a5   :  { %1090 = vmatpush1.bf16.msra.mxu0 %v2389_v30 }
 0x3a6   :  { %1091 = vmatprep.subr.bf16.mxu0 %v2394_v31 }
 0x3a9   :  { %1092 = vmatpush1.bf16.msra.mxu0 %v2392_v38 }
 0x411   :  { %v605_v44 = vpop.permute.xlu1 %604 }
 0x412   :  { %2162 = vmatmul.mubr.msk.bf16.vlgmr.msra.gmra.mrb[8].mxu1 %vm259_vm1, %v605_v44 }
 0x413   :  { %847 = vmatpush1.bf16.msra.mxu1 %v2651_v7  ;;  %878 = vmatprep.mubr.bf16.mxu1 %v2573_v2  ;;  %v592_v7 = vrot.slane %v587_v45, %v2748_v35 }
 0x414   :  { %848 = vmatprep.subr.bf16.mxu1 %v2663_v10 }
 0x417   :  { %849 = vmatpush1.bf16.msra.mxu1 %v2669_v11 }
 0x418   :  { %850 = vmatprep.subr.bf16.mxu1 %v2678_v13 }
 0x41b   :  { %851 = vmatpush1.bf16.msra.mxu1 %v2687_v15 }
 0x41c   :  { %852 = vmatprep.subr.bf16.mxu1 %v2693_v16 }
 0x41f   :  { %853 = vmatpush1.bf16.msra.mxu1 %v2704_v19 }
 0x420   :  { %1190 = vmatprep.subr.bf16.mxu1 %v2853_v24 }
 0x4e5   :  { %v683_v46 = vpop.f32.mrb[8].mxu1 }
 0x4e6   :  { %v684_v47 = vadd.f32 %v683_v46, %v592_v7  ;;  %v685_v48 = vpop.f32.mrb[9].mxu1  ;;  %v2398_v46 = vld [vmem:[%s3252_s1 + $0xe0] ss:$8 sps:$4 sm:$0xff]  }
 0x4e7   :  { %v687_v10 = vpop.f32.mrb[10].mxu1  ;;  %v686_v6 = vadd.f32 %v685_v48, %v596_v57  ;;  %v2923_v57 = vld [vmem:[%s3253_s2 + $0x50] ss:$8 sps:$4 sm:$0xff]  }
 0x4e8   :  { %v691_v49 = vrot.slane %v684_v47, 6  ;;  %v692_v11 = vrot.slane %v684_v47, 7  ;;  %v688_v50 = vpop.f32.mrb[11].mxu1  ;;  %v2400_v47 = vld [vmem:[%s3252_s1 + $0xe4] ss:$8 sps:$4 sm:$0xff]  }
 0x4e9   :  { %v710_v59 = vrot.slane %v686_v6, 6  ;;  %v711_v62 = vrot.slane %v686_v6, 7  ;;  %1093 = vmatprep.subr.bf16.mxu0 %v2400_v47  ;;  %v2404_v50 = vld [vmem:[%s3252_s1 + $0xf0] ss:$8 sps:$4 sm:$0xff]   ;;  %v2928_v6 = vld [vmem:[%s3253_s2 + $0x64] ss:$8 sps:$4 sm:$0xff]  }
 0x4ea   :  { %v695_v13 = vadd.f32 %v691_v49, %v2761_v54  ;;  %v696_v15 = vadd.f32 %v692_v11, %v2763_v55  ;;  %1094 = vmatpush1.bf16.msra.mxu0 %v2398_v46 }
 0x4ec   :  { %v2163_v16 = vmul.f32 -1.442695, %v695_v13  ;;  %v2164_v51 = vmul.f32 -1.442695, %v696_v15  ;;  %v2406_v13 = vld [vmem:[%s3252_s1 + $0xf4] ss:$8 sps:$4 sm:$0xff]  }
 0x4ed   :  { %1095 = vmatprep.subr.bf16.mxu0 %v2406_v13 }
 0x4ee   :  { %2445 = vpow2.f32 %v2163_v16  ;;  %1096 = vmatpush1.bf16.msra.mxu0 %v2404_v50 }
 0x4ef   :  { %2447 = vpow2.f32 %v2164_v51  ;;  %1578 = vmatprep.subr.bf16.mxu0 %v2853_v24 }
 0x4f1   :  { %1114 = vmatmul.mubr.bf16.vlgmr.msra.gmra.mrb[4].mxu0 %v2739_v34  ;;  %v2935_v34 = vld [vmem:[%s3253_s2 + $0x60] ss:$8 sps:$4 sm:$0xff]  }
 0x4f2   :  { %1610 = vmatprep.mubr.bf16.mxu0 %v2573_v2 }
 0x4f8   :  { %v2446_v19 = vpop.eup %2445 }
 0x4f9   :  { %v2448_v52 = vpop.eup %2447  ;;  %v703_v53 = vadd.f32 1.0, %v2446_v19 }
 0x4fa   :  { %v704_v56 = vadd.f32 1.0, %v2448_v52  ;;  %v2908_v52 = vld [vmem:[%s3253_s2 + $0x40] ss:$8 sps:$4 sm:$0xff]  }
 0x4fb   :  { %2449 = vrcp.f32 %v703_v53  ;;  %1579 = vmatpush1.bf16.msra.mxu0 %v2908_v52 }
 0x4fc   :  { %2451 = vrcp.f32 %v704_v56  ;;  %v2913_v56 = vld [vmem:[%s3253_s2 + $0x54] ss:$8 sps:$4 sm:$0xff]  }
 0x4fd   :  { %1580 = vmatprep.subr.bf16.mxu0 %v2913_v56 }
 0x4ff   :  { %1581 = vmatpush1.bf16.msra.mxu0 %v2923_v57 }
 0x500   :  { %1582 = vmatprep.subr.bf16.mxu0 %v2928_v6 }
 0x503   :  { %1583 = vmatpush1.bf16.msra.mxu0 %v2935_v34 }
 0x505   :  { %v2450_v60 = vpop.eup %2449 }
 0x506   :  { %v2452_v63 = vpop.eup %2451  ;;  %v714_v0 = vmul.f32 %v2450_v60, %v710_v59  ;;  %v738_v1 = vmul.f32 %v2450_v60, %v734_v58  ;;  %v720_v39 = vsub.f32 1.0, %v2450_v60  ;;  %v2940_v58 = vld [vmem:[%s3253_s2 + $0x74] ss:$8 sps:$4 sm:$0xff]   ;;  %v2947_v59 = vld [vmem:[%s3253_s2 + $0x70] ss:$8 sps:$4 sm:$0xff]  }
 0x507   :  { %v715_v3 = vmul.f32 %v2452_v63, %v711_v62  ;;  %v739_v4 = vmul.f32 %v2452_v63, %v735_v61  ;;  %v721_v40 = vsub.f32 1.0, %v2452_v63  ;;  %1584 = vmatprep.subr.bf16.mxu0 %v2940_v58  ;;  %v2192_v62 = vld [vmem:[%s3254_s3 + $0x2] sm:$0x3]  ;;  %s2092_s3 = sshll.u32 %s2578_s26, 4  ;;  %s2093_s3 = int_to_ptr.vmem [resolvable:$true] %s2092_s3 }
 0x508   :  { %v716_v5 = vadd.f32 %v714_v0, %v2772_v14  ;;  %1585 = vmatpush1.bf16.msra.mxu0 %v2947_v59  ;;  %v994_v0 = vrot.slane %v2192_v62, %v2748_v35  ;;  %p2530_p1 = scmp.lt.s32.totalorder %s2093_s3, %s2093_s3 }
 0x509   :  { %v717_v8 = vadd.f32 %v715_v3, %v2769_v9 }
 0x50a   :  { %2453 = vtanh.f32 %v716_v5 }
 0x50b   :  { %2455 = vtanh.f32 %v717_v8 }
 0x514   :  { %v2454_v12 = vpop.eup %2453 }
 0x515   :  { %v2456_v17 = vpop.eup %2455  ;;  %724 = vrot.lane.b32.xlu0 %v2454_v12, %s2575_s16 }
 0x516   :  { %726 = vrot.lane.b32.xlu1 %v2456_v17, %s2575_s16 }
 0x587   :  { %v725_v41 = vpop.permute.xlu0 %724 }
 0x588   :  { %v727_v43 = vpop.permute.xlu1 %726  ;;  %v730_v44 = vmul.f32 %v725_v41, %v720_v39  ;;  %v2217_v39 = vld [vmem:[%s3255_s4 + $0x2] sm:$0x3] }
 0x589   :  { %v731_v45 = vmul.f32 %v727_v43, %v721_v40  ;;  %v1143_v40 = vrot.slane %v2217_v39, %v2748_v35 }
 0x58a   :  { %v2877_v7 = vadd.f32 %v738_v1, %v730_v44  ;;  %v998_v1 = vrot.slane %v2192_v62, %v2754_v42 }
 0x58b   :  { %v2885_v48 = vadd.f32 %v739_v4, %v731_v45 }
 0x58c   :  { %v2889_v10 = vpack.c.bf16 %v2877_v7, %v2877_v7 }
 0x58d   :  { %v2893_v49 = vpack.c.bf16 %v2885_v48, %v2885_v48 }
 0x58e   :  { %v795_v11 = vunpack.c.l.b16 %v2889_v10 }
 0x58f   :  { %v796_v15 = vunpack.c.l.b16 %v2893_v49 }
 0x590   :  { %v797_v16 = vrot.slane %v795_v11, 2 }
 0x591   :  { %v798_v51 = vrot.slane %v796_v15, 1 }
 0x593   :  { %v799_v19 = vsel %vm408_vm0, %v798_v51, %v797_v16  ;;  %v792_v51 = vrot.slane %v783_v18, %v2754_v42 }
 0x594   :  { %v800_v53 = vpack.c.b16 %v799_v19, %v799_v19 }
 0x596   :  { %801 = vrot.lane.b32.xlu0 %v800_v53, %s2575_s16 }
 0x5c4   :  { %v1115_v61 = vpop.f32.mrb[4].mxu0 }
 0x5c5   :  { %v1117_v63 = vpop.f32.mrb[5].mxu0  ;;  %v1116_v5 = vadd.f32 %v1115_v61, %v994_v0  ;;  %v931_v61 = vrot.slane %v2877_v7, 7  ;;  %v932_v0 = vrot.slane %v2885_v48, 7  ;;  %v1147_v48 = vrot.slane %v2217_v39, %v2754_v42 }
 0x5c6   :  { %v1119_v3 = vpop.f32.mrb[6].mxu0  ;;  %v1118_v8 = vadd.f32 %v1117_v63, %v998_v1 }
 0x5c7   :  { %v1120_v4 = vpop.f32.mrb[7].mxu0 }
 0x5c8   :  { %v2975_v12 = vcombine.low %v1116_v5, %v1118_v8  ;;  %v2977_v17 = vcombine.high %v1116_v5, %v1118_v8 }
 0x608   :  { %v802_v60 = vpop.permute.xlu0 %801 }
 0x609   :  { %2173 = vmatmul.mubr.msk.bf16.vlgmr.msra.gmra.mrb[12].mxu1 %vm259_vm1, %v802_v60 }
 0x60a   :  { %1191 = vmatpush1.bf16.msra.mxu1 %v2908_v52  ;;  %1222 = vmatprep.mubr.bf16.mxu1 %v2573_v2 }
 0x60b   :  { %1192 = vmatprep.subr.bf16.mxu1 %v2913_v56 }
 0x60e   :  { %1193 = vmatpush1.bf16.msra.mxu1 %v2923_v57 }
 0x60f   :  { %1194 = vmatprep.subr.bf16.mxu1 %v2928_v6 }
 0x612   :  { %1195 = vmatpush1.bf16.msra.mxu1 %v2935_v34 }
 0x613   :  { %1196 = vmatprep.subr.bf16.mxu1 %v2940_v58 }
 0x616   :  { %1197 = vmatpush1.bf16.msra.mxu1 %v2947_v59 }
 0x617   :  { %1382 = vmatprep.subr.bf16.mxu1 %v2853_v24 }
 0x619   :  { %1223 = vmatmul.mubr.bf16.vlgmr.msra.gmra.mrb[16].mxu1 %v2573_v2 }
 0x61a   :  { %1383 = vmatpush1.bf16.msra.mxu1 %v2908_v52  ;;  %1414 = vmatprep.mubr.bf16.mxu1 %v2573_v2 }
 0x61b   :  { %1384 = vmatprep.subr.bf16.mxu1 %v2913_v56 }
 0x61e   :  { %1385 = vmatpush1.bf16.msra.mxu1 %v2923_v57 }
 0x61f   :  { %1386 = vmatprep.subr.bf16.mxu1 %v2928_v6 }
 0x622   :  { %1387 = vmatpush1.bf16.msra.mxu1 %v2935_v34 }
 0x623   :  { %1388 = vmatprep.subr.bf16.mxu1 %v2940_v58 }
 0x626   :  { %1389 = vmatpush1.bf16.msra.mxu1 %v2947_v59 }
 0x627   :  { %1771 = vmatprep.subr.bf16.mxu1 %v2853_v24 }
 0x6dc   :  { %v880_v21 = vpop.f32.mrb[12].mxu1 }
 0x6dd   :  { %v881_v22 = vadd.f32 %v880_v21, %v788_v20  ;;  %v882_v23 = vpop.f32.mrb[13].mxu1 }
 0x6de   :  { %v884_v24 = vpop.f32.mrb[14].mxu1  ;;  %v883_v60 = vadd.f32 %v882_v23, %v792_v51 }
 0x6df   :  { %v888_v25 = vrot.slane %v881_v22, 5  ;;  %v889_v26 = vrot.slane %v881_v22, 6  ;;  %v885_v27 = vpop.f32.mrb[15].mxu1 }
 0x6e0   :  { %v907_v62 = vrot.slane %v883_v60, 5  ;;  %v908_v1 = vrot.slane %v883_v60, 6 }
 0x6e1   :  { %v892_v28 = vadd.f32 %v888_v25, %v2761_v54  ;;  %v893_v30 = vadd.f32 %v889_v26, %v2763_v55 }
 0x6e3   :  { %v2174_v31 = vmul.f32 -1.442695, %v892_v28  ;;  %v2175_v38 = vmul.f32 -1.442695, %v893_v30  ;;  %v3012_v30 = vrot.slane %v2975_v12, 4 }
 0x6e5   :  { %2457 = vpow2.f32 %v2174_v31 }
 0x6e6   :  { %2459 = vpow2.f32 %v2175_v38  ;;  %v3015_v38 = vrot.slane %v2977_v17, 4 }
 0x6ec   :  { %v1224_v41 = vpop.f32.mrb[16].mxu1 }
 0x6ed   :  { %v1225_v43 = vadd.f32 %v1224_v41, %v1143_v40  ;;  %v1226_v44 = vpop.f32.mrb[17].mxu1 }
 0x6ee   :  { %v1228_v45 = vpop.f32.mrb[18].mxu1  ;;  %v1227_v23 = vadd.f32 %v1226_v44, %v1147_v48 }
 0x6ef   :  { %v2458_v46 = vpop.eup %2457  ;;  %v1232_v47 = vrot.slane %v1225_v43, 5  ;;  %v1233_v11 = vrot.slane %v1225_v43, 6  ;;  %v1229_v54 = vpop.f32.mrb[19].mxu1 }
 0x6f0   :  { %v2460_v50 = vpop.eup %2459  ;;  %v900_v55 = vadd.f32 1.0, %v2458_v46  ;;  %v1251_v24 = vrot.slane %v1227_v23, 5  ;;  %v1252_v26 = vrot.slane %v1227_v23, 6 }
 0x6f1   :  { %v901_v13 = vadd.f32 1.0, %v2460_v50  ;;  %v1236_v15 = vadd.f32 %v1232_v47, %v2975_v12  ;;  %v1237_v16 = vadd.f32 %v1233_v11, %v2977_v17 }
 0x6f2   :  { %2461 = vrcp.f32 %v900_v55 }
 0x6f3   :  { %2463 = vrcp.f32 %v901_v13  ;;  %v2226_v19 = vmul.f32 -1.442695, %v1236_v15  ;;  %v2227_v53 = vmul.f32 -1.442695, %v1237_v16 }
 0x6f5   :  { %2465 = vpow2.f32 %v2226_v19 }
 0x6f6   :  { %2467 = vpow2.f32 %v2227_v53 }
 0x6fc   :  { %v2993_v63 = vpop.eup %2461 }
 0x6fd   :  { %v2996_v3 = vpop.eup %2463  ;;  %v2999_v4 = vmul.f32 %v2993_v63, %v907_v62  ;;  %v3002_v5 = vmul.f32 %v2993_v63, %v931_v61 }
 0x6fe   :  { %v3005_v8 = vmul.f32 %v2996_v3, %v908_v1  ;;  %v3008_v18 = vmul.f32 %v2996_v3, %v932_v0 }
 0x6ff   :  { %v2466_v7 = vpop.eup %2465 }
 0x700   :  { %v2468_v20 = vpop.eup %2467  ;;  %v1244_v21 = vadd.f32 1.0, %v2466_v7  ;;  %v2236_v7 = vld [vmem:[%s3255_s4 + $0x2] sm:$0x3] }
 0x701   :  { %v1245_v22 = vadd.f32 1.0, %v2468_v20 }
 0x702   :  { %2469 = vrcp.f32 %v1244_v21 }
 0x703   :  { %2471 = vrcp.f32 %v1245_v22 }
 0x70c   :  { %v2470_v25 = vpop.eup %2469 }
 0x70d   :  { %v2472_v27 = vpop.eup %2471  ;;  %v1255_v28 = vmul.f32 %v2470_v25, %v1251_v24  ;;  %v1265_v44 = vsub.f32 1.0, %v2470_v25  ;;  %v1277_v11 = vmul.f32 0.0, %v2470_v25 }
 0x70e   :  { %v1256_v31 = vmul.f32 %v2472_v27, %v1252_v26  ;;  %v1266_v45 = vsub.f32 1.0, %v2472_v27  ;;  %v1278_v50 = vmul.f32 0.0, %v2472_v27  ;;  %v1328_v27 = vrot.slane %v2236_v7, %v2754_v42 }
 0x70f   :  { %v1261_v40 = vadd.f32 %v3012_v30, %v1255_v28 }
 0x710   :  { %v1262_v41 = vadd.f32 %v3015_v38, %v1256_v31 }
 0x711   :  { %2473 = vtanh.f32 %v1261_v40 }
 0x712   :  { %2475 = vtanh.f32 %v1262_v41 }
 0x71b   :  { %v2474_v39 = vpop.eup %2473 }
 0x71c   :  { %v2476_v43 = vpop.eup %2475  ;;  %1269 = vrot.lane.b32.xlu1 %v2474_v39, %s2575_s16 }
 0x71d   :  { %1271 = vrot.lane.b32.xlu0 %v2476_v43, %s2575_s16 }
 0x78e   :  { %v1270_v46 = vpop.permute.xlu1 %1269 }
 0x78f   :  { %v1272_v47 = vpop.permute.xlu0 %1271  ;;  %v1275_v54 = vmul.f32 %v1270_v46, %v1265_v44 }
 0x790   :  { %v1276_v55 = vmul.f32 %v1272_v47, %v1266_v45 }
 0x791   :  { %v1279_v13 = vadd.f32 %v1277_v11, %v1275_v54 }
 0x792   :  { %v1280_v15 = vadd.f32 %v1278_v50, %v1276_v55 }
 0x793   :  { %v3021_v16 = vpack.c.bf16 %v1279_v13, %v1279_v13  ;;  %v2248_v31 = vrot.slane %v1279_v13, 9 }
 0x794   :  { %v3023_v51 = vpack.c.bf16 %v1280_v15, %v1280_v15  ;;  %v2249_v39 = vrot.slane %v1280_v15, 9 }
 0x795   :  { %v1331_v19 = vunpack.c.l.b16 %v3021_v16 }
 0x796   :  { %v1332_v53 = vunpack.c.l.b16 %v3023_v51 }
 0x797   :  { %v1333_v60 = vrot.slane %v1331_v19, 3 }
 0x798   :  { %v1334_v61 = vrot.slane %v1332_v53, 2 }
 0x79a   :  { %v1335_v62 = vsel %vm408_vm0, %v1334_v61, %v1333_v60 }
 0x79b   :  { %v1336_v0 = vpack.c.b16 %v1335_v62, %v1335_v62 }
 0x79d   :  { %1337 = vrot.lane.b32.xlu1 %v1336_v0, %s2575_s16 }
 0x80f   :  { %v1338_v1 = vpop.permute.xlu1 %1337 }
 0x810   :  { %2245 = vmatmul.mubr.msk.bf16.vlgmr.msra.gmra.mrb[20].mxu1 %vm259_vm1, %v1338_v1 }
 0x811   :  { %1772 = vmatpush1.bf16.msra.mxu1 %v2908_v52  ;;  %1803 = vmatprep.mubr.bf16.mxu1 %v2573_v2  ;;  %v1324_v52 = vrot.slane %v2236_v7, %v2748_v35 }
 0x812   :  { %1773 = vmatprep.subr.bf16.mxu1 %v2913_v56 }
 0x815   :  { %1774 = vmatpush1.bf16.msra.mxu1 %v2923_v57 }
 0x816   :  { %1775 = vmatprep.subr.bf16.mxu1 %v2928_v6 }
 0x819   :  { %1776 = vmatpush1.bf16.msra.mxu1 %v2935_v34 }
 0x81a   :  { %1777 = vmatprep.subr.bf16.mxu1 %v2940_v58 }
 0x81d   :  { %1778 = vmatpush1.bf16.msra.mxu1 %v2947_v59 }
 0x8e3   :  { %v1416_v20 = vpop.f32.mrb[20].mxu1 }
 0x8e4   :  { %v1417_v2 = vadd.f32 %v1416_v20, %v1324_v52  ;;  %v1418_v21 = vpop.f32.mrb[21].mxu1 }
 0x8e5   :  { %v1420_v56 = vpop.f32.mrb[22].mxu1  ;;  %v1419_v28 = vadd.f32 %v1418_v21, %v1328_v27 }
 0x8e6   :  { %v1424_v22 = vrot.slane %v1417_v2, 6  ;;  %v1425_v57 = vrot.slane %v1417_v2, 7  ;;  %v1421_v48 = vpop.f32.mrb[23].mxu1 }
 0x8e7   :  { %v1443_v40 = vrot.slane %v1419_v28, 6  ;;  %v1444_v43 = vrot.slane %v1419_v28, 7 }
 0x8e8   :  { %v1428_v6 = vadd.f32 %v1424_v22, %v2975_v12  ;;  %v1429_v34 = vadd.f32 %v1425_v57, %v2977_v17 }
 0x8ea   :  { %v2246_v58 = vmul.f32 -1.442695, %v1428_v6  ;;  %v2247_v23 = vmul.f32 -1.442695, %v1429_v34  ;;  %v2258_v6 = vld [vmem:[%s3255_s4 + $0x2] sm:$0x3] }
 0x8eb   :  { %v1520_v34 = vrot.slane %v2258_v6, %v2748_v35 }
 0x8ec   :  { %2477 = vpow2.f32 %v2246_v58 }
 0x8ed   :  { %2479 = vpow2.f32 %v2247_v23 }
 0x8f6   :  { %v2478_v59 = vpop.eup %2477 }
 0x8f7   :  { %v2480_v24 = vpop.eup %2479  ;;  %v1436_v25 = vadd.f32 1.0, %v2478_v59 }
 0x8f8   :  { %v1437_v26 = vadd.f32 1.0, %v2480_v24 }
 0x8f9   :  { %2481 = vrcp.f32 %v1436_v25 }
 0x8fa   :  { %2483 = vrcp.f32 %v1437_v26 }
 0x903   :  { %v2482_v41 = vpop.eup %2481 }
 0x904   :  { %v2484_v44 = vpop.eup %2483  ;;  %v1447_v45 = vmul.f32 %v2482_v41, %v1443_v40  ;;  %v1473_v46 = vmul.f32 %v2482_v41, %v2248_v31  ;;  %v1453_v13 = vsub.f32 1.0, %v2482_v41 }
 0x905   :  { %v1448_v47 = vmul.f32 %v2484_v44, %v1444_v43  ;;  %v1474_v11 = vmul.f32 %v2484_v44, %v2249_v39  ;;  %v1454_v15 = vsub.f32 1.0, %v2484_v44 }
 0x906   :  { %v1449_v54 = vadd.f32 %v1447_v45, %v3012_v30  ;;  %v1524_v45 = vrot.slane %v2258_v6, %v2754_v42 }
 0x907   :  { %v1450_v50 = vadd.f32 %v1448_v47, %v3015_v38 }
 0x908   :  { %2485 = vtanh.f32 %v1449_v54 }
 0x909   :  { %2487 = vtanh.f32 %v1450_v50 }
 0x912   :  { %v2486_v55 = vpop.eup %2485 }
 0x913   :  { %v2488_v19 = vpop.eup %2487  ;;  %1457 = vrot.lane.b32.xlu0 %v2486_v55, %s2575_s16 }
 0x914   :  { %1459 = vrot.lane.b32.xlu1 %v2488_v19, %s2575_s16 }
 0x985   :  { %v1458_v53 = vpop.permute.xlu0 %1457 }
 0x986   :  { %v1460_v60 = vpop.permute.xlu1 %1459  ;;  %v1463_v61 = vmul.f32 %v1458_v53, %v1453_v13 }
 0x987   :  { %v1464_v62 = vmul.f32 %v1460_v60, %v1454_v15 }
 0x988   :  { %v1475_v0 = vadd.f32 %v1473_v46, %v1463_v61 }
 0x989   :  { %v1476_v1 = vadd.f32 %v1474_v11, %v1464_v62 }
 0x98a   :  { %v3049_v7 = vpack.c.bf16 %v1475_v0, %v1475_v0  ;;  %v2270_v54 = vrot.slane %v1475_v0, 9 }
 0x98b   :  { %v3051_v52 = vpack.c.bf16 %v1476_v1, %v1476_v1  ;;  %v2271_v47 = vrot.slane %v1476_v1, 9 }
 0x98c   :  { %v1527_v20 = vunpack.c.l.b16 %v3049_v7 }
 0x98d   :  { %v1528_v2 = vunpack.c.l.b16 %v3051_v52 }
 0x98e   :  { %v1529_v21 = vrot.slane %v1527_v20, 2 }
 0x98f   :  { %v1530_v56 = vrot.slane %v1528_v2, 1 }
 0x991   :  { %v1531_v22 = vsel %vm408_vm0, %v1530_v56, %v1529_v21 }
 0x992   :  { %v1532_v57 = vpack.c.b16 %v1531_v22, %v1531_v22 }
 0x994   :  { %1533 = vrot.lane.b32.xlu0 %v1532_v57, %s2575_s16 }
 0xa06   :  { %v1534_v48 = vpop.permute.xlu0 %1533 }
 0xa07   :  { %2267 = vmatmul.mubr.msk.bf16.vlgmr.msra.gmra.mrb[8].mxu0 %vm259_vm1, %v1534_v48 }
 0xada   :  { %v1612_v58 = vpop.f32.mrb[8].mxu0 }
 0xadb   :  { %v1613_v23 = vadd.f32 %v1612_v58, %v1520_v34  ;;  %v1614_v59 = vpop.f32.mrb[9].mxu0 }
 0xadc   :  { %v1616_v24 = vpop.f32.mrb[10].mxu0  ;;  %v1615_v46 = vadd.f32 %v1614_v59, %v1524_v45 }
 0xadd   :  { %v1620_v25 = vrot.slane %v1613_v23, 7  ;;  %v1624_v26 = vadd.f32 %v1613_v23, %v2977_v17  ;;  %v1617_v27 = vpop.f32.mrb[11].mxu0 }
 0xade   :  { %v1638_v50 = vrot.slane %v1615_v46, 7  ;;  %v2280_v27 = vld [vmem:[%s3255_s4 + $0x2] sm:$0x3] }
 0xadf   :  { %v1623_v28 = vadd.f32 %v1620_v25, %v2975_v12  ;;  %v2269_v31 = vmul.f32 -1.442695, %v1624_v26 }
 0xae1   :  { %v2268_v40 = vmul.f32 -1.442695, %v1623_v28  ;;  %2489 = vpow2.f32 %v2269_v31  ;;  %v1714_v28 = vrot.slane %v2280_v27, %v2748_v35  ;;  %v1718_v35 = vrot.slane %v2280_v27, %v2754_v42 }
 0xae3   :  { %2491 = vpow2.f32 %v2268_v40 }
 0xaeb   :  { %v2490_v41 = vpop.eup %2489 }
 0xaec   :  { %v1632_v39 = vadd.f32 1.0, %v2490_v41 }
 0xaed   :  { %v2492_v43 = vpop.eup %2491 }
 0xaee   :  { %v1631_v44 = vadd.f32 1.0, %v2492_v43  ;;  %2493 = vrcp.f32 %v1632_v39 }
 0xaf0   :  { %2495 = vrcp.f32 %v1631_v44 }
 0xaf8   :  { %v2494_v11 = vpop.eup %2493 }
 0xaf9   :  { %v1642_v55 = vmul.f32 %v2494_v11, %v1615_v46  ;;  %v1668_v19 = vmul.f32 %v2494_v11, %v2271_v47  ;;  %v1648_v1 = vsub.f32 1.0, %v2494_v11 }
 0xafa   :  { %v2496_v13 = vpop.eup %2495 }
 0xafb   :  { %v1641_v15 = vmul.f32 %v2496_v13, %v1638_v50  ;;  %v1644_v53 = vadd.f32 %v1642_v55, %v3015_v38  ;;  %v1667_v60 = vmul.f32 %v2496_v13, %v2270_v54  ;;  %v1647_v21 = vsub.f32 1.0, %v2496_v13 }
 0xafd   :  { %v1643_v61 = vadd.f32 %v1641_v15, %v3012_v30  ;;  %2497 = vtanh.f32 %v1644_v53 }
 0xaff   :  { %2499 = vtanh.f32 %v1643_v61 }
 0xb07   :  { %v2498_v62 = vpop.eup %2497 }
 0xb08   :  { %1653 = vrot.lane.b32.xlu0 %v2498_v62, %s2575_s16 }
 0xb09   :  { %v2500_v20 = vpop.eup %2499 }
 0xb0a   :  { %1651 = vrot.lane.b32.xlu1 %v2500_v20, %s2575_s16 }
 0xb7a   :  { %v1654_v0 = vpop.permute.xlu0 %1653 }
 0xb7b   :  { %v1658_v2 = vmul.f32 %v1654_v0, %v1648_v1 }
 0xb7c   :  { %v1652_v56 = vpop.permute.xlu1 %1651 }
 0xb7d   :  { %v1670_v22 = vadd.f32 %v1668_v19, %v1658_v2  ;;  %v1657_v57 = vmul.f32 %v1652_v56, %v1647_v21  ;;  %v913_v21 = vadd.f32 %v2999_v4, %v2772_v14  ;;  %v914_v56 = vadd.f32 %v3005_v8, %v2769_v9 }
 0xb7f   :  { %v1669_v48 = vadd.f32 %v1667_v60, %v1657_v57  ;;  %v1672_v6 = vpack.c.bf16 %v1670_v22, %v1670_v22  ;;  %v2293_v60 = vrot.slane %v1670_v22, 9 }
 0xb81   :  { %v1671_v34 = vpack.c.bf16 %v1669_v48, %v1669_v48  ;;  %v1722_v23 = vunpack.c.l.b16 %v1672_v6  ;;  %v2292_v15 = vrot.slane %v1669_v48, 9  ;;  %v1688_v9 = vrot.slane %v1672_v6, %v2734_v33 }
 0xb83   :  { %v1721_v58 = vunpack.c.l.b16 %v1671_v34  ;;  %v1681_v14 = vrot.slane %v1671_v34, %v2734_v33 }
 0xb85   :  { %v1723_v59 = vrot.slane %v1721_v58, 1 }
 0xb87   :  { %v1724_v24 = vsel %vm408_vm0, %v1722_v23, %v1723_v59 }
 0xb88   :  { %v1725_v25 = vpack.c.b16 %v1724_v24, %v1724_v24 }
 0xb8a   :  { %1726 = vrot.lane.b32.xlu1 %v1725_v25, %s2575_s16  ;;  %v1308_v25 = vld [vmem:[#allocation3 + $0x2] sm:$0x2] }
 0xbfc   :  { %v1727_v26 = vpop.permute.xlu1 %1726 }
 0xbfd   :  { %2289 = vmatmul.mubr.msk.bf16.vlgmr.msra.gmra.mrb[24].mxu1 %vm259_vm1, %v1727_v26 }
 0xcd0   :  { %v1805_v31 = vpop.f32.mrb[24].mxu1 }
 0xcd1   :  { %v1806_v40 = vadd.f32 %v1805_v31, %v1714_v28  ;;  %v1807_v41 = vpop.f32.mrb[25].mxu1 }
 0xcd2   :  { %v1809_v39 = vpop.f32.mrb[26].mxu1  ;;  %v1808_v13 = vadd.f32 %v1807_v41, %v1718_v35  ;;  %v1695_v41 = vld [vmem:[#allocation3] sm:$0x1] }
 0xcd3   :  { %v1813_v43 = vrot.slane %v1806_v40, 1  ;;  %v1816_v44 = vadd.f32 %v1806_v40, %v2975_v12  ;;  %v1810_v45 = vpop.f32.mrb[27].mxu1 }
 0xcd4   :  { %v1831_v12 = vrot.slane %v1808_v13, 1 }
 0xcd5   :  { %v1817_v46 = vadd.f32 %v1813_v43, %v2977_v17  ;;  %v2290_v47 = vmul.f32 -1.442695, %v1816_v44 }
 0xcd7   :  { %2501 = vpow2.f32 %v2290_v47  ;;  %v2291_v11 = vmul.f32 -1.442695, %v1817_v46  ;;  %v1698_v46 = vld [vmem:[#allocation3 + $0x2] sm:$0x1] }
 0xcd9   :  { %2503 = vpow2.f32 %v2291_v11 }
 0xce1   :  { %v2502_v54 = vpop.eup %2501 }
 0xce2   :  { %v1824_v50 = vadd.f32 1.0, %v2502_v54 }
 0xce3   :  { %v2504_v55 = vpop.eup %2503 }
 0xce4   :  { %v1825_v19 = vadd.f32 1.0, %v2504_v55  ;;  %2505 = vrcp.f32 %v1824_v50  ;;  %v917_v55 = vsub.f32 1.0, %v2993_v63 }
 0xce6   :  { %2507 = vrcp.f32 %v1825_v19  ;;  %v362_v19 = vrot.slane %v2781_v37, %v2734_v33 }
 0xcee   :  { %v2506_v53 = vpop.eup %2505 }
 0xcef   :  { %v1834_v61 = vmul.f32 %v2506_v53, %v1808_v13  ;;  %v1860_v62 = vmul.f32 %v2506_v53, %v2292_v15  ;;  %v1840_v57 = vsub.f32 1.0, %v2506_v53  ;;  %v918_v15 = vsub.f32 1.0, %v2996_v3 }
 0xcf0   :  { %v2508_v17 = vpop.eup %2507  ;;  %v369_v53 = vrot.slane %v2778_v29, %v2734_v33  ;;  %v2413_v29 = vld [vmem:[%s3256_s5] sm:$0xff]  }
 0xcf1   :  { %v1835_v20 = vmul.f32 %v2508_v17, %v1831_v12  ;;  %v1836_v1 = vadd.f32 %v1834_v61, %v3012_v30  ;;  %v1861_v0 = vmul.f32 %v2508_v17, %v2293_v60  ;;  %v1291_v30 = vrot.slane %v3021_v16, %v2734_v33 }
 0xcf2   :  { %v1487_v16 = vrot.slane %v3049_v7, %v2734_v33  ;;  %v1841_v34 = vsub.f32 1.0, %v2508_v17  ;;  %v1305_v7 = vld [vmem:[#allocation3] sm:$0x2]  ;;  %v752_v61 = vrot.slane %v2889_v10, %v2734_v33 }
 0xcf3   :  { %v1837_v2 = vadd.f32 %v1835_v20, %v3015_v38  ;;  %2509 = vtanh.f32 %v1836_v1  ;;  %v1298_v38 = vrot.slane %v3023_v51, %v2734_v33  ;;  %v1494_v51 = vrot.slane %v3051_v52, %v2734_v33 }
 0xcf4   :  { %v2576_v1 = vmov 0.0  }
 0xcf5   :  { %2511 = vtanh.f32 %v1837_v2  ;;  %2313 = vmatprep.subr.bf16.mxu0 %v2576_v1  ;;  %v2414_v2 = vld [vmem:[%s3256_s5 + $0x8] sm:$0xff]   ;;  %2329 = vmatprep.mubr.msk.bf16.mxu0 %vm2577_vm12, %v2576_v1 }
 0xcf6   :  { %2513 = vtanh.f32 %v913_v21  ;;  %2314 = vmatpush3.bf16.msra.mxu0 %v2413_v29  ;;  %v2294_v29 = vld [vmem:[%s3257_s6] ss:$0 sm:$0xff]  ;;  %s2525_s6 = scalar_lea.vmem %s2093_s3, 128 }
 0xcf7   :  { %2515 = vtanh.f32 %v914_v56  ;;  %2315 = vmatprep.subr.bf16.mxu0 %v2576_v1  ;;  %v564_v56 = vrot.slane %v2807_v32, %v2734_v33  ;;  %v2417_v32 = vld [vmem:[%s3256_s5 + $0x20] sm:$0xff]   ;;  %p2526_p0 = scmp.ne.s32.totalorder %s2093_s3, %s2525_s6  ;;  %p2531_p2 = scmp.lt.s32.totalorder %s2525_s6, %s2525_s6 }
 0xcf9   :  { %p2532_p3 = por %p2531_p2, %p2530_p1 }
 0xcfa   :  { %2316 = vmatpush3.bf16.msra.mxu0 %v2414_v2 }
 0xcfb   :  { %2317 = vmatprep.subr.bf16.mxu0 %v2576_v1  ;;  %p2533_p4 = pnand %p2532_p3, %p2526_p0 }
 0xcfd   :  { %v2510_v42 = vpop.eup %2509 }
 0xcfe   :  { %1844 = vrot.lane.b32.xlu0 %v2510_v42, %s2575_s16  ;;  %v557_v42 = vrot.slane %v2809_v36, %v2734_v33 }
 0xcff   :  { %v2512_v22 = vpop.eup %2511 }
 0xd00   :  { %1846 = vrot.lane.b32.xlu1 %v2512_v22, %s2575_s16  ;;  %v2514_v4 = vpop.eup %2513  ;;  %v2415_v22 = vld [vmem:[%s3256_s5 + $0x10] sm:$0xff]  }
 0xd01   :  { %v2516_v8 = vpop.eup %2515  ;;  %2318 = vmatpush3.bf16.msra.mxu0 %v2415_v22 }
 0xd02   :  { %1299 = vrot.lane.b32.xlu0 %v1291_v30, %s2575_s16  ;;  %2319 = vmatprep.subr.bf16.mxu0 %v2576_v1 }
 0xd04   :  { %1301 = vrot.lane.b32.xlu1 %v1298_v38, %s2575_s16  ;;  %v2416_v38 = vld [vmem:[%s3256_s5 + $0x18] sm:$0xff]  }
 0xd05   :  { %2320 = vmatpush3.bf16.msra.mxu0 %v2416_v38 }
 0xd06   :  { %1689 = vrot.lane.b32.xlu0 %v1681_v14, %s2575_s16  ;;  %2321 = vmatprep.subr.bf16.mxu0 %v2576_v1  ;;  %v2418_v14 = vld [vmem:[%s3256_s5 + $0x28] sm:$0xff]  }
 0xd08   :  { %1691 = vrot.lane.b32.xlu1 %v1688_v9, %s2575_s16  ;;  %v2419_v9 = vld [vmem:[%s3256_s5 + $0x30] sm:$0xff]  }
 0xd09   :  { %2322 = vmatpush3.bf16.msra.mxu0 %v2417_v32 }
 0xd0a   :  { %921 = vrot.lane.b32.xlu0 %v2514_v4, %s2575_s16  ;;  %2323 = vmatprep.subr.bf16.mxu0 %v2576_v1  ;;  %v2420_v4 = vld [vmem:[%s3256_s5 + $0x38] sm:$0xff]  }
 0xd0c   :  { %923 = vrot.lane.b32.xlu1 %v2516_v8, %s2575_s16 }
 0xd0d   :  { %2324 = vmatpush3.bf16.msra.mxu0 %v2418_v14 }
 0xd0e   :  { %1495 = vrot.lane.b32.xlu0 %v1487_v16, %s2575_s16  ;;  %2325 = vmatprep.subr.bf16.mxu0 %v2576_v1 }
 0xd10   :  { %1497 = vrot.lane.b32.xlu1 %v1494_v51, %s2575_s16 }
 0xd11   :  { %2326 = vmatpush3.bf16.msra.mxu0 %v2419_v9 }
 0xd12   :  { %2327 = vmatprep.subr.bf16.mxu0 %v2576_v1 }
 0xd15   :  { %2328 = vmatpush3.bf16.msra.mxu0 %v2420_v4 }
 0xd70   :  { %v1845_v48 = vpop.permute.xlu0 %1844 }
 0xd71   :  { %v1850_v6 = vmul.f32 %v1845_v48, %v1840_v57 }
 0xd72   :  { %v1847_v58 = vpop.permute.xlu1 %1846 }
 0xd73   :  { %v1862_v59 = vadd.f32 %v1860_v62, %v1850_v6  ;;  %v1851_v24 = vmul.f32 %v1847_v58, %v1841_v34  ;;  %v379_v34 = vld [vmem:[#allocation2] sm:$0x1] }
 0xd74   :  { %v1300_v52 = vpop.permute.xlu0 %1299 }
 0xd75   :  { %v1864_v26 = vpack.c.bf16 %v1862_v59, %v1862_v59  ;;  %v1863_v27 = vadd.f32 %v1861_v0, %v1851_v24  ;;  %v1306_v28 = vsel %vm3106_vm4, %v1300_v52, %v1305_v7  ;;  %v382_v59 = vld [vmem:[#allocation2 + $0x2] sm:$0x1] }
 0xd76   :  { %1307 = vst [vmem:[#allocation3] sm:$0x2] %v1306_v28  ;;  %v1302_v31 = vpop.permute.xlu1 %1301  ;;  %v772_v28 = vld [vmem:[#allocation2 + $0x2] sm:$0x2] }
 0xd77   :  { %v1865_v39 = vpack.c.bf16 %v1863_v27, %v1863_v27  ;;  %v1309_v43 = vsel %vm3106_vm4, %v1302_v31, %v1308_v25  ;;  %v1874_v44 = vrot.slane %v1864_v26, %v2734_v33  ;;  %v769_v25 = vld [vmem:[#allocation2] sm:$0x2] }
 0xd78   :  { %1310 = vst [vmem:[#allocation3 + $0x2] sm:$0x2] %v1309_v43  ;;  %v1690_v45 = vpop.permute.xlu0 %1689 }
 0xd79   :  { %v1696_v47 = vsel %vm3113_vm7, %v1690_v45, %v1695_v41  ;;  %1882 = vrot.lane.b32.xlu0 %v1874_v44, %s2575_s16  ;;  %v1881_v11 = vrot.slane %v1865_v39, %v2734_v33 }
 0xd7a   :  { %1697 = vst [vmem:[#allocation3] sm:$0x1] %v1696_v47  ;;  %v1692_v54 = vpop.permute.xlu1 %1691 }
 0xd7b   :  { %v1699_v50 = vsel %vm3113_vm7, %v1692_v54, %v1698_v46  ;;  %1884 = vrot.lane.b32.xlu1 %v1881_v11, %s2575_s16 }
 0xd7c   :  { %1700 = vst [vmem:[#allocation3 + $0x2] sm:$0x1] %v1699_v50  ;;  %v922_v35 = vpop.permute.xlu0 %921 }
 0xd7d   :  { %v927_v13 = vmul.f32 %v922_v35, %v917_v55  ;;  %370 = vrot.lane.b32.xlu0 %v362_v19, %s2575_s16  ;;  %v1501_v62 = vld [vmem:[#allocation3] sm:$0x2] }
 0xd7e   :  { %v924_v60 = vpop.permute.xlu1 %923 }
 0xd7f   :  { %v937_v63 = vadd.f32 %v3002_v5, %v927_v13  ;;  %v928_v37 = vmul.f32 %v924_v60, %v918_v15  ;;  %372 = vrot.lane.b32.xlu1 %v369_v53, %s2575_s16  ;;  %v759_v5 = vrot.slane %v2893_v49, %v2734_v33  ;;  %v1504_v10 = vld [vmem:[#allocation3 + $0x2] sm:$0x2] }
 0xd80   :  { %v1496_v17 = vpop.permute.xlu0 %1495 }
 0xd81   :  { %v938_v3 = vadd.f32 %v3008_v18, %v928_v37  ;;  %v1502_v20 = vsel %vm3135_vm9, %v1496_v17, %v1501_v62  ;;  %760 = vrot.lane.b32.xlu0 %v752_v61, %s2575_s16  ;;  %v939_v21 = vpack.c.bf16 %v937_v63, %v937_v63  ;;  %v1888_v16 = vld [vmem:[#allocation3] sm:$0x1] }
 0xd82   :  { %1503 = vst [vmem:[#allocation3] sm:$0x2] %v1502_v20  ;;  %v1498_v0 = vpop.permute.xlu1 %1497 }
 0xd83   :  { %v1505_v18 = vsel %vm3135_vm9, %v1498_v0, %v1504_v10  ;;  %762 = vrot.lane.b32.xlu1 %v759_v5, %s2575_s16  ;;  %v940_v49 = vpack.c.bf16 %v938_v3, %v938_v3  ;;  %v949_v30 = vrot.slane %v939_v21, %v2734_v33  ;;  %v1891_v48 = vld [vmem:[#allocation3 + $0x2] sm:$0x1] }
 0xd84   :  { %1506 = vst [vmem:[#allocation3 + $0x2] sm:$0x2] %v1505_v18 }
 0xd85   :  { %565 = vrot.lane.b32.xlu0 %v557_v42, %s2575_s16  ;;  %v956_v36 = vrot.slane %v940_v49, %v2734_v33 }
 0xd87   :  { %567 = vrot.lane.b32.xlu1 %v564_v56, %s2575_s16 }
 0xd89   :  { %957 = vrot.lane.b32.xlu0 %v949_v30, %s2575_s16 }
 0xd8b   :  { %959 = vrot.lane.b32.xlu1 %v956_v36, %s2575_s16 }
 0xdeb   :  { %v1883_v51 = vpop.permute.xlu0 %1882 }
 0xdec   :  { %v1889_v57 = vsel %vm3187_vm11, %v1883_v51, %v1888_v16 }
 0xded   :  { %1890 = vst [vmem:[#allocation3] sm:$0x1] %v1889_v57  ;;  %v1885_v6 = vpop.permute.xlu1 %1884 }
 0xdee   :  { %v1892_v58 = vsel %vm3187_vm11, %v1885_v6, %v1891_v48 }
 0xdef   :  { %1893 = vst [vmem:[#allocation3 + $0x2] sm:$0x1] %v1892_v58  ;;  %v371_v7 = vpop.permute.xlu0 %370 }
 0xdf0   :  { %v380_v24 = vsel %vm3187_vm11, %v371_v7, %v379_v34 }
 0xdf1   :  { %381 = vst [vmem:[#allocation2] sm:$0x1] %v380_v24  ;;  %v373_v52 = vpop.permute.xlu1 %372 }
 0xdf2   :  { %v383_v26 = vsel %vm3187_vm11, %v373_v52, %v382_v59 }
 0xdf3   :  { %384 = vst [vmem:[#allocation2 + $0x2] sm:$0x1] %v383_v26  ;;  %v761_v27 = vpop.permute.xlu0 %760 }
 0xdf4   :  { %v770_v31 = vsel %vm3135_vm9, %v761_v27, %v769_v25  ;;  %v1896_v43 = vld [vmem:[#allocation3] sm:$0x3] }
 0xdf5   :  { %771 = vst [vmem:[#allocation2] sm:$0x2] %v770_v31  ;;  %v763_v41 = vpop.permute.xlu1 %762 }
 0xdf6   :  { %v773_v39 = vsel %vm3135_vm9, %v763_v41, %v772_v28  ;;  %v1897_v44 = vld [vmem:[#allocation3 + $0x2] sm:$0x3] }
 0xdf7   :  { %774 = vst [vmem:[#allocation2 + $0x2] sm:$0x2] %v773_v39  ;;  %v566_v45 = vpop.permute.xlu0 %565  ;;  %v1910_v46 = vcombine.low %v1896_v43, %v1897_v44 }
 0xdf8   :  { %v573_v47 = vld [vmem:[#allocation2] sm:$0x1] }
 0xdf9   :  { %v574_v11 = vsel %vm3113_vm7, %v566_v45, %v573_v47  ;;  %v568_v54 = vpop.permute.xlu1 %567  ;;  %v1917_v50 = vrot.slane %v1910_v46, %v2734_v33 }
 0xdfa   :  { %575 = vst [vmem:[#allocation2] sm:$0x1] %v574_v11  ;;  %v576_v55 = vld [vmem:[#allocation2 + $0x2] sm:$0x1] }
 0xdfb   :  { %v577_v19 = vsel %vm3113_vm7, %v568_v54, %v576_v55  ;;  %1918 = vrot.lane.b32.xlu0 %v1917_v50, %s2575_s16  ;;  %v958_v35 = vpop.permute.xlu0 %957 }
 0xdfc   :  { %578 = vst [vmem:[#allocation2 + $0x2] sm:$0x1] %v577_v19  ;;  %v965_v13 = vld [vmem:[#allocation2] sm:$0x2] }
 0xdfd   :  { %v966_v15 = vsel %vm3106_vm4, %v958_v35, %v965_v13  ;;  %v960_v53 = vpop.permute.xlu1 %959 }
 0xdfe   :  { %967 = vst [vmem:[#allocation2] sm:$0x2] %v966_v15  ;;  %v968_v60 = vld [vmem:[#allocation2 + $0x2] sm:$0x2] }
 0xdff   :  { %v969_v12 = vsel %vm3106_vm4, %v960_v53, %v968_v60 }
 0xe00   :  { %970 = vst [vmem:[#allocation2 + $0x2] sm:$0x2] %v969_v12 }
 0xe05   :  { %v1894_v37 = vld [vmem:[#allocation2] sm:$0x3] }
 0xe07   :  { %v1895_v63 = vld [vmem:[#allocation2 + $0x2] sm:$0x3] }
 0xe08   :  { %v1900_v61 = vcombine.low %v1894_v37, %v1895_v63 }
 0xe0a   :  { %v1907_v40 = vrot.slane %v1900_v61, %v2734_v33 }
 0xe6d   :  { %v1919_v62 = vpop.permute.xlu0 %1918 }
 0xe6e   :  { %v1922_v17 = vsel %vm259_vm1, %v1907_v40, %v1919_v62 }
 0xe6f   :  { %2330 = vmatmul.mubr.bf16.vlgmr.msra.gmra.mrb[12].mxu0 %v1922_v17 }
 0xf42   :  { %v2029_v3 = vpop.f32.mrb[12].mxu0 }
 0xf43   :  { %v2030_v20 = vadd.f32 %v2294_v29, %v2029_v3  ;;  %v2331_v5 = vpop.f32.mrb[13].mxu0 }
 0xf44   :  { %v2032_v1 = vpop.f32.mrb[14].mxu0 }
 0xf45   :  { %v2303_v23 = vmul.f32 -1.442695, %v2030_v20  ;;  %v2332_v10 = vpop.f32.mrb[15].mxu0 }
 0xf47   :  { %2517 = vpow2.f32 %v2303_v23 }
 0xf51   :  { %v2518_v0 = vpop.eup %2517 }
 0xf52   :  { %v2038_v2 = vadd.f32 1.0, %v2518_v0 }
 0xf54   :  { %2519 = vrcp.f32 %v2038_v2 }
 0xf5e   :  { %v2520_v33 = vpop.eup %2519 }
 0xf5f   :  { %v2042_v21 = vcombine.high %v2520_v33, %v2520_v33  ;;  %2045 = vst.msk [vmem:[#allocation4] sm:$0xf] %vm2044_vm13, %v2520_v33  ;;  %v2047_v18 = vmul.f32 %v2520_v33, %v2520_v33  ;;  %v2063_v42 = vsel %vm2044_vm13, %v2520_v33, 0.0 }
 0xf60   :  { %v2064_v49 = vrot.slane %v2063_v42, 4 }
 0xf61   :  { %2046 = vst.msk [vmem:[#allocation4 + $0x4] sm:$0xf] %vm2044_vm13, %v2042_v21  ;;  %v2048_v56 = vmul.f32 %v2042_v21, %v2042_v21  ;;  %v2070_v22 = vsel %vm2044_vm13, %v2042_v21, 0.0  ;;  %v2049_v30 = vsel %vm2044_vm13, %v2047_v18, 0.0 }
 0xf62   :  { %v2071_v36 = vrot.slane %v2070_v22, 4 }
 0xf63   :  { %2536 = shalt.err (!%p2533_p4)
}
 0xf64   :  { %s2537_s29 = scalar_lea.hbm %s3258_s7, 128 }
 0xf65   :  { %p2538_p5 = scmp.ne.s32.totalorder %s3258_s7, %s2537_s29  ;;  %p2541_p6 = scmp.lt.u32.totalorder %s2537_s29, %s3258_s7 }
 0xf67   :  { %p2543_p7 = pnand %p2541_p6, %p2538_p5 }
 0xf69   :  { %2546 = shalt.err (!%p2543_p7)
}
 0xf6a   :  { %s2579_s4 = smov 4   ;;  %v2065_v38 = vadd.f32 %v2064_v49, %v2063_v42  ;;  %v2050_v32 = vrot.slane %v2049_v30, 4  ;;  %v2056_v14 = vsel %vm2044_vm13, %v2048_v56, 0.0  ;;  %v2072_v9 = vadd.f32 %v2071_v36, %v2070_v22 }
 0xf6b   :  { %2098 = dma.vmem_to_hbm [thread:$0]  %s2093_s3, 128, %s3258_s7, [#allocation5], %s2575_s16, %s2575_s16, %s2579_s4   ;;  %v2057_v4 = vrot.slane %v2056_v14, 4  ;;  %vm2085_vm14 = vcmask 58368  }
 0xf6c   :  { %v2066_v8 = vrot.slane %v2065_v38, 2  ;;  %v2073_v16 = vrot.slane %v2072_v9, 2  ;;  %v2051_v57 = vadd.f32 %v2050_v32, %v2049_v30  ;;  %s2580_s7 = smov [#allocation6]  }
 0xf6d   :  { %v2058_v48 = vadd.f32 %v2057_v4, %v2056_v14  ;;  %s2105_s16 = sshll.u32 %s2580_s7, 4  ;;  %s2106_s16 = int_to_ptr.vmem [resolvable:$true] %s2105_s16 }
 0xf6e   :  { %v2067_v51 = vadd.f32 %v2066_v8, %v2065_v38  ;;  %v2074_v6 = vadd.f32 %v2073_v16, %v2072_v9  ;;  %v2052_v59 = vrot.slane %v2051_v57, 2  ;;  %s2547_s13 = scalar_lea.vmem %s2106_s16, 32  ;;  %p2552_p9 = scmp.lt.s32.totalorder %s2106_s16, %s2106_s16 }
 0xf6f   :  { %v2059_v24 = vrot.slane %v2058_v48, 2  ;;  %p2548_p8 = scmp.ne.s32.totalorder %s2106_s16, %s2547_s13  ;;  %p2553_p10 = scmp.lt.s32.totalorder %s2547_s13, %s2547_s13 }
 0xf70   :  { %v2068_v34 = vrot.slane %v2067_v51, 1  ;;  %v2075_v58 = vrot.slane %v2074_v6, 1  ;;  %v2053_v25 = vadd.f32 %v2052_v59, %v2051_v57 }
 0xf71   :  { %v2060_v26 = vadd.f32 %v2059_v24, %v2058_v48  ;;  %p2554_p11 = por %p2553_p10, %p2552_p9 }
 0xf72   :  { %v2069_v7 = vadd.f32 %v2068_v34, %v2067_v51  ;;  %v2076_v52 = vadd.f32 %v2075_v58, %v2074_v6  ;;  %v2054_v27 = vrot.slane %v2053_v25, 1 }
 0xf73   :  { %v2061_v28 = vrot.slane %v2060_v26, 1  ;;  %p2555_p12 = pnand %p2554_p11, %p2548_p8 }
 0xf74   :  { %2521 = vrcp.f32 %v2069_v7  ;;  %v2055_v41 = vadd.f32 %v2054_v27, %v2053_v25 }
 0xf75   :  { %2523 = vrcp.f32 %v2076_v52  ;;  %v2062_v39 = vadd.f32 %v2061_v28, %v2060_v26 }
 0xf7e   :  { %v2522_v31 = vpop.eup %2521 }
 0xf7f   :  { %v2524_v43 = vpop.eup %2523  ;;  %v2078_v44 = vmul.f32 %v2522_v31, %v2055_v41 }
 0xf80   :  { %v2080_v45 = vmul.f32 %v2524_v43, %v2062_v39 }
 0xf82   :  { %v2083_v46 = vsel %vm408_vm0, %v2080_v45, %v2078_v44 }
 0xf83   :  { %2086 = vst.msk [vmem:[#allocation6] sm:$0x3] %vm2085_vm14, %v2083_v46 }
 0xf84   :  { %2558 = shalt.err (!%p2555_p12)
}
 0xf85   :  { %s2559_s15 = scalar_lea.hbm %s3259_s8, 32 }
 0xf86   :  { %p2560_p13 = scmp.ne.s32.totalorder %s3259_s8, %s2559_s15  ;;  %p2563_p0 = scmp.lt.u32.totalorder %s2559_s15, %s3259_s8 }
 0xf88   :  { %p2565_p1 = pnand %p2563_p0, %p2560_p13 }
 0xf8a   :  { %2568 = shalt.err (!%p2565_p1)
}
 0xf8b   :  { %2108 = dma.vmem_to_hbm [thread:$0]  %s2106_s16, 32, %s3259_s8, [#allocation7]  }
 0xf8c   :  { %2569 = dma.done.wait [#allocation5], 128  }
 0xf8d   :  { %2570 = vsyncadd [#allocation5], 4294967168 }
 0xf8e   :  { %2571 = dma.done.wait [#allocation7], 32  }
 0xf8f   :  { %2572 = vsyncadd [#allocation7], 4294967264 }
 0xf90   :  { %2115 = vsyncpa [#allocation5], 1 }
 0xf91   :  { %2116 = vsyncpa [#allocation7], 1 }

</bundles_post_ra>
